<compile_context>
chip_gen: v7x
topology: tpu7x:2x2x1
jax: 0.10.0
libtpu: 0.0.40
codegen_flags: <defaults>
</compile_context>

<pallas_src>
import math

import jax
import jax.numpy as jnp
from jax.experimental import pallas as pl
from jax.experimental.pallas import tpu as pltpu

C = 16       # fixed by the module: BatchNorm2d(16), Conv1d(16, 16, ...)
EPS = 1e-5   # BatchNorm2d default eps


def _sigmoid(x):
    return 1.0 / (1.0 + jnp.exp(-x))


def _conv1d(x_cl, w, b, pad):
    """x_cl: (C, L), w: (Cout, Cin, K), b: (Cout, 1).  torch.nn.Conv1d
    (cross-correlation, zero padding) semantics, K static unrolled MXU taps.
    Perf-irrelevant here (review: do not over-optimize the 16x16 convs)."""
    c, L = x_cl.shape
    K = w.shape[-1]
    zeros = jnp.zeros((c, pad), jnp.float32)
    xp = jnp.concatenate([zeros, x_cl, zeros], axis=1)   # (C, L + 2*pad)
    out = jnp.zeros((c, L), jnp.float32)
    for k in range(K):                                   # static unrolled taps
        out = out + jnp.dot(w[:, :, k], xp[:, k:k + L],
                            preferred_element_type=jnp.float32)
    return out + b


def tfattn3_branch_kernel(at_in_ref, af_in_ref,
                          wt1_ref, bt1_ref, wt2_ref, bt2_ref,
                          wf1_ref, bf1_ref, wf2_ref, bf2_ref,
                          at_out_ref, af_out_ref):
    """Conv branches on the tiny BN-folded per-axis means (one batch/step)."""
    a_t = at_in_ref[0]                      # (C, T) = mean over F of bn(x)
    a_f = af_in_ref[0]                      # (C, F) = mean over T of bn(x)

    # temporal branch: Conv1d(k=3, p=1) + ReLU -> Conv1d(k=3, p=1) + Sigmoid
    a_t = jnp.maximum(_conv1d(a_t, wt1_ref[...], bt1_ref[...], 1), 0.0)
    a_t = _sigmoid(_conv1d(a_t, wt2_ref[...], bt2_ref[...], 1))

    # frequency branch: Conv1d(k=5, p=2) + ReLU -> Conv1d(k=5, p=2) + Sigmoid
    a_f = jnp.maximum(_conv1d(a_f, wf1_ref[...], bf1_ref[...], 2), 0.0)
    a_f = _sigmoid(_conv1d(a_f, wf2_ref[...], bf2_ref[...], 2))

    at_out_ref[0] = a_t
    af_out_ref[0] = a_f


def tfattn3_apply_kernel(x_ref, at_ref, af_ref, scale_ref, shift_ref,
                         fft_ref, ff_ref, ft_ref):
    """Pure elementwise pass on a (1, C, tf, tt) tile: BN affine + 3 products."""
    x = x_ref[0]                            # (C, tf, tt)
    scale = scale_ref[...][:, :, None]      # (C, 1, 1)
    shift = shift_ref[...][:, :, None]      # (C, 1, 1)
    xn = x * scale + shift                  # BatchNorm2d (stats folded outside)

    a_t = at_ref[0][:, None, :]             # (C, 1, tt)
    a_f = af_ref[0][:, :, None]             # (C, tf, 1)

    ff = xn * a_f                           # f_f  (a_f broadcast over T)
    ff_ref[0] = ff
    ft_ref[0] = xn * a_t                    # f_t  (a_t broadcast over F)
    fft_ref[0] = ff * a_t                   # f_ft = xn*a_f*a_t (reuse ff)


def _pick_tiles(Fdim, T, budget_elems=32768):
    """Choose (tf, tt) so a (C, tf, tt) f32 block is ~<=2 MiB (1 input + 3
    outputs double-buffered stays well under scoped VMEM on v5e/v6e/v7x) and
    every BlockSpec dim is either a multiple of (8, 128) or the full extent."""
    if Fdim * T <= budget_elems:
        return Fdim, T                      # whole per-batch (F, T) slab
    tt = T if T <= 512 else 512             # lane axis: big, 128-aligned tiles
    max_tf = max(1, budget_elems // tt)
    if Fdim <= max_tf:
        return Fdim, tt
    tf = (max_tf // 128) * 128              # a_f lane axis needs tf % 128 == 0
    if tf == 0:
        tf, tt = 128, 256
    return tf, tt


@jax.jit
def tfattn3_forward(x, params):
    B, c, Fdim, T = x.shape
    assert c == C
    x = x.astype(jnp.float32)
    gamma = params["gamma"].astype(jnp.float32)
    beta = params["beta"].astype(jnp.float32)

    # ---- tiny plain-JAX glue: train-mode BN batch stats (biased var) and the
    #      per-axis means, computed in a single fused streaming pass over x.
    m_f = jnp.mean(x, axis=2)               # (B, C, T): mean over F
    m_t = jnp.mean(x, axis=3)               # (B, C, F): mean over T
    mean = jnp.mean(m_f, axis=(0, 2))       # (C,) == mean over (B, F, T)
    ex2 = jnp.mean(x * x, axis=(0, 2, 3))   # (C,)
    var = ex2 - mean * mean                 # biased, matches PyTorch train BN
    inv = gamma * jax.lax.rsqrt(var + EPS)
    shift_vec = beta - mean * inv
    scale = inv.reshape(c, 1)
    shift = shift_vec.reshape(c, 1)

    # BN affine commutes with the F/T means: these ARE mean_F(bn(x)), mean_T(bn(x)).
    at_pre = m_f * inv[None, :, None] + shift_vec[None, :, None]   # (B, C, T)
    af_pre = m_t * inv[None, :, None] + shift_vec[None, :, None]   # (B, C, F)

    def const_spec(shape):
        n = len(shape)
        return pl.BlockSpec(shape, lambda *_: (0,) * n)

    # ---- kernel 1: conv branches on the tiny attention vectors --------------
    branch_args = (
        at_pre, af_pre,
        params["wt1"].astype(jnp.float32), params["bt1"].reshape(c, 1).astype(jnp.float32),
        params["wt2"].astype(jnp.float32), params["bt2"].reshape(c, 1).astype(jnp.float32),
        params["wf1"].astype(jnp.float32), params["bf1"].reshape(c, 1).astype(jnp.float32),
        params["wf2"].astype(jnp.float32), params["bf2"].reshape(c, 1).astype(jnp.float32),
    )
    a_t, a_f = pl.pallas_call(
        tfattn3_branch_kernel,
        out_shape=(jax.ShapeDtypeStruct((B, c, T), jnp.float32),
                   jax.ShapeDtypeStruct((B, c, Fdim), jnp.float32)),
        grid=(B,),
        in_specs=[pl.BlockSpec((1, c, T), lambda b: (b, 0, 0)),
                  pl.BlockSpec((1, c, Fdim), lambda b: (b, 0, 0))]
                 + [const_spec(a.shape) for a in branch_args[2:]],
        out_specs=(pl.BlockSpec((1, c, T), lambda b: (b, 0, 0)),
                   pl.BlockSpec((1, c, Fdim), lambda b: (b, 0, 0))),
        compiler_params=pltpu.CompilerParams(
            dimension_semantics=("parallel",)),
    )(*branch_args)

    # ---- kernel 2: heavy elementwise pass, tiled over (B, F, T) --------------
    tf, tt = _pick_tiles(Fdim, T)
    grid = (B, pl.cdiv(Fdim, tf), pl.cdiv(T, tt))
    block_bytes = c * tf * tt * 4
    vmem_limit = int(min(48 * 2**20, max(32 * 2**20, 16 * block_bytes)))
    full_bytes = B * c * Fdim * T * 4
    cost = pl.CostEstimate(
        flops=6 * B * c * Fdim * T,                     # affine + 3 products
        transcendentals=0,
        bytes_accessed=4 * full_bytes + 4 * B * c * (Fdim + T) + 8 * c * 4)

    x_spec = pl.BlockSpec((1, c, tf, tt), lambda b, i, j: (b, 0, i, j))
    out_spec = pl.BlockSpec((1, c, tf, tt), lambda b, i, j: (b, 0, i, j))
    at_spec = pl.BlockSpec((1, c, tt), lambda b, i, j: (b, 0, j))
    af_spec = pl.BlockSpec((1, c, tf), lambda b, i, j: (b, 0, i))
    cs_spec = pl.BlockSpec((c, 1), lambda b, i, j: (0, 0))

    # TODO(synk): optional bf16 outputs would cut write traffic ~37% if the
    # consumer tolerates it; kept f32 to preserve the module's numerics.
    f_ft, f_f, f_t = pl.pallas_call(
        tfattn3_apply_kernel,
        out_shape=tuple(jax.ShapeDtypeStruct((B, c, Fdim, T), jnp.float32)
                        for _ in range(3)),
        grid=grid,
        in_specs=[x_spec, at_spec, af_spec, cs_spec, cs_spec],
        out_specs=(out_spec, out_spec, out_spec),
        compiler_params=pltpu.CompilerParams(
            dimension_semantics=("parallel", "parallel", "parallel"),
            vmem_limit_bytes=vmem_limit),
        cost_estimate=cost,
    )(x, a_t, a_f, scale, shift)
    return f_ft, f_f, f_t


def tfattn3_reference(x, params):
    """Pure-JAX reference mirroring the PyTorch forward (train-mode BN)."""
    gamma = params["gamma"][None, :, None, None]
    beta = params["beta"][None, :, None, None]
    mean = jnp.mean(x, axis=(0, 2, 3), keepdims=True)
    var = jnp.var(x, axis=(0, 2, 3), keepdims=True)
    xn = (x - mean) / jnp.sqrt(var + EPS) * gamma + beta

    a_t = jnp.mean(xn, axis=2)          # (B, C, T)
    a_f = jnp.mean(xn, axis=3)          # (B, C, F)

    def conv1d(a, w, b, pad):
        K = w.shape[-1]
        L = a.shape[-1]
        ap = jnp.pad(a, ((0, 0), (0, 0), (pad, pad)))
        out = jnp.zeros_like(a)
        for k in range(K):
            out = out + jnp.einsum("oi,bil->bol", w[:, :, k], ap[:, :, k:k + L])
        return out + b[None, :, None]

    a_t = jax.nn.relu(conv1d(a_t, params["wt1"], params["bt1"], 1))
    a_t = jax.nn.sigmoid(conv1d(a_t, params["wt2"], params["bt2"], 1))
    a_f = jax.nn.relu(conv1d(a_f, params["wf1"], params["bf1"], 2))
    a_f = jax.nn.sigmoid(conv1d(a_f, params["wf2"], params["bf2"], 2))

    a_t = a_t[:, :, None, :]            # (B, C, 1, T)
    a_f = a_f[:, :, :, None]            # (B, C, F, 1)
    a_ft = a_t * a_f
    return xn * a_ft, xn * a_f, xn * a_t


def _make_params(key):
    keys = jax.random.split(key, 8)

    def conv_init(kw, kb, ksize):
        bound = 1.0 / math.sqrt(C * ksize)
        w = jax.random.uniform(kw, (C, C, ksize), jnp.float32, -bound, bound)
        b = jax.random.uniform(kb, (C,), jnp.float32, -bound, bound)
        return w, b

    wt1, bt1 = conv_init(keys[0], keys[1], 3)
    wt2, bt2 = conv_init(keys[2], keys[3], 3)
    wf1, bf1 = conv_init(keys[4], keys[5], 5)
    wf2, bf2 = conv_init(keys[6], keys[7], 5)
    return dict(
        gamma=jnp.ones((C,), jnp.float32),   # BatchNorm2d default init
        beta=jnp.zeros((C,), jnp.float32),
        wt1=wt1, bt1=bt1, wt2=wt2, bt2=bt2,
        wf1=wf1, bf1=bf1, wf2=wf2, bf2=bf2,
    )


def _check(x, params, atol, rtol):
    f_ft, f_f, f_t = jax.block_until_ready(tfattn3_forward(x, params))
    r_ft, r_f, r_t = tfattn3_reference(x, params)
    assert jnp.allclose(f_ft, r_ft, atol=atol, rtol=rtol)
    assert jnp.allclose(f_f, r_f, atol=atol, rtol=rtol)
    assert jnp.allclose(f_t, r_t, atol=atol, rtol=rtol)


if __name__ == "__main__":
    key = jax.random.PRNGKey(0)
    kp, k1, k2 = jax.random.split(key, 3)
    params = _make_params(kp)

    # small shape (single-tile path)
    x_small = jax.random.normal(k1, (2, C, 16, 16), jnp.float32)
    _check(x_small, params, atol=1e-4, rtol=1e-4)

    # larger shape exercising the tiled (B, F, T) grid with lane-dense blocks
    x_big = jax.random.normal(k2, (2, C, 40, 1024), jnp.float32)
    _check(x_big, params, atol=5e-4, rtol=5e-4)

    print("KERNEL_OK")
</pallas_src>

<mosaic_0001>
module attributes {stable_mosaic.version = 11 : i64} {
  func.func @tfattn3_branch_kernel(%arg0: i32, %arg1: memref<1x16x16xf32, #tpu.memory_space<vmem>>, %arg2: memref<1x16x16xf32, #tpu.memory_space<vmem>>, %arg3: memref<16x16x3xf32, #tpu.memory_space<vmem>>, %arg4: memref<16x1xf32, #tpu.memory_space<vmem>>, %arg5: memref<16x16x3xf32, #tpu.memory_space<vmem>>, %arg6: memref<16x1xf32, #tpu.memory_space<vmem>>, %arg7: memref<16x16x5xf32, #tpu.memory_space<vmem>>, %arg8: memref<16x1xf32, #tpu.memory_space<vmem>>, %arg9: memref<16x16x5xf32, #tpu.memory_space<vmem>>, %arg10: memref<16x1xf32, #tpu.memory_space<vmem>>, %arg11: memref<1x16x16xf32, #tpu.memory_space<vmem>>, %arg12: memref<1x16x16xf32, #tpu.memory_space<vmem>>) attributes {dimension_semantics = [#tpu.dimension_semantics<parallel>], iteration_bounds = array<i64: 2>, scalar_prefetch = 0 : i64, scratch_operands = 0 : i64, tpu.core_type = #tpu.core_type<tc>, window_params = [{transform_indices = @transform_0, window_bounds = array<i64: 1, 16, 16>}, {transform_indices = @transform_1, window_bounds = array<i64: 1, 16, 16>}, {pipeline_mode = #tpu.pipeline_mode<synchronous>, transform_indices = @transform_2, window_bounds = array<i64: 16, 16, 3>}, {pipeline_mode = #tpu.pipeline_mode<synchronous>, transform_indices = @transform_3, window_bounds = array<i64: 16, 1>}, {pipeline_mode = #tpu.pipeline_mode<synchronous>, transform_indices = @transform_4, window_bounds = array<i64: 16, 16, 3>}, {pipeline_mode = #tpu.pipeline_mode<synchronous>, transform_indices = @transform_5, window_bounds = array<i64: 16, 1>}, {pipeline_mode = #tpu.pipeline_mode<synchronous>, transform_indices = @transform_6, window_bounds = array<i64: 16, 16, 5>}, {pipeline_mode = #tpu.pipeline_mode<synchronous>, transform_indices = @transform_7, window_bounds = array<i64: 16, 1>}, {pipeline_mode = #tpu.pipeline_mode<synchronous>, transform_indices = @transform_8, window_bounds = array<i64: 16, 16, 5>}, {pipeline_mode = #tpu.pipeline_mode<synchronous>, transform_indices = @transform_9, window_bounds = array<i64: 16, 1>}, {transform_indices = @transform_10, window_bounds = array<i64: 1, 16, 16>}, {transform_indices = @transform_11, window_bounds = array<i64: 1, 16, 16>}]} {
    %c0 = arith.constant 0 : index
    %c0_0 = arith.constant 0 : index
    %c0_1 = arith.constant 0 : index
    %0 = vector.load %arg1[%c0, %c0_0, %c0_1] : memref<1x16x16xf32, #tpu.memory_space<vmem>>, vector<1x16x16xf32>
    %1 = vector.shape_cast %0 : vector<1x16x16xf32> to vector<16x16xf32>
    %c0_2 = arith.constant 0 : index
    %c0_3 = arith.constant 0 : index
    %c0_4 = arith.constant 0 : index
    %2 = vector.load %arg2[%c0_2, %c0_3, %c0_4] : memref<1x16x16xf32, #tpu.memory_space<vmem>>, vector<1x16x16xf32>
    %3 = vector.shape_cast %2 : vector<1x16x16xf32> to vector<16x16xf32>
    %c0_5 = arith.constant 0 : index
    %c0_6 = arith.constant 0 : index
    %c0_7 = arith.constant 0 : index
    %4 = vector.load %arg3[%c0_5, %c0_6, %c0_7] : memref<16x16x3xf32, #tpu.memory_space<vmem>>, vector<16x16x3xf32>
    %c0_8 = arith.constant 0 : index
    %c0_9 = arith.constant 0 : index
    %5 = vector.load %arg4[%c0_8, %c0_9] : memref<16x1xf32, #tpu.memory_space<vmem>>, vector<16x1xf32>
    %cst = arith.constant 0.000000e+00 : f32
    %6 = vector.broadcast %cst : f32 to vector<16x1xf32>
    %7 = tpu.concatenate %6, %1, %6 in 1 : vector<16x1xf32>, vector<16x16xf32>, vector<16x1xf32> -> vector<16x18xf32>
    %cst_10 = arith.constant 0.000000e+00 : f32
    %8 = vector.broadcast %cst_10 : f32 to vector<16x16xf32>
    %9 = vector.extract_strided_slice %4 {offsets = [0, 0, 0], sizes = [16, 16, 1], strides = [1, 1, 1]} : vector<16x16x3xf32> to vector<16x16x1xf32>
    %10 = vector.shape_cast %9 : vector<16x16x1xf32> to vector<16x16xf32>
    %11 = vector.extract_strided_slice %7 {offsets = [0, 0], sizes = [16, 16], strides = [1, 1]} : vector<16x18xf32> to vector<16x16xf32>
    %cst_11 = arith.constant dense<0.000000e+00> : vector<16x16xf32>
    %12 = tpu.matmul %10, %11, %cst_11 {dimension_numbers = #tpu.dot_dimension_numbers<[1], [0], [0], [1], [0, 0, 1, 1], [], []>} : vector<16x16xf32>, vector<16x16xf32>, vector<16x16xf32> -> vector<16x16xf32>
    %13 = arith.addf %8, %12 : vector<16x16xf32>
    %14 = vector.extract_strided_slice %4 {offsets = [0, 0, 1], sizes = [16, 16, 1], strides = [1, 1, 1]} : vector<16x16x3xf32> to vector<16x16x1xf32>
    %15 = vector.shape_cast %14 : vector<16x16x1xf32> to vector<16x16xf32>
    %16 = vector.extract_strided_slice %7 {offsets = [0, 1], sizes = [16, 16], strides = [1, 1]} : vector<16x18xf32> to vector<16x16xf32>
    %cst_12 = arith.constant dense<0.000000e+00> : vector<16x16xf32>
    %17 = tpu.matmul %15, %16, %cst_12 {dimension_numbers = #tpu.dot_dimension_numbers<[1], [0], [0], [1], [0, 0, 1, 1], [], []>} : vector<16x16xf32>, vector<16x16xf32>, vector<16x16xf32> -> vector<16x16xf32>
    %18 = arith.addf %13, %17 : vector<16x16xf32>
    %19 = vector.extract_strided_slice %4 {offsets = [0, 0, 2], sizes = [16, 16, 1], strides = [1, 1, 1]} : vector<16x16x3xf32> to vector<16x16x1xf32>
    %20 = vector.shape_cast %19 : vector<16x16x1xf32> to vector<16x16xf32>
    %21 = vector.extract_strided_slice %7 {offsets = [0, 2], sizes = [16, 16], strides = [1, 1]} : vector<16x18xf32> to vector<16x16xf32>
    %cst_13 = arith.constant dense<0.000000e+00> : vector<16x16xf32>
    %22 = tpu.matmul %20, %21, %cst_13 {dimension_numbers = #tpu.dot_dimension_numbers<[1], [0], [0], [1], [0, 0, 1, 1], [], []>} : vector<16x16xf32>, vector<16x16xf32>, vector<16x16xf32> -> vector<16x16xf32>
    %23 = arith.addf %18, %22 : vector<16x16xf32>
    %24 = vector.broadcast %5 : vector<16x1xf32> to vector<16x16xf32>
    %25 = arith.addf %23, %24 : vector<16x16xf32>
    %cst_14 = arith.constant 0.000000e+00 : f32
    %26 = vector.broadcast %cst_14 : f32 to vector<16x16xf32>
    %27 = arith.maximumf %25, %26 : vector<16x16xf32>
    %c0_15 = arith.constant 0 : index
    %c0_16 = arith.constant 0 : index
    %c0_17 = arith.constant 0 : index
    %28 = vector.load %arg5[%c0_15, %c0_16, %c0_17] : memref<16x16x3xf32, #tpu.memory_space<vmem>>, vector<16x16x3xf32>
    %c0_18 = arith.constant 0 : index
    %c0_19 = arith.constant 0 : index
    %29 = vector.load %arg6[%c0_18, %c0_19] : memref<16x1xf32, #tpu.memory_space<vmem>>, vector<16x1xf32>
    %cst_20 = arith.constant 0.000000e+00 : f32
    %30 = vector.broadcast %cst_20 : f32 to vector<16x1xf32>
    %31 = tpu.concatenate %30, %27, %30 in 1 : vector<16x1xf32>, vector<16x16xf32>, vector<16x1xf32> -> vector<16x18xf32>
    %cst_21 = arith.constant 0.000000e+00 : f32
    %32 = vector.broadcast %cst_21 : f32 to vector<16x16xf32>
    %33 = vector.extract_strided_slice %28 {offsets = [0, 0, 0], sizes = [16, 16, 1], strides = [1, 1, 1]} : vector<16x16x3xf32> to vector<16x16x1xf32>
    %34 = vector.shape_cast %33 : vector<16x16x1xf32> to vector<16x16xf32>
    %35 = vector.extract_strided_slice %31 {offsets = [0, 0], sizes = [16, 16], strides = [1, 1]} : vector<16x18xf32> to vector<16x16xf32>
    %cst_22 = arith.constant dense<0.000000e+00> : vector<16x16xf32>
    %36 = tpu.matmul %34, %35, %cst_22 {dimension_numbers = #tpu.dot_dimension_numbers<[1], [0], [0], [1], [0, 0, 1, 1], [], []>} : vector<16x16xf32>, vector<16x16xf32>, vector<16x16xf32> -> vector<16x16xf32>
    %37 = arith.addf %32, %36 : vector<16x16xf32>
    %38 = vector.extract_strided_slice %28 {offsets = [0, 0, 1], sizes = [16, 16, 1], strides = [1, 1, 1]} : vector<16x16x3xf32> to vector<16x16x1xf32>
    %39 = vector.shape_cast %38 : vector<16x16x1xf32> to vector<16x16xf32>
    %40 = vector.extract_strided_slice %31 {offsets = [0, 1], sizes = [16, 16], strides = [1, 1]} : vector<16x18xf32> to vector<16x16xf32>
    %cst_23 = arith.constant dense<0.000000e+00> : vector<16x16xf32>
    %41 = tpu.matmul %39, %40, %cst_23 {dimension_numbers = #tpu.dot_dimension_numbers<[1], [0], [0], [1], [0, 0, 1, 1], [], []>} : vector<16x16xf32>, vector<16x16xf32>, vector<16x16xf32> -> vector<16x16xf32>
    %42 = arith.addf %37, %41 : vector<16x16xf32>
    %43 = vector.extract_strided_slice %28 {offsets = [0, 0, 2], sizes = [16, 16, 1], strides = [1, 1, 1]} : vector<16x16x3xf32> to vector<16x16x1xf32>
    %44 = vector.shape_cast %43 : vector<16x16x1xf32> to vector<16x16xf32>
    %45 = vector.extract_strided_slice %31 {offsets = [0, 2], sizes = [16, 16], strides = [1, 1]} : vector<16x18xf32> to vector<16x16xf32>
    %cst_24 = arith.constant dense<0.000000e+00> : vector<16x16xf32>
    %46 = tpu.matmul %44, %45, %cst_24 {dimension_numbers = #tpu.dot_dimension_numbers<[1], [0], [0], [1], [0, 0, 1, 1], [], []>} : vector<16x16xf32>, vector<16x16xf32>, vector<16x16xf32> -> vector<16x16xf32>
    %47 = arith.addf %42, %46 : vector<16x16xf32>
    %48 = vector.broadcast %29 : vector<16x1xf32> to vector<16x16xf32>
    %49 = arith.addf %47, %48 : vector<16x16xf32>
    %cst_25 = arith.constant 0.000000e+00 : f32
    %50 = vector.broadcast %cst_25 : f32 to vector<16x16xf32>
    %51 = arith.subf %50, %49 : vector<16x16xf32>
    %52 = math.exp %51 : vector<16x16xf32>
    %cst_26 = arith.constant 1.000000e+00 : f32
    %53 = vector.broadcast %cst_26 : f32 to vector<16x16xf32>
    %54 = arith.addf %53, %52 : vector<16x16xf32>
    %cst_27 = arith.constant 1.000000e+00 : f32
    %55 = vector.broadcast %cst_27 : f32 to vector<16x16xf32>
    %56 = arith.divf %55, %54 : vector<16x16xf32>
    %c0_28 = arith.constant 0 : index
    %c0_29 = arith.constant 0 : index
    %c0_30 = arith.constant 0 : index
    %57 = vector.load %arg7[%c0_28, %c0_29, %c0_30] : memref<16x16x5xf32, #tpu.memory_space<vmem>>, vector<16x16x5xf32>
    %c0_31 = arith.constant 0 : index
    %c0_32 = arith.constant 0 : index
    %58 = vector.load %arg8[%c0_31, %c0_32] : memref<16x1xf32, #tpu.memory_space<vmem>>, vector<16x1xf32>
    %cst_33 = arith.constant 0.000000e+00 : f32
    %59 = vector.broadcast %cst_33 : f32 to vector<16x2xf32>
    %60 = tpu.concatenate %59, %3, %59 in 1 : vector<16x2xf32>, vector<16x16xf32>, vector<16x2xf32> -> vector<16x20xf32>
    %cst_34 = arith.constant 0.000000e+00 : f32
    %61 = vector.broadcast %cst_34 : f32 to vector<16x16xf32>
    %62 = vector.extract_strided_slice %57 {offsets = [0, 0, 0], sizes = [16, 16, 1], strides = [1, 1, 1]} : vector<16x16x5xf32> to vector<16x16x1xf32>
    %63 = vector.shape_cast %62 : vector<16x16x1xf32> to vector<16x16xf32>
    %64 = vector.extract_strided_slice %60 {offsets = [0, 0], sizes = [16, 16], strides = [1, 1]} : vector<16x20xf32> to vector<16x16xf32>
    %cst_35 = arith.constant dense<0.000000e+00> : vector<16x16xf32>
    %65 = tpu.matmul %63, %64, %cst_35 {dimension_numbers = #tpu.dot_dimension_numbers<[1], [0], [0], [1], [0, 0, 1, 1], [], []>} : vector<16x16xf32>, vector<16x16xf32>, vector<16x16xf32> -> vector<16x16xf32>
    %66 = arith.addf %61, %65 : vector<16x16xf32>
    %67 = vector.extract_strided_slice %57 {offsets = [0, 0, 1], sizes = [16, 16, 1], strides = [1, 1, 1]} : vector<16x16x5xf32> to vector<16x16x1xf32>
    %68 = vector.shape_cast %67 : vector<16x16x1xf32> to vector<16x16xf32>
    %69 = vector.extract_strided_slice %60 {offsets = [0, 1], sizes = [16, 16], strides = [1, 1]} : vector<16x20xf32> to vector<16x16xf32>
    %cst_36 = arith.constant dense<0.000000e+00> : vector<16x16xf32>
    %70 = tpu.matmul %68, %69, %cst_36 {dimension_numbers = #tpu.dot_dimension_numbers<[1], [0], [0], [1], [0, 0, 1, 1], [], []>} : vector<16x16xf32>, vector<16x16xf32>, vector<16x16xf32> -> vector<16x16xf32>
    %71 = arith.addf %66, %70 : vector<16x16xf32>
    %72 = vector.extract_strided_slice %57 {offsets = [0, 0, 2], sizes = [16, 16, 1], strides = [1, 1, 1]} : vector<16x16x5xf32> to vector<16x16x1xf32>
    %73 = vector.shape_cast %72 : vector<16x16x1xf32> to vector<16x16xf32>
    %74 = vector.extract_strided_slice %60 {offsets = [0, 2], sizes = [16, 16], strides = [1, 1]} : vector<16x20xf32> to vector<16x16xf32>
    %cst_37 = arith.constant dense<0.000000e+00> : vector<16x16xf32>
    %75 = tpu.matmul %73, %74, %cst_37 {dimension_numbers = #tpu.dot_dimension_numbers<[1], [0], [0], [1], [0, 0, 1, 1], [], []>} : vector<16x16xf32>, vector<16x16xf32>, vector<16x16xf32> -> vector<16x16xf32>
    %76 = arith.addf %71, %75 : vector<16x16xf32>
    %77 = vector.extract_strided_slice %57 {offsets = [0, 0, 3], sizes = [16, 16, 1], strides = [1, 1, 1]} : vector<16x16x5xf32> to vector<16x16x1xf32>
    %78 = vector.shape_cast %77 : vector<16x16x1xf32> to vector<16x16xf32>
    %79 = vector.extract_strided_slice %60 {offsets = [0, 3], sizes = [16, 16], strides = [1, 1]} : vector<16x20xf32> to vector<16x16xf32>
    %cst_38 = arith.constant dense<0.000000e+00> : vector<16x16xf32>
    %80 = tpu.matmul %78, %79, %cst_38 {dimension_numbers = #tpu.dot_dimension_numbers<[1], [0], [0], [1], [0, 0, 1, 1], [], []>} : vector<16x16xf32>, vector<16x16xf32>, vector<16x16xf32> -> vector<16x16xf32>
    %81 = arith.addf %76, %80 : vector<16x16xf32>
    %82 = vector.extract_strided_slice %57 {offsets = [0, 0, 4], sizes = [16, 16, 1], strides = [1, 1, 1]} : vector<16x16x5xf32> to vector<16x16x1xf32>
    %83 = vector.shape_cast %82 : vector<16x16x1xf32> to vector<16x16xf32>
    %84 = vector.extract_strided_slice %60 {offsets = [0, 4], sizes = [16, 16], strides = [1, 1]} : vector<16x20xf32> to vector<16x16xf32>
    %cst_39 = arith.constant dense<0.000000e+00> : vector<16x16xf32>
    %85 = tpu.matmul %83, %84, %cst_39 {dimension_numbers = #tpu.dot_dimension_numbers<[1], [0], [0], [1], [0, 0, 1, 1], [], []>} : vector<16x16xf32>, vector<16x16xf32>, vector<16x16xf32> -> vector<16x16xf32>
    %86 = arith.addf %81, %85 : vector<16x16xf32>
    %87 = vector.broadcast %58 : vector<16x1xf32> to vector<16x16xf32>
    %88 = arith.addf %86, %87 : vector<16x16xf32>
    %cst_40 = arith.constant 0.000000e+00 : f32
    %89 = vector.broadcast %cst_40 : f32 to vector<16x16xf32>
    %90 = arith.maximumf %88, %89 : vector<16x16xf32>
    %c0_41 = arith.constant 0 : index
    %c0_42 = arith.constant 0 : index
    %c0_43 = arith.constant 0 : index
    %91 = vector.load %arg9[%c0_41, %c0_42, %c0_43] : memref<16x16x5xf32, #tpu.memory_space<vmem>>, vector<16x16x5xf32>
    %c0_44 = arith.constant 0 : index
    %c0_45 = arith.constant 0 : index
    %92 = vector.load %arg10[%c0_44, %c0_45] : memref<16x1xf32, #tpu.memory_space<vmem>>, vector<16x1xf32>
    %cst_46 = arith.constant 0.000000e+00 : f32
    %93 = vector.broadcast %cst_46 : f32 to vector<16x2xf32>
    %94 = tpu.concatenate %93, %90, %93 in 1 : vector<16x2xf32>, vector<16x16xf32>, vector<16x2xf32> -> vector<16x20xf32>
    %cst_47 = arith.constant 0.000000e+00 : f32
    %95 = vector.broadcast %cst_47 : f32 to vector<16x16xf32>
    %96 = vector.extract_strided_slice %91 {offsets = [0, 0, 0], sizes = [16, 16, 1], strides = [1, 1, 1]} : vector<16x16x5xf32> to vector<16x16x1xf32>
    %97 = vector.shape_cast %96 : vector<16x16x1xf32> to vector<16x16xf32>
    %98 = vector.extract_strided_slice %94 {offsets = [0, 0], sizes = [16, 16], strides = [1, 1]} : vector<16x20xf32> to vector<16x16xf32>
    %cst_48 = arith.constant dense<0.000000e+00> : vector<16x16xf32>
    %99 = tpu.matmul %97, %98, %cst_48 {dimension_numbers = #tpu.dot_dimension_numbers<[1], [0], [0], [1], [0, 0, 1, 1], [], []>} : vector<16x16xf32>, vector<16x16xf32>, vector<16x16xf32> -> vector<16x16xf32>
    %100 = arith.addf %95, %99 : vector<16x16xf32>
    %101 = vector.extract_strided_slice %91 {offsets = [0, 0, 1], sizes = [16, 16, 1], strides = [1, 1, 1]} : vector<16x16x5xf32> to vector<16x16x1xf32>
    %102 = vector.shape_cast %101 : vector<16x16x1xf32> to vector<16x16xf32>
    %103 = vector.extract_strided_slice %94 {offsets = [0, 1], sizes = [16, 16], strides = [1, 1]} : vector<16x20xf32> to vector<16x16xf32>
    %cst_49 = arith.constant dense<0.000000e+00> : vector<16x16xf32>
    %104 = tpu.matmul %102, %103, %cst_49 {dimension_numbers = #tpu.dot_dimension_numbers<[1], [0], [0], [1], [0, 0, 1, 1], [], []>} : vector<16x16xf32>, vector<16x16xf32>, vector<16x16xf32> -> vector<16x16xf32>
    %105 = arith.addf %100, %104 : vector<16x16xf32>
    %106 = vector.extract_strided_slice %91 {offsets = [0, 0, 2], sizes = [16, 16, 1], strides = [1, 1, 1]} : vector<16x16x5xf32> to vector<16x16x1xf32>
    %107 = vector.shape_cast %106 : vector<16x16x1xf32> to vector<16x16xf32>
    %108 = vector.extract_strided_slice %94 {offsets = [0, 2], sizes = [16, 16], strides = [1, 1]} : vector<16x20xf32> to vector<16x16xf32>
    %cst_50 = arith.constant dense<0.000000e+00> : vector<16x16xf32>
    %109 = tpu.matmul %107, %108, %cst_50 {dimension_numbers = #tpu.dot_dimension_numbers<[1], [0], [0], [1], [0, 0, 1, 1], [], []>} : vector<16x16xf32>, vector<16x16xf32>, vector<16x16xf32> -> vector<16x16xf32>
    %110 = arith.addf %105, %109 : vector<16x16xf32>
    %111 = vector.extract_strided_slice %91 {offsets = [0, 0, 3], sizes = [16, 16, 1], strides = [1, 1, 1]} : vector<16x16x5xf32> to vector<16x16x1xf32>
    %112 = vector.shape_cast %111 : vector<16x16x1xf32> to vector<16x16xf32>
    %113 = vector.extract_strided_slice %94 {offsets = [0, 3], sizes = [16, 16], strides = [1, 1]} : vector<16x20xf32> to vector<16x16xf32>
    %cst_51 = arith.constant dense<0.000000e+00> : vector<16x16xf32>
    %114 = tpu.matmul %112, %113, %cst_51 {dimension_numbers = #tpu.dot_dimension_numbers<[1], [0], [0], [1], [0, 0, 1, 1], [], []>} : vector<16x16xf32>, vector<16x16xf32>, vector<16x16xf32> -> vector<16x16xf32>
    %115 = arith.addf %110, %114 : vector<16x16xf32>
    %116 = vector.extract_strided_slice %91 {offsets = [0, 0, 4], sizes = [16, 16, 1], strides = [1, 1, 1]} : vector<16x16x5xf32> to vector<16x16x1xf32>
    %117 = vector.shape_cast %116 : vector<16x16x1xf32> to vector<16x16xf32>
    %118 = vector.extract_strided_slice %94 {offsets = [0, 4], sizes = [16, 16], strides = [1, 1]} : vector<16x20xf32> to vector<16x16xf32>
    %cst_52 = arith.constant dense<0.000000e+00> : vector<16x16xf32>
    %119 = tpu.matmul %117, %118, %cst_52 {dimension_numbers = #tpu.dot_dimension_numbers<[1], [0], [0], [1], [0, 0, 1, 1], [], []>} : vector<16x16xf32>, vector<16x16xf32>, vector<16x16xf32> -> vector<16x16xf32>
    %120 = arith.addf %115, %119 : vector<16x16xf32>
    %121 = vector.broadcast %92 : vector<16x1xf32> to vector<16x16xf32>
    %122 = arith.addf %120, %121 : vector<16x16xf32>
    %cst_53 = arith.constant 0.000000e+00 : f32
    %123 = vector.broadcast %cst_53 : f32 to vector<16x16xf32>
    %124 = arith.subf %123, %122 : vector<16x16xf32>
    %125 = math.exp %124 : vector<16x16xf32>
    %cst_54 = arith.constant 1.000000e+00 : f32
    %126 = vector.broadcast %cst_54 : f32 to vector<16x16xf32>
    %127 = arith.addf %126, %125 : vector<16x16xf32>
    %cst_55 = arith.constant 1.000000e+00 : f32
    %128 = vector.broadcast %cst_55 : f32 to vector<16x16xf32>
    %129 = arith.divf %128, %127 : vector<16x16xf32>
    %c0_56 = arith.constant 0 : index
    %c0_57 = arith.constant 0 : index
    %c0_58 = arith.constant 0 : index
    %130 = vector.load %arg11[%c0_56, %c0_57, %c0_58] : memref<1x16x16xf32, #tpu.memory_space<vmem>>, vector<1x16x16xf32>
    %131 = vector.shape_cast %130 : vector<1x16x16xf32> to vector<16x16xf32>
    %132 = vector.shape_cast %56 : vector<16x16xf32> to vector<1x16x16xf32>
    tpu.vector_store %arg11[%c0_56, %c0_57, %c0_58], %132 {strides = array<i32>} : memref<1x16x16xf32, #tpu.memory_space<vmem>>, vector<1x16x16xf32>,
    %c0_59 = arith.constant 0 : index
    %c0_60 = arith.constant 0 : index
    %c0_61 = arith.constant 0 : index
    %133 = vector.load %arg12[%c0_59, %c0_60, %c0_61] : memref<1x16x16xf32, #tpu.memory_space<vmem>>, vector<1x16x16xf32>
    %134 = vector.shape_cast %133 : vector<1x16x16xf32> to vector<16x16xf32>
    %135 = vector.shape_cast %129 : vector<16x16xf32> to vector<1x16x16xf32>
    tpu.vector_store %arg12[%c0_59, %c0_60, %c0_61], %135 {strides = array<i32>} : memref<1x16x16xf32, #tpu.memory_space<vmem>>, vector<1x16x16xf32>,
    return
  }
  func.func @transform_0(%arg0: i32) -> (i32, i32, i32) {
    %c0_i32 = arith.constant 0 : i32
    %c0_i32_0 = arith.constant 0 : i32
    %c0_i32_1 = arith.constant 0 : i32
    return %arg0, %c0_i32, %c0_i32_0 : i32, i32, i32
  }
  func.func @transform_1(%arg0: i32) -> (i32, i32, i32) {
    %c0_i32 = arith.constant 0 : i32
    %c0_i32_0 = arith.constant 0 : i32
    %c0_i32_1 = arith.constant 0 : i32
    return %arg0, %c0_i32, %c0_i32_0 : i32, i32, i32
  }
  func.func @transform_2(%arg0: i32) -> (i32, i32, i32) {
    %c0_i32 = arith.constant 0 : i32
    %c0_i32_0 = arith.constant 0 : i32
    %c0_i32_1 = arith.constant 0 : i32
    %c0_i32_2 = arith.constant 0 : i32
    return %c0_i32, %c0_i32_0, %c0_i32_1 : i32, i32, i32
  }
  func.func @transform_3(%arg0: i32) -> (i32, i32) {
    %c0_i32 = arith.constant 0 : i32
    %c0_i32_0 = arith.constant 0 : i32
    %c0_i32_1 = arith.constant 0 : i32
    return %c0_i32, %c0_i32_0 : i32, i32
  }
  func.func @transform_4(%arg0: i32) -> (i32, i32, i32) {
    %c0_i32 = arith.constant 0 : i32
    %c0_i32_0 = arith.constant 0 : i32
    %c0_i32_1 = arith.constant 0 : i32
    %c0_i32_2 = arith.constant 0 : i32
    return %c0_i32, %c0_i32_0, %c0_i32_1 : i32, i32, i32
  }
  func.func @transform_5(%arg0: i32) -> (i32, i32) {
    %c0_i32 = arith.constant 0 : i32
    %c0_i32_0 = arith.constant 0 : i32
    %c0_i32_1 = arith.constant 0 : i32
    return %c0_i32, %c0_i32_0 : i32, i32
  }
  func.func @transform_6(%arg0: i32) -> (i32, i32, i32) {
    %c0_i32 = arith.constant 0 : i32
    %c0_i32_0 = arith.constant 0 : i32
    %c0_i32_1 = arith.constant 0 : i32
    %c0_i32_2 = arith.constant 0 : i32
    return %c0_i32, %c0_i32_0, %c0_i32_1 : i32, i32, i32
  }
  func.func @transform_7(%arg0: i32) -> (i32, i32) {
    %c0_i32 = arith.constant 0 : i32
    %c0_i32_0 = arith.constant 0 : i32
    %c0_i32_1 = arith.constant 0 : i32
    return %c0_i32, %c0_i32_0 : i32, i32
  }
  func.func @transform_8(%arg0: i32) -> (i32, i32, i32) {
    %c0_i32 = arith.constant 0 : i32
    %c0_i32_0 = arith.constant 0 : i32
    %c0_i32_1 = arith.constant 0 : i32
    %c0_i32_2 = arith.constant 0 : i32
    return %c0_i32, %c0_i32_0, %c0_i32_1 : i32, i32, i32
  }
  func.func @transform_9(%arg0: i32) -> (i32, i32) {
    %c0_i32 = arith.constant 0 : i32
    %c0_i32_0 = arith.constant 0 : i32
    %c0_i32_1 = arith.constant 0 : i32
    return %c0_i32, %c0_i32_0 : i32, i32
  }
  func.func @transform_10(%arg0: i32) -> (i32, i32, i32) {
    %c0_i32 = arith.constant 0 : i32
    %c0_i32_0 = arith.constant 0 : i32
    %c0_i32_1 = arith.constant 0 : i32
    return %arg0, %c0_i32, %c0_i32_0 : i32, i32, i32
  }
  func.func @transform_11(%arg0: i32) -> (i32, i32, i32) {
    %c0_i32 = arith.constant 0 : i32
    %c0_i32_0 = arith.constant 0 : i32
    %c0_i32_1 = arith.constant 0 : i32
    return %arg0, %c0_i32, %c0_i32_0 : i32, i32, i32
  }
}

module attributes {stable_mosaic.version = 11 : i64} {
  func.func @tfattn3_apply_kernel(%arg0: i32, %arg1: i32, %arg2: i32, %arg3: memref<1x16x16x16xf32, #tpu.memory_space<vmem>>, %arg4: memref<1x16x16xf32, #tpu.memory_space<vmem>>, %arg5: memref<1x16x16xf32, #tpu.memory_space<vmem>>, %arg6: memref<16x1xf32, #tpu.memory_space<vmem>>, %arg7: memref<16x1xf32, #tpu.memory_space<vmem>>, %arg8: memref<1x16x16x16xf32, #tpu.memory_space<vmem>>, %arg9: memref<1x16x16x16xf32, #tpu.memory_space<vmem>>, %arg10: memref<1x16x16x16xf32, #tpu.memory_space<vmem>>) attributes {dimension_semantics = [#tpu.dimension_semantics<parallel>, #tpu.dimension_semantics<parallel>, #tpu.dimension_semantics<parallel>], iteration_bounds = array<i64: 2, 1, 1>, scalar_prefetch = 0 : i64, scratch_operands = 0 : i64, tpu.core_type = #tpu.core_type<tc>, window_params = [{transform_indices = @transform_0, window_bounds = array<i64: 1, 16, 16, 16>}, {transform_indices = @transform_1, window_bounds = array<i64: 1, 16, 16>}, {transform_indices = @transform_2, window_bounds = array<i64: 1, 16, 16>}, {pipeline_mode = #tpu.pipeline_mode<synchronous>, transform_indices = @transform_3, window_bounds = array<i64: 16, 1>}, {pipeline_mode = #tpu.pipeline_mode<synchronous>, transform_indices = @transform_4, window_bounds = array<i64: 16, 1>}, {transform_indices = @transform_5, window_bounds = array<i64: 1, 16, 16, 16>}, {transform_indices = @transform_6, window_bounds = array<i64: 1, 16, 16, 16>}, {transform_indices = @transform_7, window_bounds = array<i64: 1, 16, 16, 16>}]} {
    %c0 = arith.constant 0 : index
    %c0_0 = arith.constant 0 : index
    %c0_1 = arith.constant 0 : index
    %c0_2 = arith.constant 0 : index
    %0 = vector.load %arg3[%c0, %c0_0, %c0_1, %c0_2] : memref<1x16x16x16xf32, #tpu.memory_space<vmem>>, vector<1x16x16x16xf32>
    %1 = vector.shape_cast %0 : vector<1x16x16x16xf32> to vector<16x16x16xf32>
    %c0_3 = arith.constant 0 : index
    %c0_4 = arith.constant 0 : index
    %2 = vector.load %arg6[%c0_3, %c0_4] : memref<16x1xf32, #tpu.memory_space<vmem>>, vector<16x1xf32>
    %3 = vector.shape_cast %2 : vector<16x1xf32> to vector<16x1x1xf32>
    %c0_5 = arith.constant 0 : index
    %c0_6 = arith.constant 0 : index
    %4 = vector.load %arg7[%c0_5, %c0_6] : memref<16x1xf32, #tpu.memory_space<vmem>>, vector<16x1xf32>
    %5 = vector.shape_cast %4 : vector<16x1xf32> to vector<16x1x1xf32>
    %6 = vector.broadcast %3 : vector<16x1x1xf32> to vector<16x16x16xf32>
    %7 = arith.mulf %1, %6 : vector<16x16x16xf32>
    %8 = vector.broadcast %5 : vector<16x1x1xf32> to vector<16x16x16xf32>
    %9 = arith.addf %7, %8 : vector<16x16x16xf32>
    %c0_7 = arith.constant 0 : index
    %c0_8 = arith.constant 0 : index
    %c0_9 = arith.constant 0 : index
    %10 = vector.load %arg4[%c0_7, %c0_8, %c0_9] : memref<1x16x16xf32, #tpu.memory_space<vmem>>, vector<1x16x16xf32>
    %11 = vector.shape_cast %10 : vector<1x16x16xf32> to vector<16x16xf32>
    %12 = vector.shape_cast %11 : vector<16x16xf32> to vector<16x1x16xf32>
    %c0_10 = arith.constant 0 : index
    %c0_11 = arith.constant 0 : index
    %c0_12 = arith.constant 0 : index
    %13 = vector.load %arg5[%c0_10, %c0_11, %c0_12] : memref<1x16x16xf32, #tpu.memory_space<vmem>>, vector<1x16x16xf32>
    %14 = vector.shape_cast %13 : vector<1x16x16xf32> to vector<16x16xf32>
    %15 = vector.shape_cast %14 : vector<16x16xf32> to vector<16x16x1xf32>
    %16 = vector.broadcast %15 : vector<16x16x1xf32> to vector<16x16x16xf32>
    %17 = arith.mulf %9, %16 : vector<16x16x16xf32>
    %c0_13 = arith.constant 0 : index
    %c0_14 = arith.constant 0 : index
    %c0_15 = arith.constant 0 : index
    %c0_16 = arith.constant 0 : index
    %18 = vector.load %arg9[%c0_13, %c0_14, %c0_15, %c0_16] : memref<1x16x16x16xf32, #tpu.memory_space<vmem>>, vector<1x16x16x16xf32>
    %19 = vector.shape_cast %18 : vector<1x16x16x16xf32> to vector<16x16x16xf32>
    %20 = vector.shape_cast %17 : vector<16x16x16xf32> to vector<1x16x16x16xf32>
    tpu.vector_store %arg9[%c0_13, %c0_14, %c0_15, %c0_16], %20 {strides = array<i32>} : memref<1x16x16x16xf32, #tpu.memory_space<vmem>>, vector<1x16x16x16xf32>,
    %21 = vector.broadcast %12 : vector<16x1x16xf32> to vector<16x16x16xf32>
    %22 = arith.mulf %9, %21 : vector<16x16x16xf32>
    %c0_17 = arith.constant 0 : index
    %c0_18 = arith.constant 0 : index
    %c0_19 = arith.constant 0 : index
    %c0_20 = arith.constant 0 : index
    %23 = vector.load %arg10[%c0_17, %c0_18, %c0_19, %c0_20] : memref<1x16x16x16xf32, #tpu.memory_space<vmem>>, vector<1x16x16x16xf32>
    %24 = vector.shape_cast %23 : vector<1x16x16x16xf32> to vector<16x16x16xf32>
    %25 = vector.shape_cast %22 : vector<16x16x16xf32> to vector<1x16x16x16xf32>
    tpu.vector_store %arg10[%c0_17, %c0_18, %c0_19, %c0_20], %25 {strides = array<i32>} : memref<1x16x16x16xf32, #tpu.memory_space<vmem>>, vector<1x16x16x16xf32>,
    %26 = vector.broadcast %12 : vector<16x1x16xf32> to vector<16x16x16xf32>
    %27 = arith.mulf %17, %26 : vector<16x16x16xf32>
    %c0_21 = arith.constant 0 : index
    %c0_22 = arith.constant 0 : index
    %c0_23 = arith.constant 0 : index
    %c0_24 = arith.constant 0 : index
    %28 = vector.load %arg8[%c0_21, %c0_22, %c0_23, %c0_24] : memref<1x16x16x16xf32, #tpu.memory_space<vmem>>, vector<1x16x16x16xf32>
    %29 = vector.shape_cast %28 : vector<1x16x16x16xf32> to vector<16x16x16xf32>
    %30 = vector.shape_cast %27 : vector<16x16x16xf32> to vector<1x16x16x16xf32>
    tpu.vector_store %arg8[%c0_21, %c0_22, %c0_23, %c0_24], %30 {strides = array<i32>} : memref<1x16x16x16xf32, #tpu.memory_space<vmem>>, vector<1x16x16x16xf32>,
    return
  }
  func.func @transform_0(%arg0: i32, %arg1: i32, %arg2: i32) -> (i32, i32, i32, i32) {
    %c0_i32 = arith.constant 0 : i32
    %c0_i32_0 = arith.constant 0 : i32
    return %arg0, %c0_i32, %arg1, %arg2 : i32, i32, i32, i32
  }
  func.func @transform_1(%arg0: i32, %arg1: i32, %arg2: i32) -> (i32, i32, i32) {
    %c0_i32 = arith.constant 0 : i32
    %c0_i32_0 = arith.constant 0 : i32
    return %arg0, %c0_i32, %arg2 : i32, i32, i32
  }
  func.func @transform_2(%arg0: i32, %arg1: i32, %arg2: i32) -> (i32, i32, i32) {
    %c0_i32 = arith.constant 0 : i32
    %c0_i32_0 = arith.constant 0 : i32
    return %arg0, %c0_i32, %arg1 : i32, i32, i32
  }
  func.func @transform_3(%arg0: i32, %arg1: i32, %arg2: i32) -> (i32, i32) {
    %c0_i32 = arith.constant 0 : i32
    %c0_i32_0 = arith.constant 0 : i32
    %c0_i32_1 = arith.constant 0 : i32
    return %c0_i32, %c0_i32_0 : i32, i32
  }
  func.func @transform_4(%arg0: i32, %arg1: i32, %arg2: i32) -> (i32, i32) {
    %c0_i32 = arith.constant 0 : i32
    %c0_i32_0 = arith.constant 0 : i32
    %c0_i32_1 = arith.constant 0 : i32
    return %c0_i32, %c0_i32_0 : i32, i32
  }
  func.func @transform_5(%arg0: i32, %arg1: i32, %arg2: i32) -> (i32, i32, i32, i32) {
    %c0_i32 = arith.constant 0 : i32
    %c0_i32_0 = arith.constant 0 : i32
    return %arg0, %c0_i32, %arg1, %arg2 : i32, i32, i32, i32
  }
  func.func @transform_6(%arg0: i32, %arg1: i32, %arg2: i32) -> (i32, i32, i32, i32) {
    %c0_i32 = arith.constant 0 : i32
    %c0_i32_0 = arith.constant 0 : i32
    return %arg0, %c0_i32, %arg1, %arg2 : i32, i32, i32, i32
  }
  func.func @transform_7(%arg0: i32, %arg1: i32, %arg2: i32) -> (i32, i32, i32, i32) {
    %c0_i32 = arith.constant 0 : i32
    %c0_i32_0 = arith.constant 0 : i32
    return %arg0, %c0_i32, %arg1, %arg2 : i32, i32, i32, i32
  }
}

</mosaic_0001>

<bundles_post_ra>
// kernel: tfattn3_forward.3
= control target key start
LH: loop header
LB: loop body
LE: loop exit
PB: predicated region body
PF: predicated region fallthrough
CT: control target
= control target key end

     0   :  { %s2918_s0 = inlined_call_operand.vmem [shape: f32[2,16,16,16], index: 0, kind: input, shape index: {}]   ;;  %s2919_s1 = inlined_call_operand.vmem [shape: f32[2,16,16], index: 1, kind: input, shape index: {}]   ;;  %s2920_s2 = inlined_call_operand.vmem [shape: f32[2,16,16], index: 2, kind: input, shape index: {}]   ;;  %s2921_s3 = inlined_call_operand.vmem [shape: f32[16,1], index: 3, kind: input, shape index: {}]   ;;  %s2922_s4 = inlined_call_operand.vmem [shape: f32[16,1], index: 4, kind: input, shape index: {}]   ;;  %s2923_s5 = inlined_call_operand.hbm [shape: f32[2,16,16,16], index: 5, kind: output, shape index: {0}]   ;;  %s2924_s6 = inlined_call_operand.hbm [shape: f32[2,16,16,16], index: 6, kind: output, shape index: {1}]   ;;  %s2925_s7 = inlined_call_operand.hbm [shape: f32[2,16,16,16], index: 7, kind: output, shape index: {2}]  }
   0x1   :  { %2928 = sst [smem:[#allocation9_spill]] %s2918_s0 }
   0x2   :  { %2929 = sst [smem:[#allocation10_spill]] %s2919_s1 }
   0x3   :  { %2930 = sst [smem:[#allocation11_spill]] %s2920_s2 }
   0x4   :  { %13 = vsyncpa [#allocation3], 0 }
   0x5   :  { %15 = vsyncpa [#allocation3 + $0x1], 0 }
   0x6   :  { %16 = vsyncpa [#allocation5], 0 }
   0x7   :  { %18 = vsyncpa [#allocation5 + $0x1], 0  ;;  %s2076_s24 = smov 0   ;;  %s2078_s25 = smov 0  }
   0x8   :  { %s2080_s26 = smov 0   ;;  %s2082_s27 = smov 0  }
   0x9   :  { %s2084_s28 = smov 0   ;;  %s2086_s29 = smov 0  }
   0xa LB: > { %s1783_s30 = sadd.s32 4294967295, %s2027_s29   ;;  %s2926_s8 = sadd.s32 4294967294, %s2027_s29   ;;  %s2027_s29 = sphi %s2086_s29, %s24_s29   ;;  %s2023_s28 = sphi %s2084_s28, %s2942_s28   ;;  %s2019_s27 = sphi %s2082_s27, %s2941_s27   ;;  %s2015_s26 = sphi %s2080_s26, %s2940_s26   ;;  %s2011_s25 = sphi %s2078_s25, %s2939_s25   ;;  %s2007_s24 = sphi %s2076_s24, %s2938_s24  }
   0xb   : > { %s43_s9 = sadd.s32 1, %s2023_s28  ;;  %s182_s10 = sadd.s32 1, %s2015_s26 }
   0xc   : > { %p45_p0 = scmp.ge.s32.totalorder %s43_s9, 2  ;;  %p192_p1 = scmp.ne.s32.totalorder %s2015_s26, %s2011_s25 }
   0xd   : > { %p193_p2 = scmp.eq.s32.totalorder %s1783_s30, 1  ;;  %p198_p3 = scmp.ne.s32.totalorder %s2011_s25, %s2007_s24 }
   0xe   : > { %s2944_s9 = smov (%p45_p0, %s43_s9), 0  ;;  %p199_p5 = scmp.eq.s32.totalorder %s2926_s8, 1 }
   0xf   : > { %p2118_p4 = por %p193_p2, %p192_p1  ;;  %s175_s12 = ssub.s32 %s2023_s28, %s2944_s9 }
  0x10   : > { %p1787_p6 = scmp.ge.s32.totalorder %s2027_s29, 1  ;;  %p180_p7 = scmp.eq.s32.totalorder %s175_s12, 0 }
  0x11   : > { %p2127_p8 = por %p199_p5, %p198_p3  ;;  %p321_p9 = scmp.lt.s32.totalorder %s2027_s29, 3 }
  0x12   : > { %s2133_s14 = scalar_select %p180_p7, %s2015_s26, %s182_s10  }
  0x13   : > { %p322_p10 = pnand %p1787_p6, %p321_p9 }
  0x14   : > { %v458_v0 = vlaneseq (!%p322_p10)  ;;  %v2029_v1 = vmov (!%p322_p10), 0   ;;  %v2030_v2 = vmov (!%p322_p10), 1966171168   ;;  %v450_v4 = vld [vmem:[%s2921_s3] sm:$0xff] (!%p322_p10)  ;;  %v451_v8 = vld [vmem:[%s2921_s3 + $0x8] sm:$0xff] (!%p322_p10)  ;;  %p387_p11 = scmp.lt.s32.totalorder (!%p322_p10), %s2019_s27, 1 }
  0x15   : > { %325 = sbr.rel (%p322_p10) target bundleno = 350 (0x15e), region = 40  ;;  %1883 = vset.pattern.permute.xlu0 (!%p322_p10), %v2029_v1  ;;  %v456_v3 = vunpack.c.l.s4 (!%p322_p10), %v2030_v2  ;;  %1884 = vset.pattern.permute.xlu1 (!%p322_p10), %v2029_v1  ;;  %v454_v7 = vcombine.high (!%p322_p10), %v450_v4, %v450_v4  ;;  %v503_v31 = vcombine.high (!%p322_p10), %v451_v8, %v451_v8  ;;  %v552_v42 = vld [vmem:[%s2922_s4] sm:$0xff] (!%p322_p10)  ;;  %s2933_s1 = sld [smem:[#allocation10_spill]] (!%p322_p10)  ;;  %v553_v2 = vld [vmem:[%s2922_s4 + $0x8] sm:$0xff] (!%p322_p10)  ;;  %vm1286_vm0 = vcmask (!%p322_p10), 130048  }
  0x16   : > { %v2138_v5 = vshrl.u32 (!%p322_p10), %v458_v0, 7  ;;  %v556_v50 = vcombine.high (!%p322_p10), %v552_v42, %v552_v42  ;;  %s2934_s2 = sld [smem:[#allocation11_spill]] (!%p322_p10)  ;;  %s2935_s0 = sld [smem:[#allocation9_spill]] (!%p322_p10) }
  0x17   : > { %v457_v6 = vunpack.c.0.s8 (!%p322_p10), %v456_v3  ;;  %s2754_s18 = sand.u32 (!%p322_p10), 1, %s1783_s30   ;;  %s1811_s30 = sshll.u32 (!%p322_p10), %s2019_s27, 12 }
  0x18   : > { %v2148_v11 = vsub.s32 (!%p322_p10), 0, %v2138_v5 }
  0x19   : > { %v2144_v9 = vsub.s32 (!%p322_p10), %v457_v6, %v2138_v5 }
  0x1b   : > { %v461_v10 = vrot.slane (!%p322_p10), %v450_v4, %v2144_v9  ;;  %v468_v12 = vrot.slane (!%p322_p10), %v454_v7, %v2144_v9  ;;  %v510_v13 = vrot.slane (!%p322_p10), %v451_v8, %v2144_v9  ;;  %v517_v36 = vrot.slane (!%p322_p10), %v503_v31, %v2144_v9 }
  0x1c   : > { %v563_v47 = vrot.slane %v552_v42, %v2144_v9  ;;  %s2180_s21 = scalar_select %p387_p11, %s2019_s27, 1  ;;  %v570_v56 = vrot.slane %v556_v50, %v2144_v9 }
  0x1d   : > { %v477_v14 = vrot.slane %v461_v10, %v2144_v9  ;;  %v469_v15 = vcombine.high %v461_v10, %v461_v10  ;;  %v484_v16 = vrot.slane %v468_v12, %v2144_v9  ;;  %v470_v17 = vcombine.high %v468_v12, %v468_v12 }
  0x1e   : > { %v518_v21 = vcombine.high %v510_v13, %v510_v13  ;;  %v526_v33 = vrot.slane %v510_v13, %v2144_v9  ;;  %v519_v41 = vcombine.high %v517_v36, %v517_v36  ;;  %v533_v44 = vrot.slane %v517_v36, %v2144_v9  ;;  %s1809_s22 = sshll.u32 %s2180_s21, 4  ;;  %s1808_s20 = sshll.u32 %s2180_s21, 8 }
  0x1f   : > { %v657_v18 = vrot.slane %v477_v14, %v2148_v11  ;;  %v499_v19 = vcombine.high %v477_v14, %v477_v14  ;;  %v498_v20 = vrot.slane %v470_v17, %v2144_v9  ;;  %v673_v23 = vrot.slane %v484_v16, %v2148_v11  ;;  %s2194_s12 = scalar_lea.vmem %s2933_s1, %s1809_s22  ;;  %s2271_s19 = scalar_lea.vmem %s2934_s2, %s1809_s22 }
  0x20   : > { %v491_v24 = vrot.slane %v469_v15, %v2144_v9  ;;  %v540_v26 = vrot.slane %v518_v21, %v2144_v9  ;;  %v500_v28 = vcombine.high %v484_v16, %v484_v16  ;;  %v689_v37 = vrot.slane %v526_v33, %v2148_v11  ;;  %v974_v59 = vld [vmem:[%s2194_s12] sm:$0xff]  ;;  %s2323_s10 = scalar_lea.vmem %s2935_s0, %s1808_s20  ;;  %s2927_s21 = sand.u32 1, %s2011_s25  }
  0x21   : > { %719 = vperm.xlu0 %1883, %v657_v18   ;;  %v665_v22 = vrot.slane %v499_v19, %v2148_v11  ;;  %v677_v25 = vrot.slane %v498_v20, %v2148_v11  ;;  %v502_v35 = vcombine.high %v498_v20, %v498_v20  ;;  %v548_v38 = vcombine.high %v526_v33, %v526_v33  ;;  %s2794_s22 = scalar_lea.hbm %s2925_s7, %s1811_s30  ;;  %s2031_s0 = smov [#allocation4]  }
  0x22   : > { %v661_v27 = vrot.slane %v491_v24, %v2148_v11  ;;  %v693_v29 = vrot.slane %v540_v26, %v2148_v11  ;;  %v501_v30 = vcombine.high %v491_v24, %v491_v24  ;;  %v681_v32 = vrot.slane %v500_v28, %v2148_v11  ;;  %s1893_s1 = sshll.u32 %s2031_s0, 4  ;;  %s1894_s1 = int_to_ptr.vmem [resolvable:$false] %s1893_s1 }
  0x23   : > { %727 = vperm.xlu1 %1884, %v665_v22   ;;  %v685_v39 = vrot.slane %v502_v35, %v2148_v11  ;;  %v550_v40 = vcombine.high %v540_v26, %v540_v26  ;;  %v697_v43 = vrot.slane %v548_v38, %v2148_v11  ;;  %v547_v46 = vrot.slane %v519_v41, %v2144_v9  ;;  %s1895_s2 = scalar_lea.vmem %s1894_s1, 8192 }
  0x24   : > { %v669_v34 = vrot.slane %v501_v30, %v2148_v11  ;;  %v705_v48 = vrot.slane %v533_v44, %v2148_v11  ;;  %v549_v49 = vcombine.high %v533_v44, %v533_v44  ;;  %v571_v53 = vcombine.high %v563_v47, %v563_v47 }
  0x25   : > { %735 = vperm.xlu0 %1883, %v673_v23   ;;  %v701_v45 = vrot.slane %v550_v40, %v2148_v11  ;;  %v709_v51 = vrot.slane %v547_v46, %v2148_v11  ;;  %v551_v52 = vcombine.high %v547_v46, %v547_v46  ;;  %v579_v55 = vrot.slane %v563_v47, %v2144_v9  ;;  %v975_v40 = vld [vmem:[%s2194_s12 + $0x8] sm:$0xff]  ;;  %s2340_s12 = sshll.u32 %s2927_s21, 8  ;;  %s2806_s21 = scalar_lea.hbm %s2923_s5, %s1811_s30 }
  0x26   : > { %v713_v54 = vrot.slane %v549_v49, %v2148_v11  ;;  %v593_v58 = vrot.slane %v571_v53, %v2144_v9  ;;  %v985_v62 = vrot.slane %v974_v59, %v2144_v9  ;;  %v572_v63 = vcombine.high %v570_v56, %v570_v56  ;;  %s2361_s15 = scalar_lea.vmem [#allocation6], %s2340_s12  ;;  %s2587_s16 = scalar_lea.vmem [#allocation4], %s2340_s12 }
  0x27   : > { %739 = vperm.xlu1 %1884, %v677_v25   ;;  %v717_v57 = vrot.slane %v551_v52, %v2148_v11  ;;  %v817_v60 = vrot.slane %v579_v55, %v2148_v11  ;;  %v601_v61 = vcombine.high %v579_v55, %v579_v55  ;;  %v586_v6 = vrot.slane %v570_v56, %v2144_v9  ;;  %s2594_s17 = scalar_lea.vmem [#allocation2], %s2340_s12  ;;  %s1592_s20 = sshll.u32 %s2361_s15, 4  ;;  %s2796_s20 = int_to_ptr.vmem [resolvable:$true] %s1592_s20 }
  0x28   : > { %v821_v0 = vrot.slane %v593_v58, %v2148_v11  ;;  %v603_v1 = vcombine.high %v593_v58, %v593_v58  ;;  %v1001_v3 = vrot.slane %v985_v62, %v2144_v9  ;;  %v993_v4 = vcombine.high %v985_v62, %v985_v62  ;;  %s1554_s27 = sshll.u32 %s2594_s17, 4  ;;  %s1533_s12 = scalar_lea.sflag [#allocation5], %s2754_s18  ;;  %s2808_s27 = int_to_ptr.vmem [resolvable:$true] %s1554_s27 }
  0x29   : > { %723 = vperm.xlu0 %1883, %v661_v27   ;;  %v825_v7 = vrot.slane %v601_v61, %v2148_v11  ;;  %v600_v12 = vrot.slane %v572_v63, %v2144_v9  ;;  %v612_v13 = vrot.slane %v553_v2, %v2144_v9  ;;  %v978_v17 = vcombine.high %v974_v59, %v974_v59 }
  0x2a   : > { %v2207_v8 = vrot.slane %v1001_v3, %v2148_v11  ;;  %v1015_v10 = vrot.slane %v993_v4, %v2144_v9  ;;  %v829_v14 = vrot.slane %v603_v1, %v2148_v11  ;;  %v1023_v16 = vcombine.high %v1001_v3, %v1001_v3 }
  0x2b   : > { %755 = vperm.xlu1 %1884, %v693_v29   ;;  %v833_v18 = vrot.slane %v586_v6, %v2148_v11  ;;  %v602_v19 = vcombine.high %v586_v6, %v586_v6  ;;  %v992_v22 = vrot.slane %v978_v17, %v2144_v9  ;;  %v837_v23 = vrot.slane %v600_v12, %v2148_v11 }
  0x2c   : > { %v2214_v15 = vrot.slane %v1015_v10, %v2148_v11  ;;  %v2218_v20 = vrot.slane %v1023_v16, %v2148_v11  ;;  %v1025_v21 = vcombine.high %v1015_v10, %v1015_v10  ;;  %v620_v24 = vcombine.high %v612_v13, %v612_v13 }
  0x2d   : > { %743 = vperm.xlu0 %1883, %v681_v32   ;;  %v605_v25 = vcombine.high %v553_v2, %v553_v2  ;;  %v604_v26 = vcombine.high %v600_v12, %v600_v12  ;;  %v1008_v28 = vrot.slane %v992_v22, %v2144_v9  ;;  %v994_v29 = vcombine.high %v992_v22, %v992_v22 }
  0x2e   : > { %v2223_v27 = vrot.slane %v1025_v21, %v2148_v11  ;;  %v628_v30 = vrot.slane %v612_v13, %v2144_v9  ;;  %v841_v31 = vrot.slane %v602_v19, %v2148_v11  ;;  %v1034_v44 = vrot.slane %v975_v40, %v2144_v9  ;;  %v1076_v13 = vld [vmem:[%s2271_s19] sm:$0xff] }
  0x2f   : > { %731 = vperm.xlu1 %1884, %v669_v34   ;;  %v2229_v32 = vrot.slane %v1008_v28, %v2148_v11  ;;  %v1022_v33 = vrot.slane %v994_v29, %v2144_v9  ;;  %v642_v34 = vrot.slane %v620_v24, %v2144_v9  ;;  %v619_v35 = vrot.slane %v605_v25, %v2144_v9 }
  0x30   : > { %v845_v36 = vrot.slane %v604_v26, %v2148_v11  ;;  %v1024_v38 = vcombine.high %v1008_v28, %v1008_v28  ;;  %v650_v41 = vcombine.high %v628_v30, %v628_v30  ;;  %v1050_v49 = vrot.slane %v1034_v44, %v2144_v9 }
  0x31   : > { %751 = vperm.xlu0 %1883, %v689_v37   ;;  %v2236_v37 = vrot.slane %v1022_v33, %v2148_v11  ;;  %v621_v46 = vcombine.high %v619_v35, %v619_v35  ;;  %v652_v47 = vcombine.high %v642_v34, %v642_v34  ;;  %v1042_v50 = vcombine.high %v1034_v44, %v1034_v44 }
  0x32   : > { %v2241_v42 = vrot.slane %v1024_v38, %v2148_v11  ;;  %v857_v52 = vrot.slane %v650_v41, %v2148_v11  ;;  %v2252_v53 = vrot.slane %v1050_v49, %v2148_v11  ;;  %v1072_v58 = vcombine.high %v1050_v49, %v1050_v49 }
  0x33   : > { %747 = vperm.xlu1 %1884, %v685_v39   ;;  %v849_v39 = vrot.slane %v628_v30, %v2148_v11  ;;  %v649_v55 = vrot.slane %v621_v46, %v2144_v9  ;;  %v861_v56 = vrot.slane %v652_v47, %v2148_v11  ;;  %v1027_v59 = vcombine.high %v975_v40, %v975_v40 }
  0x34   : > { %v2262_v62 = vrot.slane %v1072_v58, %v2148_v11  ;;  %v1091_v19 = vsub.s32 1, %v2138_v5  ;;  %v1102_v24 = vsub.s32 2, %v2138_v5  ;;  %v1113_v26 = vsub.s32 3, %v2138_v5 }
  0x35   : > { %759 = vperm.xlu0 %1883, %v697_v43   ;;  %v1026_v43 = vcombine.high %v1022_v33, %v1022_v33  ;;  %v869_v1 = vrot.slane %v649_v55, %v2148_v11  ;;  %v653_v2 = vcombine.high %v649_v55, %v649_v55  ;;  %v1124_v29 = vsub.s32 4, %v2138_v5 }
  0x36   : > { %v1103_v25 = vrot.slane %v1076_v13, %v1102_v24  ;;  %v1114_v28 = vrot.slane %v1076_v13, %v1113_v26 }
  0x37   : > { %763 = vperm.xlu1 %1884, %v701_v45   ;;  %v853_v45 = vrot.slane %v642_v34, %v2148_v11  ;;  %v1125_v30 = vrot.slane %v1076_v13, %v1124_v29  ;;  %v1146_v34 = vsub.s32 6, %v2138_v5 }
  0x39   : > { %767 = vperm.xlu0 %1883, %v705_v48   ;;  %v2246_v48 = vrot.slane %v1026_v43, %v2148_v11 }
  0x3b   : > { %771 = vperm.xlu1 %1884, %v709_v51   ;;  %v635_v51 = vrot.slane %v619_v35, %v2144_v9  ;;  %v1147_v35 = vrot.slane %v1076_v13, %v1146_v34 }
  0x3d   : > { %775 = vperm.xlu0 %1883, %v713_v54   ;;  %v1064_v54 = vrot.slane %v1042_v50, %v2144_v9  ;;  %v651_v61 = vcombine.high %v635_v51, %v635_v51 }
  0x3f   : > { %779 = vperm.xlu1 %1884, %v717_v57   ;;  %v2258_v57 = vrot.slane %v1064_v54, %v2148_v11  ;;  %v1074_v63 = vcombine.high %v1064_v54, %v1064_v54 }
  0x41   : > { %879 = vperm.xlu0 %1883, %v817_v60   ;;  %v865_v60 = vrot.slane %v635_v51, %v2148_v11  ;;  %v2274_v3 = vrot.slane %v1074_v63, %v2148_v11 }
  0x43   : > { %883 = vperm.xlu1 %1884, %v821_v0   ;;  %v1041_v0 = vrot.slane %v1027_v59, %v2144_v9 }
  0x45   : > { %887 = vperm.xlu0 %1883, %v825_v7   ;;  %v1057_v4 = vrot.slane %v1041_v0, %v2144_v9  ;;  %v1043_v6 = vcombine.high %v1041_v0, %v1041_v0  ;;  %v873_v7 = vrot.slane %v651_v61, %v2148_v11 }
  0x47   : > { %891 = vperm.xlu1 %1884, %v829_v14   ;;  %v2279_v10 = vrot.slane %v1057_v4, %v2148_v11  ;;  %v1071_v12 = vrot.slane %v1043_v6, %v2144_v9  ;;  %v877_v14 = vrot.slane %v653_v2, %v2148_v11  ;;  %v1073_v17 = vcombine.high %v1057_v4, %v1057_v4  ;;  %v419_v2 = vld [vmem:[%s2323_s10 + $0x8] sm:$0xff]  ;;  %v420_v6 = vld [vmem:[%s2323_s10 + $0x10] sm:$0xff] }
  0x49   : > { %895 = vperm.xlu0 %1883, %v833_v18   ;;  %v2285_v16 = vrot.slane %v1071_v12, %v2148_v11  ;;  %v1081_v18 = vrot.slane %v1076_v13, %v2148_v11  ;;  %v2290_v21 = vrot.slane %v1073_v17, %v2148_v11  ;;  %v1075_v22 = vcombine.high %v1071_v12, %v1071_v12  ;;  %v422_v17 = vld [vmem:[%s2323_s10 + $0x20] sm:$0xff] }
  0x4b   : > { %899 = vperm.xlu1 %1884, %v837_v23   ;;  %v2293_v9 = vrot.slane %v1075_v22, %v2148_v11  ;;  %v1092_v23 = vrot.slane %v1076_v13, %v1091_v19 }
  0x4d   : > { %903 = vperm.xlu0 %1883, %v841_v31   ;;  %v1135_v31 = vsub.s32 5, %v2138_v5 }
  0x4f   : > { %907 = vperm.xlu1 %1884, %v845_v36   ;;  %v1136_v33 = vrot.slane %v1076_v13, %v1135_v31  ;;  %v1157_v36 = vsub.s32 7, %v2138_v5 }
  0x51   : > { %911 = vperm.xlu0 %1883, %v849_v39   ;;  %v1158_v38 = vrot.slane %v1076_v13, %v1157_v36  ;;  %v1077_v39 = vld [vmem:[%s2271_s19 + $0x8] sm:$0xff]  ;;  %s1573_s19 = sshll.u32 %s2587_s16, 4  ;;  %s2789_s19 = int_to_ptr.vmem [resolvable:$true] %s1573_s19 }
  0x52   : > { %v1169_v40 = vrot.slane %v1077_v39, %v2148_v11  ;;  %v1180_v41 = vrot.slane %v1077_v39, %v1091_v19  ;;  %v1191_v43 = vrot.slane %v1077_v39, %v1102_v24  ;;  %v1202_v44 = vrot.slane %v1077_v39, %v1113_v26  ;;  %v424_v24 = vld [vmem:[%s2323_s10 + $0x30] sm:$0xff]  ;;  %p1896_p1 = scmp.lt.s32.totalorder %s2789_s19, %s1894_s1 }
  0x53   : > { %915 = vperm.xlu1 %1884, %v853_v45   ;;  %v1213_v5 = vrot.slane %v1077_v39, %v1124_v29  ;;  %v1224_v45 = vrot.slane %v1077_v39, %v1135_v31  ;;  %v1235_v46 = vrot.slane %v1077_v39, %v1146_v34  ;;  %v1246_v11 = vrot.slane %v1077_v39, %v1157_v36  ;;  %v427_v34 = vld [vmem:[%s2323_s10 + $0x48] sm:$0xff] }
  0x55   : > { %919 = vperm.xlu0 %1883, %v857_v52  }
  0x57   : > { %923 = vperm.xlu1 %1884, %v861_v56  }
  0x59   : > { %927 = vperm.xlu0 %1883, %v865_v60  }
  0x5b   : > { %931 = vperm.xlu1 %1884, %v869_v1   ;;  %v418_v1 = vld [vmem:[%s2323_s10] sm:$0xff] }
  0x5d   : > { %935 = vperm.xlu0 %1883, %v873_v7   ;;  %v421_v7 = vld [vmem:[%s2323_s10 + $0x18] sm:$0xff] }
  0x5f   : > { %939 = vperm.xlu1 %1884, %v877_v14  }
  0x61   : > { %1083 = vbcast.lane.b32.xlu0 %v1081_v18, 256 }
  0x63   : > { %1087 = vbcast.lane.b32.xlu1 %v1081_v18, 264  ;;  %v423_v18 = vld [vmem:[%s2323_s10 + $0x28] sm:$0xff] }
  0x65   : > { %1094 = vbcast.lane.b32.xlu0 %v1092_v23, 256 }
  0x67   : > { %1098 = vbcast.lane.b32.xlu1 %v1092_v23, 264 }
  0x69   : > { %1105 = vbcast.lane.b32.xlu0 %v1103_v25, 256 }
  0x6b   : > { %1109 = vbcast.lane.b32.xlu1 %v1103_v25, 264  ;;  %v425_v25 = vld [vmem:[%s2323_s10 + $0x38] sm:$0xff] }
  0x6d   : > { %1116 = vbcast.lane.b32.xlu0 %v1114_v28, 256 }
  0x6f   : > { %1120 = vbcast.lane.b32.xlu1 %v1114_v28, 264 }
  0x71   : > { %1127 = vbcast.lane.b32.xlu0 %v1125_v30, 256 }
  0x73   : > { %1131 = vbcast.lane.b32.xlu1 %v1125_v30, 264 }
  0x75   : > { %1138 = vbcast.lane.b32.xlu0 %v1136_v33, 256 }
  0x77   : > { %1142 = vbcast.lane.b32.xlu1 %v1136_v33, 264  ;;  %v426_v33 = vld [vmem:[%s2323_s10 + $0x40] sm:$0xff] }
  0x79   : > { %1149 = vbcast.lane.b32.xlu0 %v1147_v35, 256 }
  0x7b   : > { %1153 = vbcast.lane.b32.xlu1 %v1147_v35, 264 }
  0x7d   : > { %1160 = vbcast.lane.b32.xlu0 %v1158_v38, 256 }
  0x7f   : > { %1164 = vbcast.lane.b32.xlu1 %v1158_v38, 264 }
  0x81   : > { %1171 = vbcast.lane.b32.xlu0 %v1169_v40, 256 }
  0x83   : > { %1175 = vbcast.lane.b32.xlu1 %v1169_v40, 264 }
  0x85   : > { %1182 = vbcast.lane.b32.xlu0 %v1180_v41, 256 }
  0x87   : > { %1186 = vbcast.lane.b32.xlu1 %v1180_v41, 264 }
  0x89   : > { %1193 = vbcast.lane.b32.xlu0 %v1191_v43, 256 }
  0x8b   : > { %1197 = vbcast.lane.b32.xlu1 %v1191_v43, 264 }
  0x8d   : > { %1204 = vbcast.lane.b32.xlu0 %v1202_v44, 256 }
  0x8f   : > { %1208 = vbcast.lane.b32.xlu1 %v1202_v44, 264  ;;  %v428_v44 = vld [vmem:[%s2323_s10 + $0x50] sm:$0xff] }
  0x91   : > { %1215 = vbcast.lane.b32.xlu0 %v1213_v5, 256 }
  0x93   : > { %1219 = vbcast.lane.b32.xlu1 %v1213_v5, 264  ;;  %v429_v5 = vld [vmem:[%s2323_s10 + $0x58] sm:$0xff] }
  0x95   : > { %1226 = vbcast.lane.b32.xlu0 %v1224_v45, 256 }
  0x97   : > { %1230 = vbcast.lane.b32.xlu1 %v1224_v45, 264 }
  0x99   : > { %1237 = vbcast.lane.b32.xlu0 %v1235_v46, 256 }
  0x9b   : > { %1241 = vbcast.lane.b32.xlu1 %v1235_v46, 264 }
  0x9d   : > { %1248 = vbcast.lane.b32.xlu0 %v1246_v11, 256 }
  0x9f   : > { %1252 = vbcast.lane.b32.xlu1 %v1246_v11, 264 }
  0xa0   : > { %v720_v47 = vpop.permute.xlu0 %719 }
  0xa1   : > { %v782_v13 = vmul.f32 %v720_v47, %v418_v1  ;;  %v783_v14 = vmul.f32 %v720_v47, %v419_v2  ;;  %v430_v1 = vld [vmem:[%s2323_s10 + $0x60] sm:$0xff]  ;;  %v431_v2 = vld [vmem:[%s2323_s10 + $0x68] sm:$0xff] }
  0xa2   : > { %v728_v49 = vpop.permute.xlu1 %727 }
  0xa3   : > { %v786_v29 = vmul.f32 %v728_v49, %v422_v17  ;;  %v787_v30 = vmul.f32 %v728_v49, %v423_v18 }
  0xa4   : > { %v736_v50 = vpop.permute.xlu0 %735 }
  0xa5   : > { %v790_v49 = vmul.f32 %v736_v50, %v426_v33  ;;  %v434_v33 = vld [vmem:[%s2323_s10 + $0x80] sm:$0xff] }
  0xa6   : > { %v2303_v51 = vpop.permute.xlu1 %739 }
  0xa7   : > { %v793_v17 = vmul.f32 %v2303_v51, %v429_v5  ;;  %v436_v5 = vld [vmem:[%s2323_s10 + $0x90] sm:$0xff] }
  0xa8   : > { %v724_v52 = vpop.permute.xlu0 %723 }
  0xa9   : > { %v784_v22 = vmul.f32 %v724_v52, %v420_v6  ;;  %v785_v23 = vmul.f32 %v724_v52, %v421_v7  ;;  %v791_v52 = vmul.f32 %v736_v50, %v427_v34  ;;  %v792_v50 = vmul.f32 %v2303_v51, %v428_v44  ;;  %v435_v34 = vld [vmem:[%s2323_s10 + $0x88] sm:$0xff] }
  0xaa   : > { %v2305_v54 = vpop.permute.xlu1 %755 }
  0xac   : > { %v2307_v55 = vpop.permute.xlu0 %743 }
  0xad   : > { %v794_v51 = vmul.f32 %v2307_v55, %v430_v1 }
  0xae   : > { %v732_v56 = vpop.permute.xlu1 %731 }
  0xaf   : > { %v788_v40 = vmul.f32 %v732_v56, %v424_v24  ;;  %v789_v41 = vmul.f32 %v732_v56, %v425_v25 }
  0xb0   : > { %v2309_v58 = vpop.permute.xlu0 %751 }
  0xb1   : > { %v799_v1 = vmul.f32 %v2309_v58, %v435_v34 }
  0xb2   : > { %v2311_v59 = vpop.permute.xlu1 %747 }
  0xb4   : > { %v2313_v60 = vpop.permute.xlu0 %759 }
  0xb6   : > { %v2316_v61 = vpop.permute.xlu1 %763 }
  0xb8   : > { %v2318_v63 = vpop.permute.xlu0 %767 }
  0xba   : > { %v2325_v0 = vpop.permute.xlu1 %771 }
  0xbc   : > { %v2329_v4 = vpop.permute.xlu0 %775 }
  0xbe   : > { %v2334_v12 = vpop.permute.xlu1 %779 }
  0xc0   : > { %v880_v19 = vpop.permute.xlu0 %879 }
  0xc1   : > { %v2344_v26 = vadd.f32 %v880_v19, %v782_v13  ;;  %v2346_v28 = vadd.f32 %v880_v19, %v783_v14  ;;  %v432_v19 = vld [vmem:[%s2323_s10 + $0x70] sm:$0xff] }
  0xc2   : > { %v884_v31 = vpop.permute.xlu1 %883 }
  0xc3   : > { %v1399_v35 = vmul.f32 %v2207_v8, %v2344_v26  ;;  %v1400_v36 = vmul.f32 %v2207_v8, %v2346_v28  ;;  %v2354_v38 = vadd.f32 %v884_v31, %v784_v22  ;;  %v2356_v39 = vadd.f32 %v884_v31, %v785_v23  ;;  %v433_v22 = vld [vmem:[%s2323_s10 + $0x78] sm:$0xff] }
  0xc4   : > { %v888_v43 = vpop.permute.xlu0 %887 }
  0xc5   : > { %1431 = vst.msk [vmem:[%s2361_s15] sm:$0xff] %vm1286_vm0, %v1399_v35  ;;  %1432 = vst.msk [vmem:[%s2361_s15 + $0x8] sm:$0xff] %vm1286_vm0, %v1400_v36  ;;  %v1401_v45 = vmul.f32 %v2214_v15, %v2354_v38  ;;  %v1402_v46 = vmul.f32 %v2214_v15, %v2356_v39  ;;  %v2371_v11 = vadd.f32 %v888_v43, %v786_v29 }
  0xc6   : > { %v2373_v47 = vadd.f32 %v888_v43, %v787_v30  ;;  %v892_v56 = vpop.permute.xlu1 %891  ;;  %v795_v30 = vmul.f32 %v2307_v55, %v431_v2  ;;  %v796_v55 = vmul.f32 %v2311_v59, %v432_v19  ;;  %v797_v43 = vmul.f32 %v2311_v59, %v433_v22 }
  0xc7   : > { %1433 = vst.msk [vmem:[%s2361_s15 + $0x10] sm:$0xff] %vm1286_vm0, %v1401_v45  ;;  %1434 = vst.msk [vmem:[%s2361_s15 + $0x18] sm:$0xff] %vm1286_vm0, %v1402_v46  ;;  %v1403_v6 = vmul.f32 %v2218_v20, %v2371_v11  ;;  %v2385_v13 = vadd.f32 %v892_v56, %v788_v40  ;;  %v2387_v14 = vadd.f32 %v892_v56, %v789_v41  ;;  %v437_v45 = vld [vmem:[%s2323_s10 + $0x98] sm:$0xff] }
  0xc8   : > { %v1404_v7 = vmul.f32 %v2218_v20, %v2373_v47  ;;  %v896_v18 = vpop.permute.xlu0 %895  ;;  %v798_v59 = vmul.f32 %v2309_v58, %v434_v33  ;;  %v800_v58 = vmul.f32 %v2305_v54, %v436_v5  ;;  %v801_v22 = vmul.f32 %v2305_v54, %v437_v45 }
  0xc9   : > { %1435 = vst.msk [vmem:[%s2361_s15 + $0x20] sm:$0xff] %vm1286_vm0, %v1403_v6  ;;  %v1405_v23 = vmul.f32 %v2223_v27, %v2385_v13  ;;  %v1406_v24 = vmul.f32 %v2223_v27, %v2387_v14  ;;  %v2401_v25 = vadd.f32 %v896_v18, %v790_v49  ;;  %v2403_v29 = vadd.f32 %v896_v18, %v791_v52  ;;  %v438_v6 = vld [vmem:[%s2323_s10 + $0xa0] sm:$0xff] }
  0xca   : > { %1436 = vst.msk [vmem:[%s2361_s15 + $0x28] sm:$0xff] %vm1286_vm0, %v1404_v7  ;;  %v900_v31 = vpop.permute.xlu1 %899  ;;  %v439_v7 = vld [vmem:[%s2323_s10 + $0xa8] sm:$0xff]  ;;  %v802_v54 = vmul.f32 %v2313_v60, %v438_v6 }
  0xcb   : > { %1437 = vst.msk [vmem:[%s2361_s15 + $0x30] sm:$0xff] %vm1286_vm0, %v1405_v23  ;;  %1438 = vst.msk [vmem:[%s2361_s15 + $0x38] sm:$0xff] %vm1286_vm0, %v1406_v24  ;;  %v1407_v35 = vmul.f32 %v2229_v32, %v2401_v25  ;;  %v1408_v36 = vmul.f32 %v2229_v32, %v2403_v29  ;;  %v2417_v40 = vadd.f32 %v900_v31, %v792_v50  ;;  %v440_v24 = vld [vmem:[%s2323_s10 + $0xb0] sm:$0xff] }
  0xcc   : > { %v2419_v41 = vadd.f32 %v900_v31, %v793_v17  ;;  %v904_v44 = vpop.permute.xlu0 %903 }
  0xcd   : > { %1439 = vst.msk [vmem:[%s2361_s15 + $0x40] sm:$0xff] %vm1286_vm0, %v1407_v35  ;;  %1440 = vst.msk [vmem:[%s2361_s15 + $0x48] sm:$0xff] %vm1286_vm0, %v1408_v36  ;;  %v1409_v46 = vmul.f32 %v2236_v37, %v2417_v40  ;;  %v2433_v52 = vadd.f32 %v904_v44, %v794_v51  ;;  %v2435_v56 = vadd.f32 %v904_v44, %v795_v30  ;;  %v441_v51 = vld [vmem:[%s2323_s10 + $0xb8] sm:$0xff] }
  0xce   : > { %v1410_v49 = vmul.f32 %v2236_v37, %v2419_v41  ;;  %v908_v2 = vpop.permute.xlu1 %907  ;;  %v803_v35 = vmul.f32 %v2313_v60, %v439_v7  ;;  %v804_v60 = vmul.f32 %v2316_v61, %v440_v24  ;;  %v447_v24 = vld [vmem:[%s2323_s10 + $0xe8] sm:$0xff] }
  0xcf   : > { %1441 = vst.msk [vmem:[%s2361_s15 + $0x50] sm:$0xff] %vm1286_vm0, %v1409_v46  ;;  %v1411_v50 = vmul.f32 %v2241_v42, %v2433_v52  ;;  %v1412_v17 = vmul.f32 %v2241_v42, %v2435_v56  ;;  %v2449_v18 = vadd.f32 %v908_v2, %v796_v55  ;;  %v2451_v19 = vadd.f32 %v908_v2, %v797_v43  ;;  %v442_v55 = vld [vmem:[%s2323_s10 + $0xc0] sm:$0xff]  ;;  %v443_v43 = vld [vmem:[%s2323_s10 + $0xc8] sm:$0xff]  ;;  %v445_v2 = vld [vmem:[%s2323_s10 + $0xd8] sm:$0xff] }
  0xd0   : > { %1442 = vst.msk [vmem:[%s2361_s15 + $0x58] sm:$0xff] %vm1286_vm0, %v1410_v49  ;;  %v912_v23 = vpop.permute.xlu0 %911  ;;  %v805_v49 = vmul.f32 %v2316_v61, %v441_v51  ;;  %v806_v61 = vmul.f32 %v2318_v63, %v442_v55  ;;  %v448_v55 = vld [vmem:[%s2323_s10 + $0xf0] sm:$0xff] }
  0xd1   : > { %1443 = vst.msk [vmem:[%s2361_s15 + $0x60] sm:$0xff] %vm1286_vm0, %v1411_v50  ;;  %1444 = vst.msk [vmem:[%s2361_s15 + $0x68] sm:$0xff] %vm1286_vm0, %v1412_v17  ;;  %v1413_v30 = vmul.f32 %v2246_v48, %v2449_v18  ;;  %v1414_v31 = vmul.f32 %v2246_v48, %v2451_v19  ;;  %v2465_v33 = vadd.f32 %v912_v23, %v798_v59 }
  0xd2   : > { %v2467_v34 = vadd.f32 %v912_v23, %v799_v1  ;;  %v916_v36 = vpop.permute.xlu1 %915  ;;  %v444_v1 = vld [vmem:[%s2323_s10 + $0xd0] sm:$0xff]  ;;  %v446_v23 = vld [vmem:[%s2323_s10 + $0xe0] sm:$0xff] }
  0xd3   : > { %1445 = vst.msk [vmem:[%s2361_s15 + $0x70] sm:$0xff] %vm1286_vm0, %v1413_v30  ;;  %1446 = vst.msk [vmem:[%s2361_s15 + $0x78] sm:$0xff] %vm1286_vm0, %v1414_v31  ;;  %v1415_v44 = vmul.f32 %v2252_v53, %v2465_v33  ;;  %v2481_v45 = vadd.f32 %v916_v36, %v800_v58  ;;  %v2483_v46 = vadd.f32 %v916_v36, %v801_v22 }
  0xd4   : > { %v1416_v5 = vmul.f32 %v2252_v53, %v2467_v34  ;;  %v920_v59 = vpop.permute.xlu0 %919  ;;  %v807_v58 = vmul.f32 %v2318_v63, %v443_v43  ;;  %v808_v63 = vmul.f32 %v2325_v0, %v444_v1  ;;  %v449_v43 = vld [vmem:[%s2323_s10 + $0xf8] sm:$0xff]  ;;  %s2780_s10 = scalar_lea.hbm %s2924_s6, %s1811_s30 }
  0xd5   : > { %1447 = vst.msk [vmem:[%s2361_s15 + $0x80] sm:$0xff] %vm1286_vm0, %v1415_v44  ;;  %v1417_v6 = vmul.f32 %v2258_v57, %v2481_v45  ;;  %v1418_v7 = vmul.f32 %v2258_v57, %v2483_v46  ;;  %v2497_v50 = vadd.f32 %v920_v59, %v802_v54  ;;  %v2499_v17 = vadd.f32 %v920_v59, %v803_v35 }
  0xd6   : > { %1448 = vst.msk [vmem:[%s2361_s15 + $0x88] sm:$0xff] %vm1286_vm0, %v1416_v5  ;;  %v924_v22 = vpop.permute.xlu1 %923  ;;  %v809_v35 = vmul.f32 %v2325_v0, %v445_v2  ;;  %v810_v0 = vmul.f32 %v2329_v4, %v446_v23  ;;  %v811_v59 = vmul.f32 %v2329_v4, %v447_v24  ;;  %v813_v4 = vmul.f32 %v2334_v12, %v449_v43 }
  0xd7   : > { %1449 = vst.msk [vmem:[%s2361_s15 + $0x90] sm:$0xff] %vm1286_vm0, %v1417_v6  ;;  %1450 = vst.msk [vmem:[%s2361_s15 + $0x98] sm:$0xff] %vm1286_vm0, %v1418_v7  ;;  %v1419_v51 = vmul.f32 %v2262_v62, %v2497_v50  ;;  %v1420_v30 = vmul.f32 %v2262_v62, %v2499_v17  ;;  %v2513_v31 = vadd.f32 %v924_v22, %v804_v60 }
  0xd8   : > { %v2515_v54 = vadd.f32 %v924_v22, %v805_v49  ;;  %v928_v36 = vpop.permute.xlu0 %927 }
  0xd9   : > { %1451 = vst.msk [vmem:[%s2361_s15 + $0xa0] sm:$0xff] %vm1286_vm0, %v1419_v51  ;;  %1452 = vst.msk [vmem:[%s2361_s15 + $0xa8] sm:$0xff] %vm1286_vm0, %v1420_v30  ;;  %v1421_v44 = vmul.f32 %v2274_v3, %v2513_v31  ;;  %v2529_v60 = vadd.f32 %v928_v36, %v806_v61  ;;  %v2531_v49 = vadd.f32 %v928_v36, %v807_v58 }
  0xda   : > { %v1422_v5 = vmul.f32 %v2274_v3, %v2515_v54  ;;  %v932_v1 = vpop.permute.xlu1 %931  ;;  %v812_v58 = vmul.f32 %v2334_v12, %v448_v55 }
  0xdb   : > { %1453 = vst.msk [vmem:[%s2361_s15 + $0xb0] sm:$0xff] %vm1286_vm0, %v1421_v44  ;;  %v1423_v2 = vmul.f32 %v2279_v10, %v2529_v60  ;;  %v1424_v6 = vmul.f32 %v2279_v10, %v2531_v49  ;;  %v2543_v7 = vadd.f32 %v932_v1, %v808_v63  ;;  %v2545_v61 = vadd.f32 %v932_v1, %v809_v35 }
  0xdc   : > { %1454 = vst.msk [vmem:[%s2361_s15 + $0xb8] sm:$0xff] %vm1286_vm0, %v1422_v5  ;;  %v936_v22 = vpop.permute.xlu0 %935 }
  0xdd   : > { %1455 = vst.msk [vmem:[%s2361_s15 + $0xc0] sm:$0xff] %vm1286_vm0, %v1423_v2  ;;  %1456 = vst.msk [vmem:[%s2361_s15 + $0xc8] sm:$0xff] %vm1286_vm0, %v1424_v6  ;;  %v1425_v23 = vmul.f32 %v2285_v16, %v2543_v7  ;;  %v1426_v24 = vmul.f32 %v2285_v16, %v2545_v61  ;;  %v2557_v51 = vadd.f32 %v936_v22, %v810_v0 }
  0xde   : > { %v2559_v30 = vadd.f32 %v936_v22, %v811_v59  ;;  %v940_v12 = vpop.permute.xlu1 %939 }
  0xdf   : > { %1457 = vst.msk [vmem:[%s2361_s15 + $0xd0] sm:$0xff] %vm1286_vm0, %v1425_v23  ;;  %1458 = vst.msk [vmem:[%s2361_s15 + $0xd8] sm:$0xff] %vm1286_vm0, %v1426_v24  ;;  %v1427_v63 = vmul.f32 %v2290_v21, %v2557_v51  ;;  %v2569_v36 = vadd.f32 %v940_v12, %v812_v58  ;;  %v2571_v55 = vadd.f32 %v940_v12, %v813_v4 }
  0xe0   : > { %v1428_v35 = vmul.f32 %v2290_v21, %v2559_v30  ;;  %v1084_v43 = vpop.permute.xlu0 %1083 }
  0xe1   : > { %1459 = vst.msk [vmem:[%s2361_s15 + $0xe0] sm:$0xff] %vm1286_vm0, %v1427_v63  ;;  %v1429_v44 = vmul.f32 %v2293_v9, %v2569_v36  ;;  %v1430_v5 = vmul.f32 %v2293_v9, %v2571_v55  ;;  %v1254_v0 = vmul.f32 %v1084_v43, %v2344_v26 }
  0xe2   : > { %1460 = vst.msk [vmem:[%s2361_s15 + $0xe8] sm:$0xff] %vm1286_vm0, %v1428_v35  ;;  %v1088_v59 = vpop.permute.xlu1 %1087 }
  0xe3   : > { %1461 = vst.msk [vmem:[%s2361_s15 + $0xf0] sm:$0xff] %vm1286_vm0, %v1429_v44  ;;  %1462 = vst.msk [vmem:[%s2361_s15 + $0xf8] sm:$0xff] %vm1286_vm0, %v1430_v5  ;;  %v1463_v1 = vmul.f32 %v2207_v8, %v1254_v0  ;;  %v1255_v2 = vmul.f32 %v1088_v59, %v2346_v28  ;;  %s1889_s15 = scalar_lea.vmem %s2789_s19, 4096 }
  0xe4   : > { %1287 = vst.msk [vmem:[%s2587_s16] sm:$0xff] %vm1286_vm0, %v1254_v0  ;;  %v1095_v6 = vpop.permute.xlu0 %1094  ;;  %p1890_p12 = scmp.ne.s32.totalorder %s2789_s19, %s1889_s15  ;;  %p1897_p2 = scmp.lt.s32.totalorder %s1895_s2, %s1889_s15 }
  0xe5   : > { %1495 = vst.msk [vmem:[%s2594_s17] sm:$0xff] %vm1286_vm0, %v1463_v1  ;;  %1288 = vst.msk [vmem:[%s2587_s16 + $0x8] sm:$0xff] %vm1286_vm0, %v1255_v2  ;;  %v1464_v26 = vmul.f32 %v2207_v8, %v1255_v2  ;;  %v1256_v58 = vmul.f32 %v1095_v6, %v2354_v38 }
  0xe6   : > { %v1099_v4 = vpop.permute.xlu1 %1098  ;;  %p1891_p13 = pnand %p1890_p12, %p2118_p4  ;;  %p1898_p3 = por %p1897_p2, %p1896_p1 }
  0xe7   : > { %1496 = vst.msk [vmem:[%s2594_s17 + $0x8] sm:$0xff] %vm1286_vm0, %v1464_v26  ;;  %1289 = vst.msk [vmem:[%s2587_s16 + $0x10] sm:$0xff] %vm1286_vm0, %v1256_v58  ;;  %v1465_v28 = vmul.f32 %v2214_v15, %v1256_v58  ;;  %v1257_v22 = vmul.f32 %v1099_v4, %v2356_v39 }
  0xe8   : > { %v1106_v23 = vpop.permute.xlu0 %1105  ;;  %p1892_p0 = pneg %p1891_p13 }
  0xe9   : > { %1497 = vst.msk [vmem:[%s2594_s17 + $0x10] sm:$0xff] %vm1286_vm0, %v1465_v28  ;;  %1290 = vst.msk [vmem:[%s2587_s16 + $0x18] sm:$0xff] %vm1286_vm0, %v1257_v22  ;;  %v1466_v8 = vmul.f32 %v2214_v15, %v1257_v22  ;;  %v1258_v38 = vmul.f32 %v1106_v23, %v2371_v11 }
  0xea   : > { %v1110_v24 = vpop.permute.xlu1 %1109  ;;  %p1899_p5 = pnand %p1898_p3, %p1892_p0 }
  0xeb   : > { %1498 = vst.msk [vmem:[%s2594_s17 + $0x18] sm:$0xff] %vm1286_vm0, %v1466_v8  ;;  %1291 = vst.msk [vmem:[%s2587_s16 + $0x20] sm:$0xff] %vm1286_vm0, %v1258_v38  ;;  %v1467_v39 = vmul.f32 %v2218_v20, %v1258_v38  ;;  %v1259_v12 = vmul.f32 %v1110_v24, %v2373_v47 }
  0xec   : > { %v1117_v63 = vpop.permute.xlu0 %1116 }
  0xed   : > { %1499 = vst.msk [vmem:[%s2594_s17 + $0x20] sm:$0xff] %vm1286_vm0, %v1467_v39  ;;  %1292 = vst.msk [vmem:[%s2587_s16 + $0x28] sm:$0xff] %vm1286_vm0, %v1259_v12  ;;  %v1468_v15 = vmul.f32 %v2218_v20, %v1259_v12  ;;  %v1260_v11 = vmul.f32 %v1117_v63, %v2385_v13 }
  0xee   : > { %v1121_v35 = vpop.permute.xlu1 %1120 }
  0xef   : > { %1500 = vst.msk [vmem:[%s2594_s17 + $0x28] sm:$0xff] %vm1286_vm0, %v1468_v15  ;;  %1293 = vst.msk [vmem:[%s2587_s16 + $0x30] sm:$0xff] %vm1286_vm0, %v1260_v11  ;;  %v1469_v47 = vmul.f32 %v2223_v27, %v1260_v11  ;;  %v1261_v43 = vmul.f32 %v1121_v35, %v2387_v14 }
  0xf0   : > { %v1128_v44 = vpop.permute.xlu0 %1127 }
  0xf1   : > { %1501 = vst.msk [vmem:[%s2594_s17 + $0x30] sm:$0xff] %vm1286_vm0, %v1469_v47  ;;  %1294 = vst.msk [vmem:[%s2587_s16 + $0x38] sm:$0xff] %vm1286_vm0, %v1261_v43  ;;  %v1470_v20 = vmul.f32 %v2223_v27, %v1261_v43  ;;  %v1262_v13 = vmul.f32 %v1128_v44, %v2401_v25 }
  0xf2   : > { %v1132_v5 = vpop.permute.xlu1 %1131 }
  0xf3   : > { %1502 = vst.msk [vmem:[%s2594_s17 + $0x38] sm:$0xff] %vm1286_vm0, %v1470_v20  ;;  %1295 = vst.msk [vmem:[%s2587_s16 + $0x40] sm:$0xff] %vm1286_vm0, %v1262_v13  ;;  %v1471_v14 = vmul.f32 %v2229_v32, %v1262_v13  ;;  %v1263_v0 = vmul.f32 %v1132_v5, %v2403_v29 }
  0xf4   : > { %v1139_v59 = vpop.permute.xlu0 %1138 }
  0xf5   : > { %1503 = vst.msk [vmem:[%s2594_s17 + $0x40] sm:$0xff] %vm1286_vm0, %v1471_v14  ;;  %1296 = vst.msk [vmem:[%s2587_s16 + $0x48] sm:$0xff] %vm1286_vm0, %v1263_v0  ;;  %v1472_v27 = vmul.f32 %v2229_v32, %v1263_v0  ;;  %v1264_v25 = vmul.f32 %v1139_v59, %v2417_v40 }
  0xf6   : > { %v1143_v1 = vpop.permute.xlu1 %1142 }
  0xf7   : > { %1504 = vst.msk [vmem:[%s2594_s17 + $0x48] sm:$0xff] %vm1286_vm0, %v1472_v27  ;;  %1297 = vst.msk [vmem:[%s2587_s16 + $0x50] sm:$0xff] %vm1286_vm0, %v1264_v25  ;;  %v1473_v29 = vmul.f32 %v2236_v37, %v1264_v25  ;;  %v1265_v2 = vmul.f32 %v1143_v1, %v2419_v41 }
  0xf8   : > { %v1150_v6 = vpop.permute.xlu0 %1149 }
  0xf9   : > { %1505 = vst.msk [vmem:[%s2594_s17 + $0x50] sm:$0xff] %vm1286_vm0, %v1473_v29  ;;  %1298 = vst.msk [vmem:[%s2587_s16 + $0x58] sm:$0xff] %vm1286_vm0, %v1265_v2  ;;  %v1474_v32 = vmul.f32 %v2236_v37, %v1265_v2  ;;  %v1266_v40 = vmul.f32 %v1150_v6, %v2433_v52 }
  0xfa   : > { %v1154_v26 = vpop.permute.xlu1 %1153 }
  0xfb   : > { %1506 = vst.msk [vmem:[%s2594_s17 + $0x58] sm:$0xff] %vm1286_vm0, %v1474_v32  ;;  %1299 = vst.msk [vmem:[%s2587_s16 + $0x60] sm:$0xff] %vm1286_vm0, %v1266_v40  ;;  %v1475_v41 = vmul.f32 %v2241_v42, %v1266_v40  ;;  %v1267_v58 = vmul.f32 %v1154_v26, %v2435_v56 }
  0xfc   : > { %v1161_v4 = vpop.permute.xlu0 %1160 }
  0xfd   : > { %1507 = vst.msk [vmem:[%s2594_s17 + $0x60] sm:$0xff] %vm1286_vm0, %v1475_v41  ;;  %1300 = vst.msk [vmem:[%s2587_s16 + $0x68] sm:$0xff] %vm1286_vm0, %v1267_v58  ;;  %v1476_v37 = vmul.f32 %v2241_v42, %v1267_v58  ;;  %v1268_v52 = vmul.f32 %v1161_v4, %v2449_v18 }
  0xfe   : > { %v1165_v28 = vpop.permute.xlu1 %1164 }
  0xff   : > { %1508 = vst.msk [vmem:[%s2594_s17 + $0x68] sm:$0xff] %vm1286_vm0, %v1476_v37  ;;  %1301 = vst.msk [vmem:[%s2587_s16 + $0x70] sm:$0xff] %vm1286_vm0, %v1268_v52  ;;  %v1477_v56 = vmul.f32 %v2246_v48, %v1268_v52  ;;  %v1269_v22 = vmul.f32 %v1165_v28, %v2451_v19 }
 0x100   : > { %v1172_v23 = vpop.permute.xlu0 %1171 }
 0x101   : > { %1509 = vst.msk [vmem:[%s2594_s17 + $0x70] sm:$0xff] %vm1286_vm0, %v1477_v56  ;;  %1302 = vst.msk [vmem:[%s2587_s16 + $0x78] sm:$0xff] %vm1286_vm0, %v1269_v22  ;;  %v1478_v42 = vmul.f32 %v2246_v48, %v1269_v22  ;;  %v1270_v18 = vmul.f32 %v1172_v23, %v2465_v33 }
 0x102   : > { %v1176_v8 = vpop.permute.xlu1 %1175 }
 0x103   : > { %1510 = vst.msk [vmem:[%s2594_s17 + $0x78] sm:$0xff] %vm1286_vm0, %v1478_v42  ;;  %1303 = vst.msk [vmem:[%s2587_s16 + $0x80] sm:$0xff] %vm1286_vm0, %v1270_v18  ;;  %v1479_v19 = vmul.f32 %v2252_v53, %v1270_v18  ;;  %v1271_v38 = vmul.f32 %v1176_v8, %v2467_v34 }
 0x104   : > { %v1183_v24 = vpop.permute.xlu0 %1182 }
 0x105   : > { %1511 = vst.msk [vmem:[%s2594_s17 + $0x80] sm:$0xff] %vm1286_vm0, %v1479_v19  ;;  %1304 = vst.msk [vmem:[%s2587_s16 + $0x88] sm:$0xff] %vm1286_vm0, %v1271_v38  ;;  %v1480_v48 = vmul.f32 %v2252_v53, %v1271_v38  ;;  %v1272_v33 = vmul.f32 %v1183_v24, %v2481_v45 }
 0x106   : > { %v1187_v39 = vpop.permute.xlu1 %1186 }
 0x107   : > { %1512 = vst.msk [vmem:[%s2594_s17 + $0x88] sm:$0xff] %vm1286_vm0, %v1480_v48  ;;  %1305 = vst.msk [vmem:[%s2587_s16 + $0x90] sm:$0xff] %vm1286_vm0, %v1272_v33  ;;  %v1481_v34 = vmul.f32 %v2258_v57, %v1272_v33  ;;  %v1273_v12 = vmul.f32 %v1187_v39, %v2483_v46 }
 0x108   : > { %v1194_v63 = vpop.permute.xlu0 %1193 }
 0x109   : > { %1513 = vst.msk [vmem:[%s2594_s17 + $0x90] sm:$0xff] %vm1286_vm0, %v1481_v34  ;;  %1306 = vst.msk [vmem:[%s2587_s16 + $0x98] sm:$0xff] %vm1286_vm0, %v1273_v12  ;;  %v1482_v53 = vmul.f32 %v2258_v57, %v1273_v12  ;;  %v1274_v45 = vmul.f32 %v1194_v63, %v2497_v50 }
 0x10a   : > { %v1198_v15 = vpop.permute.xlu1 %1197 }
 0x10b   : > { %1514 = vst.msk [vmem:[%s2594_s17 + $0x98] sm:$0xff] %vm1286_vm0, %v1482_v53  ;;  %1307 = vst.msk [vmem:[%s2587_s16 + $0xa0] sm:$0xff] %vm1286_vm0, %v1274_v45  ;;  %v1483_v46 = vmul.f32 %v2262_v62, %v1274_v45  ;;  %v1275_v11 = vmul.f32 %v1198_v15, %v2499_v17 }
 0x10c   : > { %v1205_v35 = vpop.permute.xlu0 %1204 }
 0x10d   : > { %1515 = vst.msk [vmem:[%s2594_s17 + $0xa0] sm:$0xff] %vm1286_vm0, %v1483_v46  ;;  %1308 = vst.msk [vmem:[%s2587_s16 + $0xa8] sm:$0xff] %vm1286_vm0, %v1275_v11  ;;  %v1484_v57 = vmul.f32 %v2262_v62, %v1275_v11  ;;  %v1276_v50 = vmul.f32 %v1205_v35, %v2513_v31 }
 0x10e   : > { %v1209_v47 = vpop.permute.xlu1 %1208 }
 0x10f   : > { %1516 = vst.msk [vmem:[%s2594_s17 + $0xa8] sm:$0xff] %vm1286_vm0, %v1484_v57  ;;  %1309 = vst.msk [vmem:[%s2587_s16 + $0xb0] sm:$0xff] %vm1286_vm0, %v1276_v50  ;;  %v1485_v17 = vmul.f32 %v2274_v3, %v1276_v50  ;;  %v1277_v43 = vmul.f32 %v1209_v47, %v2515_v54 }
 0x110   : > { %v1216_v44 = vpop.permute.xlu0 %1215 }
 0x111   : > { %1517 = vst.msk [vmem:[%s2594_s17 + $0xb0] sm:$0xff] %vm1286_vm0, %v1485_v17  ;;  %1310 = vst.msk [vmem:[%s2587_s16 + $0xb8] sm:$0xff] %vm1286_vm0, %v1277_v43  ;;  %v1486_v62 = vmul.f32 %v2274_v3, %v1277_v43  ;;  %v1278_v31 = vmul.f32 %v1216_v44, %v2529_v60 }
 0x112   : > { %v1220_v20 = vpop.permute.xlu1 %1219 }
 0x113   : > { %1518 = vst.msk [vmem:[%s2594_s17 + $0xb8] sm:$0xff] %vm1286_vm0, %v1486_v62  ;;  %1311 = vst.msk [vmem:[%s2587_s16 + $0xc0] sm:$0xff] %vm1286_vm0, %v1278_v31  ;;  %v1487_v54 = vmul.f32 %v2279_v10, %v1278_v31  ;;  %v1279_v13 = vmul.f32 %v1220_v20, %v2531_v49 }
 0x114   : > { %v1227_v5 = vpop.permute.xlu0 %1226 }
 0x115   : > { %1519 = vst.msk [vmem:[%s2594_s17 + $0xc0] sm:$0xff] %vm1286_vm0, %v1487_v54  ;;  %1312 = vst.msk [vmem:[%s2587_s16 + $0xc8] sm:$0xff] %vm1286_vm0, %v1279_v13  ;;  %v1488_v3 = vmul.f32 %v2279_v10, %v1279_v13  ;;  %v1280_v60 = vmul.f32 %v1227_v5, %v2543_v7 }
 0x116   : > { %v1231_v14 = vpop.permute.xlu1 %1230 }
 0x117   : > { %1520 = vst.msk [vmem:[%s2594_s17 + $0xc8] sm:$0xff] %vm1286_vm0, %v1488_v3  ;;  %1313 = vst.msk [vmem:[%s2587_s16 + $0xd0] sm:$0xff] %vm1286_vm0, %v1280_v60  ;;  %v1489_v49 = vmul.f32 %v2285_v16, %v1280_v60  ;;  %v1281_v0 = vmul.f32 %v1231_v14, %v2545_v61 }
 0x118   : > { %v1238_v59 = vpop.permute.xlu0 %1237 }
 0x119   : > { %1521 = vst.msk [vmem:[%s2594_s17 + $0xd0] sm:$0xff] %vm1286_vm0, %v1489_v49  ;;  %1314 = vst.msk [vmem:[%s2587_s16 + $0xd8] sm:$0xff] %vm1286_vm0, %v1281_v0  ;;  %v1490_v10 = vmul.f32 %v2285_v16, %v1281_v0  ;;  %v1282_v7 = vmul.f32 %v1238_v59, %v2557_v51 }
 0x11a   : > { %v1242_v27 = vpop.permute.xlu1 %1241 }
 0x11b   : > { %1522 = vst.msk [vmem:[%s2594_s17 + $0xd8] sm:$0xff] %vm1286_vm0, %v1490_v10  ;;  %1315 = vst.msk [vmem:[%s2587_s16 + $0xe0] sm:$0xff] %vm1286_vm0, %v1282_v7  ;;  %v1491_v61 = vmul.f32 %v2290_v21, %v1282_v7  ;;  %v1283_v25 = vmul.f32 %v1242_v27, %v2559_v30 }
 0x11c   : > { %v1249_v1 = vpop.permute.xlu0 %1248 }
 0x11d   : > { %1523 = vst.msk [vmem:[%s2594_s17 + $0xe0] sm:$0xff] %vm1286_vm0, %v1491_v61  ;;  %1316 = vst.msk [vmem:[%s2587_s16 + $0xe8] sm:$0xff] %vm1286_vm0, %v1283_v25  ;;  %v1492_v16 = vmul.f32 %v2290_v21, %v1283_v25  ;;  %v1284_v51 = vmul.f32 %v1249_v1, %v2569_v36 }
 0x11e   : > { %v1253_v29 = vpop.permute.xlu1 %1252 }
 0x11f   : > { %1524 = vst.msk [vmem:[%s2594_s17 + $0xe8] sm:$0xff] %vm1286_vm0, %v1492_v16  ;;  %1317 = vst.msk [vmem:[%s2587_s16 + $0xf0] sm:$0xff] %vm1286_vm0, %v1284_v51  ;;  %v1493_v30 = vmul.f32 %v2293_v9, %v1284_v51  ;;  %v1285_v21 = vmul.f32 %v1253_v29, %v2571_v55 }
 0x121   : > { %1525 = vst.msk [vmem:[%s2594_s17 + $0xf0] sm:$0xff] %vm1286_vm0, %v1493_v30  ;;  %1318 = vst.msk [vmem:[%s2587_s16 + $0xf8] sm:$0xff] %vm1286_vm0, %v1285_v21  ;;  %v1494_v36 = vmul.f32 %v2293_v9, %v1285_v21 }
 0x122   : > { %1902 = shalt.err (!%p1899_p5)
}
 0x123   : > { %s1903_s8 = scalar_lea.hbm %s2780_s10, 4096  ;;  %s1907_s0 = scalar_lea.hbm %s2924_s6, 8192 }
 0x124   : > { %p1904_p6 = scmp.ne.s32.totalorder %s2780_s10, %s1903_s8  ;;  %p1908_p10 = scmp.lt.u32.totalorder %s2780_s10, %s2924_s6 }
 0x125   : > { %p1909_p11 = scmp.lt.u32.totalorder %s1907_s0, %s1903_s8  ;;  %p1911_p13 = scmp.lt.u32.totalorder %s1903_s8, %s2780_s10 }
 0x126   : > { %p1905_p7 = pnand %p1904_p6, %p2118_p4 }
 0x127   : > { %p1910_p12 = por %p1909_p11, %p1908_p10 }
 0x128   : > { %p1906_p9 = pneg %p1905_p7 }
 0x129   : > { %p1912_p0 = por %p1911_p13, %p1910_p12 }
 0x12b   : > { %p1913_p1 = pnand %p1912_p0, %p1906_p9 }
 0x12d   : > { %1916 = shalt.err (!%p1913_p1)
}
 0x12e   : > { %s2032_s2 = smov 128   ;;  %s2033_s15 = smov 8   ;;  %1526 = vst.msk [vmem:[%s2594_s17 + $0xf8] sm:$0xff] %vm1286_vm0, %v1494_v36 }
 0x12f   : > { %1815 = dma.vmem_to_hbm [thread:$0]  (%p2118_p4), %s2789_s19, 4096, %s2780_s10, %s1533_s12, %s2032_s2, %s2032_s2, %s2033_s15  }
 0x130   : > { %s1917_s8 = scalar_lea.vmem %s2796_s20, 4096  ;;  %s2034_s16 = smov [#allocation6]  }
 0x131   : > { %p1918_p2 = scmp.ne.s32.totalorder %s2796_s20, %s1917_s8  ;;  %s1921_s30 = sshll.u32 %s2034_s16, 4  ;;  %s1922_s30 = int_to_ptr.vmem [resolvable:$false] %s1921_s30 }
 0x132   : > { %s1923_s0 = scalar_lea.vmem %s1922_s30, 8192  ;;  %p1924_p6 = scmp.lt.s32.totalorder %s2796_s20, %s1922_s30 }
 0x133   : > { %p1919_p3 = pnand %p1918_p2, %p2118_p4  ;;  %p1925_p7 = scmp.lt.s32.totalorder %s1923_s0, %s1917_s8 }
 0x135   : > { %p1920_p5 = pneg %p1919_p3  ;;  %p1926_p9 = por %p1925_p7, %p1924_p6 }
 0x137   : > { %p1927_p10 = pnand %p1926_p9, %p1920_p5 }
 0x139   : > { %1930 = shalt.err (!%p1927_p10)
}
 0x13a   : > { %s1931_s17 = scalar_lea.hbm %s2794_s22, 4096  ;;  %s1935_s23 = scalar_lea.hbm %s2925_s7, 8192 }
 0x13b   : > { %p1932_p11 = scmp.ne.s32.totalorder %s2794_s22, %s1931_s17  ;;  %p1936_p0 = scmp.lt.u32.totalorder %s2794_s22, %s2925_s7 }
 0x13c   : > { %p1937_p1 = scmp.lt.u32.totalorder %s1935_s23, %s1931_s17  ;;  %p1939_p3 = scmp.lt.u32.totalorder %s1931_s17, %s2794_s22 }
 0x13d   : > { %p1933_p12 = pnand %p1932_p11, %p2118_p4 }
 0x13e   : > { %p1938_p2 = por %p1937_p1, %p1936_p0 }
 0x13f   : > { %p1934_p13 = pneg %p1933_p12 }
 0x140   : > { %p1940_p5 = por %p1939_p3, %p1938_p2 }
 0x142   : > { %p1941_p6 = pnand %p1940_p5, %p1934_p13 }
 0x144   : > { %1944 = shalt.err (!%p1941_p6)
}
 0x145   : > { %1816 = dma.vmem_to_hbm [thread:$0]  (%p2118_p4), %s2796_s20, 4096, %s2794_s22, %s1533_s12, %s2032_s2, %s2032_s2, %s2033_s15  }
 0x146   : > { %s2936_s8 = sand.u32 1, %s2011_s25   ;;  %s1945_s0 = scalar_lea.vmem %s2808_s27, 4096 }
 0x147   : > { %s2867_s30 = scalar_lea.sflag [#allocation3], %s2936_s8  ;;  %p1946_p7 = scmp.ne.s32.totalorder %s2808_s27, %s1945_s0 }
 0x148   : > { %s2035_s17 = smov [#allocation2]  }
 0x149   : > { %p1947_p9 = pnand %p1946_p7, %p2118_p4  ;;  %s1949_s19 = sshll.u32 %s2035_s17, 4  ;;  %s1950_s19 = int_to_ptr.vmem [resolvable:$false] %s1949_s19 }
 0x14a   : > { %s1951_s18 = scalar_lea.vmem %s1950_s19, 8192  ;;  %p1952_p11 = scmp.lt.s32.totalorder %s2808_s27, %s1950_s19 }
 0x14b   : > { %p1948_p10 = pneg %p1947_p9  ;;  %p1953_p12 = scmp.lt.s32.totalorder %s1951_s18, %s1945_s0 }
 0x14d   : > { %p1954_p13 = por %p1953_p12, %p1952_p11 }
 0x14f   : > { %p1955_p0 = pnand %p1954_p13, %p1948_p10 }
 0x151   : > { %1958 = shalt.err (!%p1955_p0)
}
 0x152   : > { %s1959_s20 = scalar_lea.hbm %s2806_s21, 4096  ;;  %s1963_s10 = scalar_lea.hbm %s2923_s5, 8192 }
 0x153   : > { %p1960_p1 = scmp.ne.s32.totalorder %s2806_s21, %s1959_s20  ;;  %p1964_p5 = scmp.lt.u32.totalorder %s2806_s21, %s2923_s5 }
 0x154   : > { %p1965_p6 = scmp.lt.u32.totalorder %s1963_s10, %s1959_s20  ;;  %p1967_p9 = scmp.lt.u32.totalorder %s1959_s20, %s2806_s21 }
 0x155   : > { %p1961_p2 = pnand %p1960_p1, %p2118_p4 }
 0x156   : > { %p1966_p7 = por %p1965_p6, %p1964_p5 }
 0x157   : > { %p1962_p3 = pneg %p1961_p2 }
 0x158   : > { %p1968_p10 = por %p1967_p9, %p1966_p7 }
 0x15a   : > { %p1969_p11 = pnand %p1968_p10, %p1962_p3 }
 0x15c   : > { %1972 = shalt.err (!%p1969_p11)
}
 0x15d   : > { %1814 = dma.vmem_to_hbm [thread:$0]  (%p2118_p4), %s2808_s27, 4096, %s2806_s21, %s2867_s30, %s2032_s2, %s2032_s2, %s2033_s15  }
 0x15e PF: > { %p1830_p12 = scmp.ge.s32.totalorder %s2027_s29, 2  ;;  %s1607_s16 = sand.u32 1, %s2007_s24  }
 0x15f   : > { %s1608_s8 = scalar_lea.sflag [#allocation3], %s1607_s16 }
 0x160   : > { %p1821_p13 = pnand %p1830_p12, %p2127_p8 }
 0x162   : > { %1998 = dma.done.wait (!%p1821_p13), %s1608_s8, 4096  }
 0x163   : > { %2000 = vsyncadd (!%p1821_p13), %s1608_s8, 4294963200  ;;  %s2937_s11 = sadd.s32 4294967294, %s2027_s29  }
 0x164   : > { %s1616_s0 = sand.u32 1, %s2937_s11  }
 0x165   : > { %s1617_s17 = scalar_lea.sflag [#allocation5], %s1616_s0 }
 0x166   : > { %2002 = dma.done.wait (!%p1821_p13), %s1617_s17, 8192  }
 0x167   : > { %2004 = vsyncadd (!%p1821_p13), %s1617_s17, 4294959104  ;;  %s24_s29 = sadd.s32 1, %s2027_s29   ;;  %s2938_s24 = smov %s2011_s25 }
 0x168   : > { %p21_p4 = scmp.ge.s32.totalorder %s24_s29, 4   ;;  %s2939_s25 = smov %s2015_s26 }
 0x169   : > { %s2940_s26 = smov %s2133_s14  ;;  %s2941_s27 = smov %s2023_s28 }
 0x16a   : > { %s2942_s28 = smov %s2944_s9  ;;  %23 = sbr.rel (!%p21_p4) target bundleno = 10 (0xa), region = 113 }
 0x171   :  { %1631 = vsyncpa [#allocation3], 1 }
 0x172   :  { %1633 = vsyncpa [#allocation3 + $0x1], 1 }
 0x173   :  { %1634 = vsyncpa [#allocation5], 1 }
 0x174   :  { %1636 = vsyncpa [#allocation5 + $0x1], 1 }

// kernel: tfattn3_forward.2
= control target key start
LH: loop header
LB: loop body
LE: loop exit
PB: predicated region body
PF: predicated region fallthrough
CT: control target
= control target key end

     0   :  { %s6973_s17 = smov 0   ;;  %s10342_s0 = inlined_call_operand.vmem [shape: f32[2,16,16], index: 0, kind: input, shape index: {}]   ;;  %s10343_s1 = inlined_call_operand.vmem [shape: f32[2,16,16], index: 1, kind: input, shape index: {}]   ;;  %s10344_s2 = inlined_call_operand.vmem [shape: f32[16,16,3], index: 2, kind: input, shape index: {}]   ;;  %s10345_s3 = inlined_call_operand.vmem [shape: f32[16,1], index: 3, kind: input, shape index: {}]   ;;  %s10346_s4 = inlined_call_operand.vmem [shape: f32[16,16,3], index: 4, kind: input, shape index: {}]   ;;  %s10347_s5 = inlined_call_operand.vmem [shape: f32[16,1], index: 5, kind: input, shape index: {}]   ;;  %s10348_s6 = inlined_call_operand.vmem [shape: f32[16,16,5], index: 6, kind: input, shape index: {}]   ;;  %s10349_s7 = inlined_call_operand.vmem [shape: f32[16,1], index: 7, kind: input, shape index: {}]   ;;  %s10350_s8 = inlined_call_operand.vmem [shape: f32[16,16,5], index: 8, kind: input, shape index: {}]   ;;  %s10351_s9 = inlined_call_operand.vmem [shape: f32[16,1], index: 9, kind: input, shape index: {}]   ;;  %s10352_s10 = inlined_call_operand.vmem [shape: f32[2,16,16], index: 10, kind: output, shape index: {0}]   ;;  %s10353_s11 = inlined_call_operand.vmem [shape: f32[2,16,16], index: 11, kind: output, shape index: {1}]  }
   0x1 LB: > { %s6356_s18 = sadd.s32 4294967295, %s6900_s17   ;;  %p6360_p0 = scmp.ge.s32.totalorder %s6900_s17, 1  ;;  %s6900_s17 = sphi %s6973_s17, %s22_s17  }
   0x2   : > { %p350_p1 = scmp.lt.s32.totalorder %s6900_s17, 3 }
   0x4   : > { %p351_p2 = pnand %p6360_p0, %p350_p1 }
   0x6   : > { %354 = sbr.rel (%p351_p2) target bundleno = 2108 (0x83c), region = 60 }
   0xd   : > { %v6984_v0 = vld [vmem:[%s10344_s2 + $0x8] sm:$0xff]  ;;  %p400_p3 = scmp.lt.s32.totalorder %s6356_s18, 1  ;;  %v10356_v1 = vmov 1   ;;  %v10354_v2 = vmov 2   ;;  %v6992_v3 = vld [vmem:[%s10344_s2 + $0x10] sm:$0xff]  ;;  %v427_v7 = vld [vmem:[%s10344_s2 + $0x18] sm:$0xff] }
   0xe   : > { %6706 = vset.pattern.permute.xlu1 %v10356_v1  ;;  %6713 = vset.pattern.permute.xlu0 %v10354_v2  ;;  %s6904_s29 = smov 1   ;;  %v424_v8 = vld [vmem:[%s10344_s2] sm:$0xff]  ;;  %v429_v9 = vld [vmem:[%s10344_s2 + $0x28] sm:$0xff]  ;;  %v431_v10 = vld [vmem:[%s10344_s2 + $0x38] sm:$0xff]  ;;  %v10358_v23 = vmov 0   ;;  %vm466_vm0 = vcmask 7168  }
   0xf   : > { %508 = vperm.xlu1 %6706, %v6984_v0   ;;  %s10788_s18 = smov (!%p400_p3, %s6356_s18), 1  ;;  %v433_v11 = vld [vmem:[%s10344_s2 + $0x48] sm:$0xff]  ;;  %v435_v12 = vld [vmem:[%s10344_s2 + $0x58] sm:$0xff]  ;;  %v7060_v24 = vld [vmem:[%s10344_s2 + $0x20] sm:$0xff]  ;;  %vm469_vm1 = vcmask 138240   ;;  %s6906_s15 = smov 127  }
  0x10   : > { %s6994_s23 = sshll.u32 %s10788_s18, 4  ;;  %v437_v13 = vld [vmem:[%s10344_s2 + $0x68] sm:$0xff]  ;;  %v439_v14 = vld [vmem:[%s10344_s2 + $0x78] sm:$0xff]  ;;  %v7066_v25 = vld [vmem:[%s10344_s2 + $0x30] sm:$0xff]  ;;  %vm611_vm2 = vcmask 130112   ;;  %vm748_vm3 = vcmask 1041409  }
  0x11   : > { %s404_s26 = scalar_lea.vmem %s10342_s0, %s6994_s23  ;;  %v441_v15 = vld [vmem:[%s10344_s2 + $0x88] sm:$0xff]  ;;  %v443_v16 = vld [vmem:[%s10344_s2 + $0x98] sm:$0xff]  ;;  %v7072_v26 = vld [vmem:[%s10344_s2 + $0x40] sm:$0xff]  ;;  %vm750_vm4 = vcmask 1042434   ;;  %vm752_vm5 = vcmask 1043459   ;;  %vm754_vm6 = vcmask 1044484   ;;  %s409_s27 = scalar_lea.vmem %s10343_s1, %s6994_s23 }
  0x12   : > { %v420_v4 = vld [vmem:[%s404_s26] sm:$0xff]  ;;  %v421_v5 = vld [vmem:[%s404_s26 + $0x8] sm:$0xff]  ;;  %v447_v18 = vld [vmem:[%s10344_s2 + $0xb8] sm:$0xff]  ;;  %s6907_s26 = smov 126   ;;  %vm756_vm7 = vcmask 1045509   ;;  %vm758_vm8 = vcmask 1046534   ;;  %s414_s19 = scalar_lea.vmem %s10352_s10, %s6994_s23 }
  0x13   : > { %511 = vperm.xlu1 %6706, %v6992_v3   ;;  %v6708_v6 = vpack.i.bf16 %v421_v5, %v420_v4  ;;  %v445_v17 = vld [vmem:[%s10344_s2 + $0xa8] sm:$0xff]  ;;  %v451_v20 = vld [vmem:[%s10344_s2 + $0xd8] sm:$0xff]  ;;  %v7078_v27 = vld [vmem:[%s10344_s2 + $0x50] sm:$0xff]  ;;  %vm760_vm9 = vcmask 1047559   ;;  %vm777_vm10 = vcmask 130048   ;;  %s6908_s12 = smov 2  }
  0x14   : > { %v449_v19 = vld [vmem:[%s10344_s2 + $0xc8] sm:$0xff]  ;;  %v7050_v22 = vld [vmem:[%s10344_s2 + $0xf8] sm:$0xff]  ;;  %v7084_v28 = vld [vmem:[%s10344_s2 + $0x60] sm:$0xff]  ;;  %vm2704_vm12 = vcmask 15360   ;;  %vm2707_vm13 = vcmask 146432   ;;  %s6910_s13 = smov 125  }
  0x15   : > { %6709 = vrot.lane.b32.xlu0 %v6708_v6, %s6904_s29  ;;  %v453_v21 = vld [vmem:[%s10344_s2 + $0xe8] sm:$0xff]  ;;  %v7090_v29 = vld [vmem:[%s10344_s2 + $0x70] sm:$0xff]  ;;  %v7096_v30 = vld [vmem:[%s10344_s2 + $0x80] sm:$0xff]  ;;  %s6912_s24 = smov 124  }
  0x16   : > { %v7102_v31 = vld [vmem:[%s10344_s2 + $0x90] sm:$0xff]  ;;  %v7108_v32 = vld [vmem:[%s10344_s2 + $0xa0] sm:$0xff]  ;;  %v7178_v55 = vld [vmem:[%s10346_s4 + $0x18] sm:$0xff] }
  0x17   : > { %514 = vperm.xlu1 %6706, %v427_v7   ;;  %v7114_v33 = vld [vmem:[%s10344_s2 + $0xb0] sm:$0xff]  ;;  %v7120_v34 = vld [vmem:[%s10344_s2 + $0xc0] sm:$0xff]  ;;  %v7189_v58 = vld [vmem:[%s10346_s4 + $0x28] sm:$0xff] }
  0x18   : > { %v7138_v45 = vld [vmem:[%s10344_s2 + $0xd0] sm:$0xff]  ;;  %v7147_v47 = vld [vmem:[%s10344_s2 + $0xe0] sm:$0xff]  ;;  %v7200_v61 = vld [vmem:[%s10346_s4 + $0x38] sm:$0xff] }
  0x19   : > { %1191 = vperm.xlu0 %6713, %v424_v8   ;;  %v7156_v49 = vld [vmem:[%s10344_s2 + $0xf0] sm:$0xff]  ;;  %v7167_v52 = vld [vmem:[%s10346_s4] sm:$0xff]  ;;  %v7222_v6 = vld [vmem:[%s10346_s4 + $0x58] sm:$0xff] }
  0x1a   : > { %vm7528_vm11 = vmpackc.low %vm469_vm1, %vm469_vm1 }
  0x1b   : > { %520 = vperm.xlu1 %6706, %v429_v9   ;;  %vm8444_vm14 = vmpackc.low %vm2707_vm13, %vm2707_vm13 }
  0x1d   : > { %1200 = vperm.xlu0 %6713, %v427_v7  }
  0x1f   : > { %526 = vperm.xlu1 %6706, %v431_v10  }
  0x21   : > { %1206 = vperm.xlu0 %6713, %v429_v9  }
  0x23   : > { %532 = vperm.xlu1 %6706, %v433_v11  }
  0x25   : > { %1212 = vperm.xlu0 %6713, %v431_v10  }
  0x27   : > { %538 = vperm.xlu1 %6706, %v435_v12  }
  0x29   : > { %1218 = vperm.xlu0 %6713, %v433_v11  }
  0x2b   : > { %544 = vperm.xlu1 %6706, %v437_v13  }
  0x2d   : > { %1224 = vperm.xlu0 %6713, %v435_v12  }
  0x2f   : > { %550 = vperm.xlu1 %6706, %v439_v14  }
  0x31   : > { %1230 = vperm.xlu0 %6713, %v437_v13  }
  0x33   : > { %556 = vperm.xlu1 %6706, %v441_v15  }
  0x35   : > { %1236 = vperm.xlu0 %6713, %v439_v14  }
  0x37   : > { %562 = vperm.xlu1 %6706, %v443_v16  }
  0x39   : > { %1242 = vperm.xlu0 %6713, %v441_v15  }
  0x3b   : > { %568 = vperm.xlu1 %6706, %v445_v17  }
  0x3d   : > { %1248 = vperm.xlu0 %6713, %v443_v16  }
  0x3f   : > { %574 = vperm.xlu1 %6706, %v447_v18  }
  0x41   : > { %1254 = vperm.xlu0 %6713, %v445_v17  }
  0x43   : > { %580 = vperm.xlu1 %6706, %v449_v19  }
  0x45   : > { %1260 = vperm.xlu0 %6713, %v447_v18  }
  0x47   : > { %586 = vperm.xlu1 %6706, %v451_v20  }
  0x49   : > { %1266 = vperm.xlu0 %6713, %v449_v19  }
  0x4b   : > { %592 = vperm.xlu1 %6706, %v453_v21  }
  0x4d   : > { %1272 = vperm.xlu0 %6713, %v451_v20  }
  0x4f   : > { %598 = vperm.xlu1 %6706, %v7050_v22  }
  0x51   : > { %1278 = vperm.xlu0 %6713, %v453_v21  }
  0x53   : > { %6707 = vset.pattern.permute.xlu1 %v10358_v23 }
  0x54   : > { %858 = vperm.xlu1 %6707, %v424_v8  }
  0x55   : > { %1284 = vperm.xlu0 %6713, %v7050_v22  }
  0x58   : > { %864 = vperm.xlu1 %6707, %v6992_v3  }
  0x59   : > { %6715 = vset.pattern.permute.xlu0 %v10356_v1 }
  0x5a   : > { %505 = vperm.xlu0 %6715, %v424_v8  }
  0x5c   : > { %867 = vperm.xlu1 %6707, %v427_v7  }
  0x5e   : > { %517 = vperm.xlu0 %6715, %v7060_v24  }
  0x60   : > { %873 = vperm.xlu1 %6707, %v429_v9   ;;  %v7233_v9 = vld [vmem:[%s10346_s4 + $0x68] sm:$0xff] }
  0x61   : > { %10445 = vst [vmem:[#allocation9_spill] sm:$0xff] %v7233_v9 }
  0x62   : > { %523 = vperm.xlu0 %6715, %v7066_v25  }
  0x64   : > { %879 = vperm.xlu1 %6707, %v431_v10  }
  0x66   : > { %529 = vperm.xlu0 %6715, %v7072_v26  }
  0x68   : > { %885 = vperm.xlu1 %6707, %v433_v11  }
  0x6a   : > { %535 = vperm.xlu0 %6715, %v7078_v27  }
  0x6c   : > { %891 = vperm.xlu1 %6707, %v435_v12   ;;  %v7244_v12 = vld [vmem:[%s10346_s4 + $0x78] sm:$0xff] }
  0x6d   : > { %10447 = vst [vmem:[#allocation11_spill] sm:$0xff] %v7244_v12 }
  0x6e   : > { %541 = vperm.xlu0 %6715, %v7084_v28  }
  0x70   : > { %897 = vperm.xlu1 %6707, %v437_v13  }
  0x72   : > { %547 = vperm.xlu0 %6715, %v7090_v29  }
  0x74   : > { %903 = vperm.xlu1 %6707, %v439_v14  }
  0x76   : > { %553 = vperm.xlu0 %6715, %v7096_v30  }
  0x78   : > { %909 = vperm.xlu1 %6707, %v441_v15   ;;  %v7255_v15 = vld [vmem:[%s10346_s4 + $0x88] sm:$0xff] }
  0x79   : > { %10449 = vst [vmem:[#allocation13_spill] sm:$0xff] %v7255_v15 }
  0x7a   : > { %559 = vperm.xlu0 %6715, %v7102_v31  }
  0x7c   : > { %915 = vperm.xlu1 %6707, %v443_v16  }
  0x7e   : > { %565 = vperm.xlu0 %6715, %v7108_v32  }
  0x80   : > { %921 = vperm.xlu1 %6707, %v445_v17  }
  0x82   : > { %571 = vperm.xlu0 %6715, %v7114_v33  }
  0x84   : > { %927 = vperm.xlu1 %6707, %v447_v18   ;;  %v7266_v18 = vld [vmem:[%s10346_s4 + $0x98] sm:$0xff] }
  0x85   : > { %10451 = vst [vmem:[#allocation15_spill] sm:$0xff] %v7266_v18 }
  0x86   : > { %577 = vperm.xlu0 %6715, %v7120_v34  }
  0x87   : > { %v6710_v35 = vpop.permute.xlu0 %6709 }
  0x88   : > { %933 = vperm.xlu1 %6707, %v449_v19   ;;  %v6712_v36 = vunpack.i.h.bf16 %v6710_v35  ;;  %v6711_v37 = vunpack.i.l.bf16 %v6710_v35 }
  0x8a   : > { %v468_v38 = vsel %vm466_vm0, 0.0, %v6712_v36  ;;  %v467_v39 = vsel %vm466_vm0, 0.0, %v6711_v37  ;;  %v7288_v36 = vld [vmem:[%s10346_s4 + $0xb8] sm:$0xff] }
  0x8b   : > { %v7125_v40 = vpack.c.bf16 %v468_v38, %v467_v39  ;;  %v470_v41 = vsel %vm469_vm1, %v467_v39, 0.0  ;;  %v471_v42 = vsel %vm469_vm1, %v468_v38, 0.0  ;;  %10455 = vst [vmem:[#allocation19_spill] sm:$0xff] %v7288_v36  ;;  %v7299_v39 = vld [vmem:[%s10346_s4 + $0xc8] sm:$0xff] }
  0x8c   : > { %939 = vperm.xlu1 %6707, %v451_v20   ;;  %v7129_v43 = vpack.i.bf16 %v471_v42, %v470_v41  ;;  %10457 = vst [vmem:[#allocation21_spill] sm:$0xff] %v7299_v39 }
  0x8e   : > { %v7131_v44 = vpop.permute.xlu1 %508  ;;  %6717 = vrot.lane.b32.xlu0 %v7129_v43, %s6906_s15 }
  0x90   : > { %945 = vperm.xlu1 %6707, %v453_v21   ;;  %v7277_v21 = vld [vmem:[%s10346_s4 + $0xa8] sm:$0xff] }
  0x91   : > { %10453 = vst [vmem:[#allocation17_spill] sm:$0xff] %v7277_v21 }
  0x92   : > { %v7140_v46 = vpop.permute.xlu1 %511  ;;  %583 = vperm.xlu0 %6715, %v7138_v45  }
  0x94   : > { %951 = vperm.xlu1 %6707, %v7050_v22  }
  0x96   : > { %v7149_v48 = vpop.permute.xlu1 %514  ;;  %589 = vperm.xlu0 %6715, %v7147_v47  }
  0x98   : > { %6714 = vset.pattern.permute.xlu1 %v10354_v2  ;;  %v7159_v50 = vpop.permute.xlu0 %1191  ;;  %v7310_v2 = vld [vmem:[%s10346_s4 + $0xd8] sm:$0xff] }
  0x99   : > { %1194 = vperm.xlu1 %6714, %v6984_v0   ;;  %10438 = vst [vmem:[#allocation2_spill] sm:$0xff] %v7159_v50  ;;  %10459 = vst [vmem:[#allocation23_spill] sm:$0xff] %v7310_v2 }
  0x9a   : > { %v7161_v51 = vpop.permute.xlu1 %520  ;;  %595 = vperm.xlu0 %6715, %v7156_v49  }
  0x9c   : > { %v7170_v53 = vpop.permute.xlu0 %1200 }
  0x9d   : > { %1197 = vperm.xlu1 %6714, %v6992_v3   ;;  %10439 = vst [vmem:[#allocation3_spill] sm:$0xff] %v7170_v53  ;;  %v7211_v3 = vld [vmem:[%s10346_s4 + $0x48] sm:$0xff] }
  0x9e   : > { %v7172_v54 = vpop.permute.xlu1 %526  ;;  %1624 = vperm.xlu0 %6715, %v7167_v52  }
  0xa0   : > { %v7181_v56 = vpop.permute.xlu0 %1206 }
  0xa1   : > { %1203 = vperm.xlu1 %6714, %v7060_v24   ;;  %10440 = vst [vmem:[#allocation4_spill] sm:$0xff] %v7181_v56  ;;  %v2666_v56 = vld [vmem:[%s10348_s6 + $0x20] sm:$0xff] }
  0xa2   : > { %v7183_v57 = vpop.permute.xlu1 %532  ;;  %1633 = vperm.xlu0 %6715, %v7178_v55  }
  0xa4   : > { %v7192_v59 = vpop.permute.xlu0 %1212 }
  0xa5   : > { %1209 = vperm.xlu1 %6714, %v7066_v25   ;;  %10441 = vst [vmem:[#allocation5_spill] sm:$0xff] %v7192_v59  ;;  %v7351_v59 = vld [vmem:[%s10346_s4 + $0x8] sm:$0xff] }
  0xa6   : > { %v7194_v60 = vpop.permute.xlu1 %538  ;;  %1639 = vperm.xlu0 %6715, %v7189_v58  }
  0xa8   : > { %v7203_v62 = vpop.permute.xlu0 %1218 }
  0xa9   : > { %1215 = vperm.xlu1 %6714, %v7072_v26   ;;  %10442 = vst [vmem:[#allocation6_spill] sm:$0xff] %v7203_v62 }
  0xaa   : > { %v7205_v63 = vpop.permute.xlu1 %544  ;;  %1645 = vperm.xlu0 %6715, %v7200_v61  }
  0xac   : > { %v7214_v4 = vpop.permute.xlu0 %1224 }
  0xad   : > { %1221 = vperm.xlu1 %6714, %v7078_v27   ;;  %10443 = vst [vmem:[#allocation7_spill] sm:$0xff] %v7214_v4 }
  0xae   : > { %v7216_v5 = vpop.permute.xlu1 %550  ;;  %1651 = vperm.xlu0 %6715, %v7211_v3  }
  0xb0   : > { %v7225_v7 = vpop.permute.xlu0 %1230 }
  0xb1   : > { %1227 = vperm.xlu1 %6714, %v7084_v28   ;;  %10444 = vst [vmem:[#allocation8_spill] sm:$0xff] %v7225_v7  ;;  %v2663_v7 = vld [vmem:[%s10348_s6 + $0x8] sm:$0xff] }
  0xb2   : > { %v7227_v8 = vpop.permute.xlu1 %556  ;;  %1657 = vperm.xlu0 %6715, %v7222_v6  }
  0xb4   : > { %v7236_v10 = vpop.permute.xlu0 %1236 }
  0xb5   : > { %1233 = vperm.xlu1 %6714, %v7090_v29   ;;  %10446 = vst [vmem:[#allocation10_spill] sm:$0xff] %v7236_v10 }
  0xb6   : > { %v7238_v11 = vpop.permute.xlu1 %562  ;;  %1663 = vperm.xlu0 %6715, %v7233_v9  }
  0xb8   : > { %v7247_v13 = vpop.permute.xlu0 %1242 }
  0xb9   : > { %1239 = vperm.xlu1 %6714, %v7096_v30   ;;  %10448 = vst [vmem:[#allocation12_spill] sm:$0xff] %v7247_v13  ;;  %v10466_v13 = vmov 0  }
  0xba   : > { %v7249_v14 = vpop.permute.xlu1 %568  ;;  %1669 = vperm.xlu0 %6715, %v7244_v12  }
  0xbc   : > { %v7258_v16 = vpop.permute.xlu0 %1248 }
  0xbd   : > { %1245 = vperm.xlu1 %6714, %v7102_v31   ;;  %10450 = vst [vmem:[#allocation14_spill] sm:$0xff] %v7258_v16 }
  0xbe   : > { %v7260_v17 = vpop.permute.xlu1 %574  ;;  %1675 = vperm.xlu0 %6715, %v7255_v15  }
  0xc0   : > { %v7269_v19 = vpop.permute.xlu0 %1254 }
  0xc1   : > { %1251 = vperm.xlu1 %6714, %v7108_v32   ;;  %10452 = vst [vmem:[#allocation16_spill] sm:$0xff] %v7269_v19  ;;  %v600_v19 = vlaneseq }
  0xc2   : > { %v7271_v20 = vpop.permute.xlu1 %580  ;;  %1681 = vperm.xlu0 %6715, %v7266_v18  }
  0xc3   : > { %v601_v4 = vand.u32 127, %v600_v19  ;;  %v603_v53 = vshrl.u32 %v600_v19, 7 }
  0xc4   : > { %v7280_v22 = vpop.permute.xlu0 %1260 }
  0xc5   : > { %1257 = vperm.xlu1 %6714, %v7114_v33   ;;  %10454 = vst [vmem:[#allocation18_spill] sm:$0xff] %v7280_v22  ;;  %v606_v50 = vadd.s32 4294967288, %v601_v4  ;;  %v7370_v19 = vsub.s32 %v601_v4, %v603_v53 }
  0xc6   : > { %v7282_v35 = vpop.permute.xlu1 %586  ;;  %1687 = vperm.xlu0 %6715, %v7277_v21  }
  0xc8   : > { %v7291_v37 = vpop.permute.xlu0 %1266 }
  0xc9   : > { %1263 = vperm.xlu1 %6714, %v7120_v34   ;;  %10456 = vst [vmem:[#allocation20_spill] sm:$0xff] %v7291_v37 }
  0xca   : > { %v7293_v38 = vpop.permute.xlu1 %592  ;;  %1693 = vperm.xlu0 %6715, %v7288_v36  }
  0xcc   : > { %v7302_v41 = vpop.permute.xlu0 %1272 }
  0xcd   : > { %1269 = vperm.xlu1 %6714, %v7138_v45   ;;  %10458 = vst [vmem:[#allocation22_spill] sm:$0xff] %v7302_v41  ;;  %v7321_v41 = vld [vmem:[%s10346_s4 + $0xe8] sm:$0xff] }
  0xce   : > { %v7304_v42 = vpop.permute.xlu1 %598  ;;  %1699 = vperm.xlu0 %6715, %v7299_v39   ;;  %10462 = vst [vmem:[#allocation26_spill] sm:$0xff] %v7321_v41 }
  0xd0   : > { %v7313_v1 = vpop.permute.xlu0 %1278 }
  0xd1   : > { %1275 = vperm.xlu1 %6714, %v7147_v47   ;;  %10460 = vst [vmem:[#allocation24_spill] sm:$0xff] %v7313_v1  ;;  %v7332_v1 = vld [vmem:[%s10346_s4 + $0xf8] sm:$0xff] }
  0xd2   : > { %1705 = vperm.xlu0 %6715, %v7310_v2   ;;  %10465 = vst [vmem:[#allocation29_spill] sm:$0xff] %v7332_v1 }
  0xd3   : > { %v7316_v23 = vpop.permute.xlu1 %858 }
  0xd4   : > { %10461 = vst [vmem:[#allocation25_spill] sm:$0xff] %v7316_v23  ;;  %v7324_v37 = vpop.permute.xlu0 %1284  ;;  %v7368_v23 = vsub.s32 %v606_v50, %v603_v53  ;;  %v7385_v50 = vld [vmem:[%s10346_s4 + $0x20] sm:$0xff] }
  0xd5   : > { %1281 = vperm.xlu1 %6714, %v7156_v49   ;;  %10463 = vst [vmem:[#allocation27_spill] sm:$0xff] %v7324_v37  ;;  %v457_v37 = vld [vmem:[%s10345_s3 + $0x8] sm:$0xff] }
  0xd6   : > { %1711 = vperm.xlu0 %6715, %v7321_v41   ;;  %v701_v18 = vrot.slane %v7249_v14, %v7368_v23 }
  0xd7   : > { %v7327_v22 = vpop.permute.xlu1 %864 }
  0xd8   : > { %10464 = vst [vmem:[#allocation28_spill] sm:$0xff] %v7327_v22 }
  0xd9   : > { %6722 = vrot.lane.b32.xlu1 %v7129_v43, %s6907_s26  ;;  %v506_v16 = vpop.permute.xlu0 %505 }
  0xda   : > { %6726 = vset.pattern.permute.xlu1 %v10466_v13  ;;  %1717 = vperm.xlu0 %6715, %v7332_v1   ;;  %v620_v1 = vrot.slane %v7149_v48, %v7368_v23  ;;  %v605_v41 = vrot.slane %v506_v16, %v7370_v19  ;;  %v638_v16 = vrot.slane %v7172_v54, %v7368_v23  ;;  %v2672_v54 = vld [vmem:[%s10348_s6 + $0x50] sm:$0xff] }
  0xdb   : > { %v7341_v10 = vpop.permute.xlu1 %867 }
  0xdc   : > { %10467 = vst [vmem:[#allocation30_spill] sm:$0xff] %v7341_v10  ;;  %v10469_v10 = vmov 1  }
  0xdd   : > { %1538 = vperm.xlu1 %6726, %v457_v37   ;;  %v518_v62 = vpop.permute.xlu0 %517  ;;  %v7363_v37 = vld [vmem:[%s10346_s4 + $0x10] sm:$0xff] }
  0xde   : > { %2746 = vperm.xlu0 %6715, %v2663_v7   ;;  %v625_v48 = vrot.slane %v518_v62, %v7370_v19  ;;  %v647_v62 = vrot.slane %v7183_v57, %v7368_v23 }
  0xdf   : > { %v7346_v43 = vpop.permute.xlu1 %873 }
  0xe0   : > { %10468 = vst [vmem:[#allocation31_spill] sm:$0xff] %v7346_v43  ;;  %v2668_v43 = vld [vmem:[%s10348_s6 + $0x30] sm:$0xff] }
  0xe1   : > { %6727 = vset.pattern.permute.xlu1 %v10469_v10  ;;  %v524_v22 = vpop.permute.xlu0 %523 }
  0xe2   : > { %1627 = vperm.xlu1 %6727, %v7351_v59   ;;  %2755 = vperm.xlu0 %6715, %v2666_v56   ;;  %v610_v56 = vrot.slane %v7131_v44, %v7368_v23  ;;  %v2670_v44 = vld [vmem:[%s10348_s6 + $0x40] sm:$0xff] }
  0xe3   : > { %v7358_v7 = vpop.permute.xlu1 %879 }
  0xe4   : > { %10470 = vst [vmem:[#allocation32_spill] sm:$0xff] %v7358_v7  ;;  %v616_v7 = vrot.slane %v7140_v46, %v7370_v19  ;;  %v629_v46 = vrot.slane %v7161_v51, %v7368_v23  ;;  %v7404_v51 = vld [vmem:[%s10346_s4 + $0x30] sm:$0xff] }
  0xe5   : > { %v530_v10 = vpop.permute.xlu0 %529 }
  0xe6   : > { %1630 = vperm.xlu1 %6727, %v7363_v37   ;;  %2761 = vperm.xlu0 %6715, %v2668_v43   ;;  %v621_v4 = vsel %vm611_vm2, %v620_v1, %v616_v7  ;;  %v612_v43 = vsel %vm611_vm2, %v610_v56, %v605_v41  ;;  %v643_v1 = vrot.slane %v530_v10, %v7370_v19 }
  0xe7   : > { %v7380_v2 = vpop.permute.xlu1 %885  ;;  %v665_v7 = vrot.slane %v7205_v63, %v7368_v23  ;;  %v749_v56 = vsel %vm748_vm3, %v621_v4, %v612_v43  ;;  %v7427_v63 = vld [vmem:[%s10346_s4 + $0x40] sm:$0xff] }
  0xe8   : > { %10471 = vst [vmem:[#allocation33_spill] sm:$0xff] %v7380_v2  ;;  %v634_v2 = vrot.slane %v524_v22, %v7370_v19  ;;  %v656_v22 = vrot.slane %v7194_v60, %v7368_v23 }
  0xe9   : > { %v536_v53 = vpop.permute.xlu0 %535 }
  0xea   : > { %1636 = vperm.xlu1 %6727, %v7385_v50   ;;  %2767 = vperm.xlu0 %6715, %v2670_v44   ;;  %v652_v41 = vrot.slane %v536_v53, %v7370_v19  ;;  %v630_v44 = vsel %vm611_vm2, %v629_v46, %v625_v48  ;;  %v639_v10 = vsel %vm611_vm2, %v638_v16, %v634_v2  ;;  %v2674_v46 = vld [vmem:[%s10348_s6 + $0x60] sm:$0xff] }
  0xeb   : > { %v7399_v39 = vpop.permute.xlu1 %891  ;;  %v648_v53 = vsel %vm611_vm2, %v647_v62, %v643_v1  ;;  %v674_v2 = vrot.slane %v7216_v5, %v7368_v23  ;;  %v751_v48 = vsel %vm750_vm4, %v630_v44, %v749_v56  ;;  %v7446_v5 = vld [vmem:[%s10346_s4 + $0x50] sm:$0xff] }
  0xec   : > { %10472 = vst [vmem:[#allocation34_spill] sm:$0xff] %v7399_v39  ;;  %v657_v4 = vsel %vm611_vm2, %v656_v22, %v652_v41  ;;  %v753_v16 = vsel %vm752_vm5, %v639_v10, %v751_v48 }
  0xed   : > { %v542_v57 = vpop.permute.xlu0 %541  ;;  %v755_v22 = vsel %vm754_vm6, %v648_v53, %v753_v16  ;;  %v7465_v53 = vld [vmem:[%s10346_s4 + $0x60] sm:$0xff]  ;;  %v2680_v16 = vld [vmem:[%s10348_s6 + $0x90] sm:$0xff] }
  0xee   : > { %1642 = vperm.xlu1 %6727, %v7404_v51   ;;  %v661_v39 = vrot.slane %v542_v57, %v7370_v19  ;;  %2773 = vperm.xlu0 %6715, %v2672_v54   ;;  %v757_v41 = vsel %vm756_vm7, %v657_v4, %v755_v22  ;;  %v7476_v4 = vld [vmem:[%s10346_s4 + $0x70] sm:$0xff]  ;;  %v2682_v22 = vld [vmem:[%s10348_s6 + $0xa0] sm:$0xff] }
  0xef   : > { %v7422_v60 = vpop.permute.xlu1 %897 }
  0xf0   : > { %10473 = vst [vmem:[#allocation35_spill] sm:$0xff] %v7422_v60  ;;  %v666_v62 = vsel %vm611_vm2, %v665_v7, %v661_v39  ;;  %v2676_v39 = vld [vmem:[%s10348_s6 + $0x70] sm:$0xff]  ;;  %v683_v60 = vrot.slane %v7227_v8, %v7368_v23 }
  0xf1   : > { %v548_v43 = vpop.permute.xlu0 %547  ;;  %v759_v56 = vsel %vm758_vm8, %v666_v62, %v757_v41 }
  0xf2   : > { %1648 = vperm.xlu1 %6727, %v7427_v63   ;;  %v670_v1 = vrot.slane %v548_v43, %v7370_v19  ;;  %2779 = vperm.xlu0 %6715, %v2674_v46   ;;  %v2678_v46 = vld [vmem:[%s10348_s6 + $0x80] sm:$0xff] }
  0xf3   : > { %v7441_v54 = vpop.permute.xlu1 %903 }
  0xf4   : > { %10474 = vst [vmem:[#allocation36_spill] sm:$0xff] %v7441_v54  ;;  %v675_v7 = vsel %vm611_vm2, %v674_v2, %v670_v1  ;;  %v7487_v1 = vld [vmem:[%s10346_s4 + $0x80] sm:$0xff] }
  0xf5   : > { %v7455_v44 = vpop.permute.xlu0 %553  ;;  %v761_v57 = vsel %vm760_vm9, %v675_v7, %v759_v56  ;;  %v7498_v7 = vld [vmem:[%s10346_s4 + $0x90] sm:$0xff] }
  0xf6   : > { %1654 = vperm.xlu1 %6727, %v7446_v5   ;;  %6483 = vmatprep.mubr.msk.f32.mxu0 %vm777_vm10, %v761_v57  ;;  %v2684_v56 = vld [vmem:[%s10348_s6 + $0xb0] sm:$0xff]  ;;  %v679_v36 = vrot.slane %v7455_v44, %v7370_v19  ;;  %v710_v44 = vrot.slane %v7260_v17, %v7368_v23 }
  0xf7   : > { %2785 = vperm.xlu0 %6715, %v2676_v39   ;;  %v7460_v10 = vpop.permute.xlu1 %909 }
  0xf8   : > { %10475 = vst [vmem:[#allocation37_spill] sm:$0xff] %v7460_v10  ;;  %v2688_v10 = vld [vmem:[%s10348_s6 + $0xd0] sm:$0xff]  ;;  %v684_v12 = vsel %vm611_vm2, %v683_v60, %v679_v36 }
  0xf9   : > { %v560_v2 = vpop.permute.xlu0 %559 }
  0xfa   : > { %1660 = vperm.xlu1 %6727, %v7465_v53  }
  0xfb   : > { %2791 = vperm.xlu0 %6715, %v2678_v46   ;;  %v7471_v48 = vpop.permute.xlu1 %915 }
  0xfc   : > { %10476 = vst [vmem:[#allocation38_spill] sm:$0xff] %v7471_v48 }
  0xfd   : > { %v566_v43 = vpop.permute.xlu0 %565 }
  0xfe   : > { %1666 = vperm.xlu1 %6727, %v7476_v4  }
  0xff   : > { %2797 = vperm.xlu0 %6715, %v2680_v16   ;;  %v7482_v62 = vpop.permute.xlu1 %921  ;;  %v7509_v16 = vld [vmem:[%s10346_s4 + $0xa0] sm:$0xff] }
 0x100   : > { %10477 = vst [vmem:[#allocation39_spill] sm:$0xff] %v7482_v62 }
 0x101   : > { %v572_v41 = vpop.permute.xlu0 %571 }
 0x102   : > { %1672 = vperm.xlu1 %6727, %v7487_v1  }
 0x103   : > { %2803 = vperm.xlu0 %6715, %v2682_v22   ;;  %v7493_v39 = vpop.permute.xlu1 %927  ;;  %v2686_v22 = vld [vmem:[%s10348_s6 + $0xc0] sm:$0xff] }
 0x104   : > { %10478 = vst [vmem:[#allocation40_spill] sm:$0xff] %v7493_v39 }
 0x105   : > { %v578_v57 = vpop.permute.xlu0 %577 }
 0x106   : > { %1678 = vperm.xlu1 %6727, %v7498_v7   ;;  %v715_v8 = vrot.slane %v578_v57, %v7370_v19  ;;  %v728_v57 = vrot.slane %v7282_v35, %v7368_v23 }
 0x107   : > { %2809 = vperm.xlu0 %6715, %v2684_v56   ;;  %v7504_v46 = vpop.permute.xlu1 %933  ;;  %v7520_v56 = vld [vmem:[%s10346_s4 + $0xb0] sm:$0xff] }
 0x108   : > { %10479 = vst [vmem:[#allocation41_spill] sm:$0xff] %v7504_v46 }
 0x109   : > { %v6718_v39 = vpop.permute.xlu0 %6717 }
 0x10a   : > { %1684 = vperm.xlu1 %6727, %v7509_v16   ;;  %v6720_v46 = vunpack.i.h.bf16 %v6718_v39  ;;  %v6719_v48 = vunpack.i.l.bf16 %v6718_v39  ;;  %v7537_v39 = vld [vmem:[%s10346_s4 + $0xc0] sm:$0xff] }
 0x10b   : > { %2815 = vperm.xlu0 %6715, %v2686_v22   ;;  %v7515_v62 = vpop.permute.xlu1 %939  ;;  %v10481_v22 = vmov 0 }
 0x10c   : > { %10480 = vst [vmem:[#allocation42_spill] sm:$0xff] %v7515_v62  ;;  %v6591_v54 = vpack.c.bf16 %v6720_v46, %v6719_v48  ;;  %v10482_v22 = vsel %vm7528_vm11, 4294967295, %v10481_v22  ;;  %v2690_v48 = vld [vmem:[%s10348_s6 + $0xe0] sm:$0xff]  ;;  %v688_v46 = vrot.slane %v560_v2, %v7370_v19  ;;  %v706_v2 = vrot.slane %v572_v41, %v7370_v19 }
 0x10d   : > { %10483 = vst [vmem:[#allocation43_spill] sm:$0xff] %v10482_v22 }
 0x10e   : > { %1690 = vperm.xlu1 %6727, %v7520_v56   ;;  %6592 = vmatprep.subr.bf16.mxu0 %v6591_v54  ;;  %v711_v9 = vsel %vm611_vm2, %v710_v44, %v706_v2 }
 0x10f   : > { %2821 = vperm.xlu0 %6715, %v2688_v10   ;;  %v7532_v62 = vpop.permute.xlu1 %945  ;;  %6594 = vmatpush3.bf16.msra.mxu0 %v6591_v54  ;;  %v697_v10 = vrot.slane %v566_v43, %v7370_v19  ;;  %v692_v54 = vrot.slane %v7238_v11, %v7368_v23  ;;  %v7560_v43 = vld [vmem:[%s10346_s4 + $0xd0] sm:$0xff] }
 0x110   : > { %10484 = vst [vmem:[#allocation44_spill] sm:$0xff] %v7532_v62  ;;  %6597 = vmatprep.subr.msk.bf16.mxu0 %vm7528_vm11, %v7125_v40  ;;  %v7568_v11 = vld [vmem:[%s10348_s6 + $0xf0] sm:$0xff] }
 0x111   : > { %v584_v62 = vpop.permute.xlu0 %583  ;;  %v693_v41 = vsel %vm611_vm2, %v692_v54, %v688_v46  ;;  %v702_v15 = vsel %vm611_vm2, %v701_v18, %v697_v10  ;;  %v737_v18 = vrot.slane %v7293_v38, %v7368_v23  ;;  %v746_v38 = vrot.slane %v7304_v42, %v7368_v23 }
 0x112   : > { %1696 = vperm.xlu1 %6727, %v7537_v39  }
 0x113   : > { %2827 = vperm.xlu0 %6715, %v2690_v48   ;;  %v7555_v21 = vpop.permute.xlu1 %951  ;;  %v724_v48 = vrot.slane %v584_v62, %v7370_v19  ;;  %v762_v62 = vsel %vm748_vm3, %v693_v41, %v684_v12 }
 0x114   : > { %10485 = vst [vmem:[#allocation45_spill] sm:$0xff] %v7555_v21  ;;  %v719_v21 = vrot.slane %v7271_v20, %v7368_v23  ;;  %v7587_v20 = vld [vmem:[%s10346_s4 + $0xe0] sm:$0xff]  ;;  %v763_v36 = vsel %vm750_vm4, %v702_v15, %v762_v62  ;;  %v7608_v15 = vld [vmem:[%s10346_s4 + $0xf0] sm:$0xff] }
 0x115   : > { %v590_v14 = vpop.permute.xlu0 %589  ;;  %v729_v60 = vsel %vm611_vm2, %v728_v57, %v724_v48  ;;  %v764_v10 = vsel %vm752_vm5, %v711_v9, %v763_v36  ;;  %10486 = vst [vmem:[#allocation46_spill] sm:$0xff] %v7608_v15 }
 0x116   : > { %1702 = vperm.xlu1 %6727, %v7560_v43   ;;  %v733_v17 = vrot.slane %v590_v14, %v7370_v19  ;;  %v720_v35 = vsel %vm611_vm2, %v719_v21, %v715_v8 }
 0x117   : > { %2833 = vperm.xlu0 %6715, %v7568_v11   ;;  %v765_v12 = vsel %vm754_vm6, %v720_v35, %v764_v10 }
 0x118   : > { %v7593_v46 = vpop.permute.xlu1 %1194  ;;  %v738_v54 = vsel %vm611_vm2, %v737_v18, %v733_v17  ;;  %v766_v8 = vsel %vm756_vm7, %v729_v60, %v765_v12 }
 0x119   : > { %v596_v2 = vpop.permute.xlu0 %595  ;;  %v767_v42 = vsel %vm758_vm8, %v738_v54, %v766_v8  ;;  %v10496_v54 = vmov 2  }
 0x11a   : > { %1708 = vperm.xlu1 %6727, %v7587_v20   ;;  %v742_v21 = vrot.slane %v596_v2, %v7370_v19 }
 0x11b   : > { %6737 = vset.pattern.permute.xlu0 %v10466_v13 }
 0x11c   : > { %v7610_v9 = vpop.permute.xlu1 %1197  ;;  %861 = vperm.xlu0 %6737, %v6984_v0   ;;  %v747_v44 = vsel %vm611_vm2, %v746_v38, %v742_v21 }
 0x11d   : > { %v7617_v41 = vpop.permute.xlu0 %1624  ;;  %v768_v48 = vsel %vm760_vm9, %v747_v44, %v767_v42  ;;  %v10497_v42 = vld [vmem:[#allocation9_spill] sm:$0xff] }
 0x11e   : > { %1714 = vperm.xlu1 %6727, %v7608_v15   ;;  %6484 = vmatmul.mubr.msk.f32.vlgmr.msra.gmra.mrb[0].mxu0 %vm777_vm10, %v768_v48 }
 0x11f   : > { %6600 = vmatpush3.bf16.msk.msra.mxu0 %vm7528_vm11, %v7125_v40 }
 0x120   : > { %v7624_v14 = vpop.permute.xlu1 %1203  ;;  %870 = vperm.xlu0 %6737, %v7060_v24  }
 0x121   : > { %v7628_v0 = vpop.permute.xlu0 %1633 }
 0x122   : > { %6728 = vset.pattern.permute.xlu1 %v10466_v13 }
 0x123   : > { %1968 = vperm.xlu1 %6728, %v7351_v59  }
 0x124   : > { %v7631_v57 = vpop.permute.xlu1 %1209  ;;  %876 = vperm.xlu0 %6737, %v7066_v25  }
 0x125   : > { %v7634_v17 = vpop.permute.xlu0 %1639 }
 0x127   : > { %1971 = vperm.xlu1 %6728, %v7363_v37  }
 0x128   : > { %v7637_v18 = vpop.permute.xlu1 %1215  ;;  %882 = vperm.xlu0 %6737, %v7072_v26  }
 0x129   : > { %v7640_v40 = vpop.permute.xlu0 %1645 }
 0x12b   : > { %1977 = vperm.xlu1 %6728, %v7385_v50  }
 0x12c   : > { %v7643_v24 = vpop.permute.xlu1 %1221  ;;  %888 = vperm.xlu0 %6737, %v7078_v27  }
 0x12d   : > { %v7646_v59 = vpop.permute.xlu0 %1651 }
 0x12f   : > { %1983 = vperm.xlu1 %6728, %v7404_v51  }
 0x130   : > { %v7649_v25 = vpop.permute.xlu1 %1227  ;;  %894 = vperm.xlu0 %6737, %v7084_v28  }
 0x131   : > { %v7652_v62 = vpop.permute.xlu0 %1657 }
 0x133   : > { %1989 = vperm.xlu1 %6728, %v7427_v63  }
 0x134   : > { %v7655_v26 = vpop.permute.xlu1 %1233  ;;  %900 = vperm.xlu0 %6737, %v7090_v29  }
 0x135   : > { %v7658_v50 = vpop.permute.xlu0 %1663 }
 0x137   : > { %1995 = vperm.xlu1 %6728, %v7446_v5  }
 0x138   : > { %v7661_v27 = vpop.permute.xlu1 %1239  ;;  %906 = vperm.xlu0 %6737, %v7096_v30  }
 0x139   : > { %v7664_v51 = vpop.permute.xlu0 %1669 }
 0x13b   : > { %2001 = vperm.xlu1 %6728, %v7465_v53  }
 0x13c   : > { %v7667_v28 = vpop.permute.xlu1 %1245  ;;  %912 = vperm.xlu0 %6737, %v7102_v31  }
 0x13d   : > { %v7670_v63 = vpop.permute.xlu0 %1675 }
 0x13e   : > { %10487 = vst [vmem:[#allocation47_spill] sm:$0xff] %v7670_v63 }
 0x13f   : > { %2007 = vperm.xlu1 %6728, %v7476_v4  }
 0x140   : > { %v7673_v29 = vpop.permute.xlu1 %1251  ;;  %918 = vperm.xlu0 %6737, %v7108_v32  }
 0x141   : > { %v7676_v5 = vpop.permute.xlu0 %1681 }
 0x142   : > { %10488 = vst [vmem:[#allocation48_spill] sm:$0xff] %v7676_v5 }
 0x143   : > { %2013 = vperm.xlu1 %6728, %v7487_v1  }
 0x144   : > { %v7679_v30 = vpop.permute.xlu1 %1257  ;;  %924 = vperm.xlu0 %6737, %v7114_v33  }
 0x145   : > { %v7682_v53 = vpop.permute.xlu0 %1687 }
 0x146   : > { %10489 = vst [vmem:[#allocation49_spill] sm:$0xff] %v7682_v53 }
 0x147   : > { %2019 = vperm.xlu1 %6728, %v7498_v7  }
 0x148   : > { %v7685_v31 = vpop.permute.xlu1 %1263  ;;  %930 = vperm.xlu0 %6737, %v7120_v34  }
 0x149   : > { %v7688_v4 = vpop.permute.xlu0 %1693 }
 0x14a   : > { %10490 = vst [vmem:[#allocation50_spill] sm:$0xff] %v7688_v4  ;;  %v10528_v4 = vld [vmem:[#allocation30_spill] sm:$0xff] }
 0x14b   : > { %2025 = vperm.xlu1 %6728, %v7509_v16  }
 0x14c   : > { %v7691_v32 = vpop.permute.xlu1 %1269  ;;  %936 = vperm.xlu0 %6737, %v7138_v45   ;;  %v456_v45 = vld [vmem:[%s10345_s3] sm:$0xff] }
 0x14d   : > { %v7694_v1 = vpop.permute.xlu0 %1699 }
 0x14e   : > { %10491 = vst [vmem:[#allocation51_spill] sm:$0xff] %v7694_v1  ;;  %v10527_v1 = vld [vmem:[#allocation28_spill] sm:$0xff] }
 0x14f   : > { %2031 = vperm.xlu1 %6728, %v7520_v56  }
 0x150   : > { %v7697_v33 = vpop.permute.xlu1 %1275  ;;  %942 = vperm.xlu0 %6737, %v7147_v47  }
 0x151   : > { %v7700_v7 = vpop.permute.xlu0 %1705 }
 0x152   : > { %10492 = vst [vmem:[#allocation52_spill] sm:$0xff] %v7700_v7 }
 0x153   : > { %2037 = vperm.xlu1 %6728, %v7537_v39  }
 0x154   : > { %v7703_v34 = vpop.permute.xlu1 %1281  ;;  %948 = vperm.xlu0 %6737, %v7156_v49  }
 0x155   : > { %v7709_v16 = vpop.permute.xlu0 %1711 }
 0x156   : > { %10493 = vst [vmem:[#allocation53_spill] sm:$0xff] %v7709_v16 }
 0x157   : > { %2043 = vperm.xlu1 %6728, %v7560_v43  }
 0x158   : > { %v6723_v56 = vpop.permute.xlu1 %6722  ;;  %1533 = vperm.xlu0 %6737, %v456_v45   ;;  %v1735_v45 = vrot.slane %v7628_v0, %v7368_v23 }
 0x159   : > { %v6725_v35 = vunpack.i.h.bf16 %v6723_v56  ;;  %v6724_v47 = vunpack.i.l.bf16 %v6723_v56  ;;  %v7712_v36 = vpop.permute.xlu0 %1717 }
 0x15a   : > { %10494 = vst [vmem:[#allocation54_spill] sm:$0xff] %v7712_v36 }
 0x15b   : > { %2049 = vperm.xlu1 %6728, %v7587_v20   ;;  %v7715_v39 = vpack.c.bf16 %v6725_v35, %v6724_v47  ;;  %v1722_v47 = vrot.slane %v7617_v41, %v7370_v19 }
 0x15c   : > { %1965 = vperm.xlu0 %6737, %v7167_v52   ;;  %v7718_v49 = vpop.permute.xlu1 %1538 }
 0x15d   : > { %10495 = vst [vmem:[#allocation55_spill] sm:$0xff] %v7718_v49  ;;  %6602 = vmatprep.subr.bf16.mxu0 %v7715_v39  ;;  %v7721_v60 = vpop.permute.xlu0 %2746 }
 0x15f   : > { %2055 = vperm.xlu1 %6728, %v7608_v15  }
 0x160   : > { %1974 = vperm.xlu0 %6737, %v7178_v55  }
 0x161   : > { %v1628_v43 = vpop.permute.xlu1 %1627  ;;  %v7725_v10 = vpop.permute.xlu0 %2755 }
 0x162   : > { %v1726_v56 = vrot.slane %v1628_v43, %v7368_v23  ;;  %v10498_v43 = vld [vmem:[#allocation11_spill] sm:$0xff] }
 0x163   : > { %6729 = vset.pattern.permute.xlu1 %v10496_v54 }
 0x164   : > { %2298 = vperm.xlu1 %6729, %v7167_v52   ;;  %1980 = vperm.xlu0 %6737, %v7189_v58  }
 0x165   : > { %v1631_v20 = vpop.permute.xlu1 %1630  ;;  %v7730_v2 = vpop.permute.xlu0 %2761 }
 0x168   : > { %2304 = vperm.xlu1 %6729, %v7363_v37   ;;  %1986 = vperm.xlu0 %6737, %v7200_v61   ;;  %v1731_v37 = vrot.slane %v1631_v20, %v7370_v19 }
 0x169   : > { %v1637_v38 = vpop.permute.xlu1 %1636  ;;  %v7734_v12 = vpop.permute.xlu0 %2767 }
 0x16a   : > { %v1736_v22 = vsel %vm611_vm2, %v1735_v45, %v1731_v37 }
 0x16c   : > { %2307 = vperm.xlu1 %6729, %v7178_v55   ;;  %1992 = vperm.xlu0 %6737, %v7211_v3   ;;  %v1740_v55 = vrot.slane %v1637_v38, %v7370_v19  ;;  %v1753_v38 = vrot.slane %v7640_v40, %v7368_v23 }
 0x16d   : > { %v1643_v21 = vpop.permute.xlu1 %1642  ;;  %v7738_v8 = vpop.permute.xlu0 %2773 }
 0x170   : > { %2313 = vperm.xlu1 %6729, %v7189_v58   ;;  %1998 = vperm.xlu0 %6737, %v7222_v6   ;;  %v1749_v58 = vrot.slane %v1643_v21, %v7370_v19  ;;  %v1762_v21 = vrot.slane %v7646_v59, %v7368_v23 }
 0x171   : > { %v1649_v52 = vpop.permute.xlu1 %1648  ;;  %v7742_v44 = vpop.permute.xlu0 %2779 }
 0x172   : > { %v1758_v20 = vrot.slane %v1649_v52, %v7370_v19  ;;  %v1727_v52 = vsel %vm611_vm2, %v1726_v56, %v1722_v47  ;;  %v1754_v40 = vsel %vm611_vm2, %v1753_v38, %v1749_v58 }
 0x173   : > { %v1863_v45 = vsel %vm748_vm3, %v1736_v22, %v1727_v52  ;;  %v10505_v52 = vld [vmem:[#allocation17_spill] sm:$0xff] }
 0x174   : > { %2319 = vperm.xlu1 %6729, %v7200_v61   ;;  %2004 = vperm.xlu0 %6737, %v10497_v42   ;;  %v1744_v61 = vrot.slane %v7634_v17, %v7368_v23  ;;  %v1771_v17 = vrot.slane %v7652_v62, %v7368_v23  ;;  %v1763_v59 = vsel %vm611_vm2, %v1762_v21, %v1758_v20  ;;  %v10500_v62 = vld [vmem:[#allocation13_spill] sm:$0xff] }
 0x175   : > { %v1655_v48 = vpop.permute.xlu1 %1654 }
 0x176   : > { %v7752_v35 = vpop.permute.xlu0 %2785  ;;  %v1767_v0 = vrot.slane %v1655_v48, %v7370_v19  ;;  %v1745_v41 = vsel %vm611_vm2, %v1744_v61, %v1740_v55 }
 0x177   : > { %v1864_v55 = vsel %vm750_vm4, %v1745_v41, %v1863_v45 }
 0x178   : > { %2325 = vperm.xlu1 %6729, %v7211_v3   ;;  %2010 = vperm.xlu0 %6737, %v10498_v43   ;;  %v1780_v3 = vrot.slane %v7658_v50, %v7368_v23  ;;  %v1772_v61 = vsel %vm611_vm2, %v1771_v17, %v1767_v0  ;;  %v1865_v56 = vsel %vm752_vm5, %v1754_v40, %v1864_v55 }
 0x179   : > { %v1661_v36 = vpop.permute.xlu1 %1660  ;;  %v1789_v50 = vrot.slane %v7664_v51, %v7368_v23  ;;  %v1866_v20 = vsel %vm754_vm6, %v1763_v59, %v1865_v56  ;;  %v10511_v59 = vld [vmem:[#allocation21_spill] sm:$0xff] }
 0x17a   : > { %v1776_v37 = vrot.slane %v1661_v36, %v7370_v19  ;;  %v7773_v48 = vpop.permute.xlu0 %2791  ;;  %v1867_v38 = vsel %vm756_vm7, %v1772_v61, %v1866_v20  ;;  %v10514_v61 = vld [vmem:[#allocation23_spill] sm:$0xff] }
 0x17b   : > { %10499 = vst [vmem:[#allocation9_spill] sm:$0xff] %v7773_v48  ;;  %v10566_v48 = vld [vmem:[#allocation38_spill] sm:$0xff] }
 0x17c   : > { %2331 = vperm.xlu1 %6729, %v7222_v6   ;;  %2016 = vperm.xlu0 %6737, %v10500_v62   ;;  %v1781_v58 = vsel %vm611_vm2, %v1780_v3, %v1776_v37  ;;  %v10502_v6 = vld [vmem:[#allocation15_spill] sm:$0xff] }
 0x17d   : > { %v1667_v36 = vpop.permute.xlu1 %1666  ;;  %v1868_v21 = vsel %vm758_vm8, %v1781_v58, %v1867_v38  ;;  %v10508_v37 = vld [vmem:[#allocation19_spill] sm:$0xff] }
 0x17e   : > { %v1785_v22 = vrot.slane %v1667_v36, %v7370_v19  ;;  %v7788_v47 = vpop.permute.xlu0 %2797  ;;  %v10517_v36 = vld [vmem:[#allocation26_spill] sm:$0xff]  ;;  %v1578_v38 = vld [vmem:[%s10347_s5 + $0x8] sm:$0xff] }
 0x17f   : > { %10501 = vst [vmem:[#allocation11_spill] sm:$0xff] %v7788_v47  ;;  %v1041_v47 = vrot.slane %v10566_v48, %v7368_v23 }
 0x180   : > { %2337 = vperm.xlu1 %6729, %v10497_v42   ;;  %2022 = vperm.xlu0 %6737, %v10502_v6   ;;  %v1790_v0 = vsel %vm611_vm2, %v1789_v50, %v1785_v22  ;;  %v10520_v22 = vld [vmem:[#allocation29_spill] sm:$0xff] }
 0x181   : > { %v7796_v41 = vpop.permute.xlu1 %1672  ;;  %v1869_v51 = vsel %vm760_vm9, %v1790_v0, %v1868_v21 }
 0x182   : > { %10503 = vst [vmem:[#allocation13_spill] sm:$0xff] %v7796_v41  ;;  %6504 = vmatprep.mubr.msk.f32.mxu1 %vm777_vm10, %v1869_v51  ;;  %v7800_v17 = vpop.permute.xlu0 %2803 }
 0x183   : > { %10504 = vst [vmem:[#allocation15_spill] sm:$0xff] %v7800_v17  ;;  %v10563_v17 = vld [vmem:[#allocation22_spill] sm:$0xff] }
 0x184   : > { %2343 = vperm.xlu1 %6729, %v10498_v43   ;;  %2028 = vperm.xlu0 %6737, %v10505_v52  }
 0x185   : > { %v7804_v40 = vpop.permute.xlu1 %1678 }
 0x186   : > { %10506 = vst [vmem:[#allocation17_spill] sm:$0xff] %v7804_v40  ;;  %v7806_v42 = vpop.permute.xlu0 %2809 }
 0x187   : > { %10507 = vst [vmem:[#allocation56_spill] sm:$0xff] %v7806_v42  ;;  %v10562_v42 = vld [vmem:[#allocation20_spill] sm:$0xff] }
 0x188   : > { %2349 = vperm.xlu1 %6729, %v10500_v62   ;;  %2034 = vperm.xlu0 %6737, %v10508_v37  }
 0x189   : > { %v7810_v3 = vpop.permute.xlu1 %1684 }
 0x18a   : > { %10509 = vst [vmem:[#allocation19_spill] sm:$0xff] %v7810_v3  ;;  %v7812_v45 = vpop.permute.xlu0 %2815  ;;  %v10555_v3 = vld [vmem:[#allocation10_spill] sm:$0xff] }
 0x18b   : > { %10510 = vst [vmem:[#allocation57_spill] sm:$0xff] %v7812_v45  ;;  %v1316_v45 = vrot.slane %v7631_v57, %v7370_v19  ;;  %v10570_v57 = vld [vmem:[#allocation41_spill] sm:$0xff] }
 0x18c   : > { %2355 = vperm.xlu1 %6729, %v10502_v6   ;;  %2040 = vperm.xlu0 %6737, %v10511_v59  }
 0x18d   : > { %v7816_v55 = vpop.permute.xlu1 %1690 }
 0x18e   : > { %10512 = vst [vmem:[#allocation21_spill] sm:$0xff] %v7816_v55  ;;  %v7818_v43 = vpop.permute.xlu0 %2821 }
 0x18f   : > { %10513 = vst [vmem:[#allocation58_spill] sm:$0xff] %v7818_v43  ;;  %v10565_v43 = vld [vmem:[#allocation37_spill] sm:$0xff] }
 0x190   : > { %2361 = vperm.xlu1 %6729, %v10505_v52   ;;  %2046 = vperm.xlu0 %6737, %v10514_v61  }
 0x191   : > { %v7822_v56 = vpop.permute.xlu1 %1696 }
 0x192   : > { %10515 = vst [vmem:[#allocation23_spill] sm:$0xff] %v7822_v56  ;;  %v7824_v62 = vpop.permute.xlu0 %2827  ;;  %v969_v56 = vrot.slane %v10528_v4, %v7368_v23 }
 0x193   : > { %10516 = vst [vmem:[#allocation59_spill] sm:$0xff] %v7824_v62  ;;  %v10564_v62 = vld [vmem:[#allocation24_spill] sm:$0xff] }
 0x194   : > { %2367 = vperm.xlu1 %6729, %v10508_v37   ;;  %2052 = vperm.xlu0 %6737, %v10517_v36  }
 0x195   : > { %v7828_v58 = vpop.permute.xlu1 %1702 }
 0x196   : > { %10518 = vst [vmem:[#allocation26_spill] sm:$0xff] %v7828_v58  ;;  %v7830_v50 = vpop.permute.xlu0 %2833  ;;  %v965_v58 = vrot.slane %v10527_v1, %v7370_v19 }
 0x197   : > { %10519 = vst [vmem:[#allocation60_spill] sm:$0xff] %v7830_v50  ;;  %v1307_v50 = vrot.slane %v7624_v14, %v7370_v19 }
 0x198   : > { %2373 = vperm.xlu1 %6729, %v10511_v59   ;;  %2058 = vperm.xlu0 %6737, %v10520_v22   ;;  %v1577_v59 = vld [vmem:[%s10347_s5] sm:$0xff] }
 0x199   : > { %v7834_v20 = vpop.permute.xlu1 %1708 }
 0x19a   : > { %10521 = vst [vmem:[#allocation29_spill] sm:$0xff] %v7834_v20 }
 0x19b   : > { %v862_v6 = vpop.permute.xlu0 %861 }
 0x19c   : > { %2379 = vperm.xlu1 %6729, %v10514_v61   ;;  %2645 = vperm.xlu0 %6737, %v1578_v38   ;;  %v422_v61 = vld [vmem:[%s409_s27] sm:$0xff]  ;;  %v423_v38 = vld [vmem:[%s409_s27 + $0x8] sm:$0xff] }
 0x19d   : > { %v7840_v0 = vpop.permute.xlu1 %1714 }
 0x19e   : > { %10522 = vst [vmem:[#allocation61_spill] sm:$0xff] %v7840_v0 }
 0x19f   : > { %v871_v21 = vpop.permute.xlu0 %870 }
 0x1a0   : > { %2385 = vperm.xlu1 %6729, %v10517_v36   ;;  %v6731_v36 = vpack.i.bf16 %v423_v38, %v422_v61  ;;  %v974_v7 = vrot.slane %v871_v21, %v7370_v19  ;;  %v10530_v21 = vld [vmem:[#allocation32_spill] sm:$0xff] }
 0x1a1   : > { %v987_v38 = vrot.slane %v10530_v21, %v7368_v23  ;;  %v970_v21 = vsel %vm611_vm2, %v969_v56, %v965_v58 }
 0x1a2   : > { %v7843_v51 = vpop.permute.xlu1 %1968 }
 0x1a3   : > { %10523 = vst [vmem:[#allocation62_spill] sm:$0xff] %v7843_v51  ;;  %v877_v52 = vpop.permute.xlu0 %876  ;;  %v960_v51 = vrot.slane %v862_v6, %v7368_v23 }
 0x1a4   : > { %2391 = vperm.xlu1 %6729, %v10520_v22   ;;  %v983_v53 = vrot.slane %v877_v52, %v7370_v19  ;;  %v7881_v52 = vld [vmem:[%s10348_s6] sm:$0xff] }
 0x1a5   : > { %10533 = vst [vmem:[#allocation28_spill] sm:$0xff] %v7881_v52 }
 0x1a6   : > { %v7850_v37 = vpop.permute.xlu1 %1971 }
 0x1a7   : > { %10524 = vst [vmem:[#allocation63_spill] sm:$0xff] %v7850_v37  ;;  %v883_v16 = vpop.permute.xlu0 %882  ;;  %v10526_v37 = vld [vmem:[#allocation25_spill] sm:$0xff] }
 0x1a8   : > { %6730 = vset.pattern.permute.xlu1 %v10466_v13  ;;  %v956_v20 = vrot.slane %v10526_v37, %v7370_v19  ;;  %v992_v6 = vrot.slane %v883_v16, %v7370_v19  ;;  %v10534_v16 = vld [vmem:[#allocation33_spill] sm:$0xff]  ;;  %v1032_v13 = vrot.slane %v10565_v43, %v7368_v23 }
 0x1a9   : > { %2640 = vperm.xlu1 %6730, %v1577_v59   ;;  %v10529_v59 = vld [vmem:[#allocation31_spill] sm:$0xff] }
 0x1aa   : > { %v7857_v0 = vpop.permute.xlu1 %1977  ;;  %v978_v61 = vrot.slane %v10529_v59, %v7368_v23  ;;  %v961_v37 = vsel %vm611_vm2, %v960_v51, %v956_v20  ;;  %v996_v59 = vrot.slane %v10534_v16, %v7368_v23  ;;  %v10535_v20 = vld [vmem:[#allocation34_spill] sm:$0xff] }
 0x1ab   : > { %10525 = vst [vmem:[#allocation64_spill] sm:$0xff] %v7857_v0  ;;  %v889_v22 = vpop.permute.xlu0 %888  ;;  %v10531_v0 = vmov 1   ;;  %v1005_v51 = vrot.slane %v10535_v20, %v7368_v23  ;;  %v1097_v41 = vsel %vm748_vm3, %v970_v21, %v961_v37  ;;  %v7932_v20 = vld [vmem:[%s10348_s6 + $0x28] sm:$0xff] }
 0x1ac   : > { %v1001_v1 = vrot.slane %v889_v22, %v7370_v19  ;;  %v988_v22 = vsel %vm611_vm2, %v987_v38, %v983_v53  ;;  %v997_v5 = vsel %vm611_vm2, %v996_v59, %v992_v6  ;;  %v7903_v53 = vld [vmem:[%s10348_s6 + $0x10] sm:$0xff] }
 0x1ad   : > { %6732 = vrot.lane.b32.xlu1 %v6731_v36, %s6908_s12  ;;  %v979_v36 = vsel %vm611_vm2, %v978_v61, %v974_v7  ;;  %10538 = vst [vmem:[#allocation31_spill] sm:$0xff] %v7903_v53  ;;  %v10539_v6 = vld [vmem:[#allocation36_spill] sm:$0xff] }
 0x1ae   : > { %6736 = vset.pattern.permute.xlu1 %v10531_v0  ;;  %v7876_v4 = vpop.permute.xlu1 %1983  ;;  %v1098_v7 = vsel %vm750_vm4, %v979_v36, %v1097_v41  ;;  %v1006_v56 = vsel %vm611_vm2, %v1005_v51, %v1001_v1  ;;  %v1023_v37 = vrot.slane %v10539_v6, %v7368_v23  ;;  %v10548_v6 = vld [vmem:[#allocation2_spill] sm:$0xff] }
 0x1af   : > { %10532 = vst [vmem:[#allocation25_spill] sm:$0xff] %v7876_v4  ;;  %v895_v63 = vpop.permute.xlu0 %894  ;;  %v10536_v4 = vld [vmem:[#allocation35_spill] sm:$0xff] }
 0x1b0   : > { %v1010_v0 = vrot.slane %v895_v63, %v7370_v19  ;;  %v1014_v55 = vrot.slane %v10536_v4, %v7368_v23  ;;  %v1099_v63 = vsel %vm752_vm5, %v988_v22, %v1098_v7  ;;  %10543 = vst [vmem:[#allocation35_spill] sm:$0xff] %v7932_v20  ;;  %v7940_v7 = vld [vmem:[%s10348_s6 + $0x38] sm:$0xff] }
 0x1b1   : > { %2743 = vperm.xlu1 %6736, %v7881_v52   ;;  %v1100_v4 = vsel %vm754_vm6, %v997_v5, %v1099_v63  ;;  %10545 = vst [vmem:[#allocation65_spill] sm:$0xff] %v7940_v7 }
 0x1b2   : > { %v7898_v58 = vpop.permute.xlu1 %1989  ;;  %v1015_v61 = vsel %vm611_vm2, %v1014_v55, %v1010_v0  ;;  %v1101_v1 = vsel %vm756_vm7, %v1006_v56, %v1100_v4  ;;  %v7920_v55 = vld [vmem:[%s10348_s6 + $0x18] sm:$0xff]  ;;  %v10549_v4 = vld [vmem:[#allocation3_spill] sm:$0xff] }
 0x1b3   : > { %10537 = vst [vmem:[#allocation30_spill] sm:$0xff] %v7898_v58  ;;  %v901_v38 = vpop.permute.xlu0 %900  ;;  %v1102_v36 = vsel %vm758_vm8, %v1015_v61, %v1101_v1  ;;  %10541 = vst [vmem:[#allocation33_spill] sm:$0xff] %v7920_v55  ;;  %v7948_v61 = vld [vmem:[%s10348_s6 + $0x48] sm:$0xff]  ;;  %v10550_v1 = vld [vmem:[#allocation4_spill] sm:$0xff] }
 0x1b4   : > { %v1019_v41 = vrot.slane %v901_v38, %v7370_v19  ;;  %10547 = vst [vmem:[#allocation67_spill] sm:$0xff] %v7948_v61  ;;  %v10554_v58 = vld [vmem:[#allocation8_spill] sm:$0xff] }
 0x1b5   : > { %2749 = vperm.xlu1 %6736, %v7903_v53  }
 0x1b6   : > { %v7913_v16 = vpop.permute.xlu1 %1995  ;;  %v1024_v59 = vsel %vm611_vm2, %v1023_v37, %v1019_v41  ;;  %v1289_v37 = vrot.slane %v10548_v6, %v7370_v19  ;;  %v1302_v41 = vrot.slane %v10549_v4, %v7368_v23  ;;  %v1298_v6 = vrot.slane %v7610_v9, %v7370_v19 }
 0x1b7   : > { %10540 = vst [vmem:[#allocation32_spill] sm:$0xff] %v7913_v16  ;;  %v7922_v0 = vpop.permute.xlu0 %906  ;;  %v1103_v5 = vsel %vm760_vm9, %v1024_v59, %v1102_v36  ;;  %v1311_v59 = vrot.slane %v10550_v1, %v7368_v23  ;;  %v10551_v36 = vld [vmem:[#allocation5_spill] sm:$0xff]  ;;  %v10560_v16 = vld [vmem:[#allocation16_spill] sm:$0xff]  ;;  %v1293_v9 = vrot.slane %v7593_v46, %v7368_v23  ;;  %v8011_v46 = vld [vmem:[%s10348_s6 + $0x68] sm:$0xff] }
 0x1b8   : > { %6490 = vmatprep.mubr.msk.f32.mxu0 %vm777_vm10, %v1103_v5  ;;  %v1320_v5 = vrot.slane %v10551_v36, %v7368_v23  ;;  %v7972_v1 = vld [vmem:[%s10348_s6 + $0x58] sm:$0xff]  ;;  %v10558_v36 = vld [vmem:[#allocation12_spill] sm:$0xff]  ;;  %v1303_v48 = vsel %vm611_vm2, %v1302_v41, %v1298_v6  ;;  %v1028_v52 = vrot.slane %v7922_v0, %v7370_v19 }
 0x1b9   : > { %2752 = vperm.xlu1 %6736, %v7920_v55   ;;  %10557 = vst [vmem:[#allocation3_spill] sm:$0xff] %v7972_v1  ;;  %v1294_v41 = vsel %vm611_vm2, %v1293_v9, %v1289_v37  ;;  %v10573_v6 = vld [vmem:[#allocation45_spill] sm:$0xff] }
 0x1ba   : > { %v7927_v21 = vpop.permute.xlu1 %2001  ;;  %v8041_v37 = vld [vmem:[%s10348_s6 + $0x78] sm:$0xff] }
 0x1bb   : > { %10542 = vst [vmem:[#allocation34_spill] sm:$0xff] %v7927_v21  ;;  %v913_v51 = vpop.permute.xlu0 %912  ;;  %v10553_v21 = vld [vmem:[#allocation7_spill] sm:$0xff] }
 0x1bd   : > { %2758 = vperm.xlu1 %6736, %v7932_v20   ;;  %v1037_v20 = vrot.slane %v913_v51, %v7370_v19  ;;  %v10571_v51 = vld [vmem:[#allocation42_spill] sm:$0xff] }
 0x1be   : > { %v7935_v22 = vpop.permute.xlu1 %2007  ;;  %v1077_v49 = vrot.slane %v10571_v51, %v7368_v23  ;;  %v1095_v51 = vrot.slane %v10573_v6, %v7368_v23 }
 0x1bf   : > { %10544 = vst [vmem:[#allocation36_spill] sm:$0xff] %v7935_v22  ;;  %v919_v56 = vpop.permute.xlu0 %918  ;;  %v1042_v0 = vsel %vm611_vm2, %v1041_v47, %v1037_v20  ;;  %v1033_v20 = vsel %vm611_vm2, %v1032_v13, %v1028_v52  ;;  %v1370_v13 = vrot.slane %v7667_v28, %v7370_v19 }
 0x1c0   : > { %v1046_v55 = vrot.slane %v919_v56, %v7370_v19 }
 0x1c1   : > { %2764 = vperm.xlu1 %6736, %v7940_v7   ;;  %v10568_v7 = vld [vmem:[#allocation40_spill] sm:$0xff] }
 0x1c2   : > { %v7943_v63 = vpop.permute.xlu1 %2013  ;;  %v1059_v53 = vrot.slane %v10568_v7, %v7368_v23 }
 0x1c3   : > { %10546 = vst [vmem:[#allocation66_spill] sm:$0xff] %v7943_v63  ;;  %v925_v38 = vpop.permute.xlu0 %924  ;;  %v10552_v63 = vld [vmem:[#allocation6_spill] sm:$0xff] }
 0x1c4   : > { %v1329_v22 = vrot.slane %v10552_v63, %v7368_v23  ;;  %v10559_v63 = vld [vmem:[#allocation14_spill] sm:$0xff]  ;;  %v1055_v15 = vrot.slane %v925_v38, %v7370_v19 }
 0x1c5   : > { %2770 = vperm.xlu1 %6736, %v7948_v61   ;;  %v10567_v61 = vld [vmem:[#allocation39_spill] sm:$0xff] }
 0x1c6   : > { %v7967_v40 = vpop.permute.xlu1 %2019  ;;  %v1050_v14 = vrot.slane %v10567_v61, %v7368_v23  ;;  %v1325_v61 = vrot.slane %v7637_v18, %v7370_v19  ;;  %v1321_v18 = vsel %vm611_vm2, %v1320_v5, %v1316_v45 }
 0x1c7   : > { %10556 = vst [vmem:[#allocation2_spill] sm:$0xff] %v7967_v40  ;;  %v931_v4 = vpop.permute.xlu0 %930  ;;  %v10561_v40 = vld [vmem:[#allocation18_spill] sm:$0xff] }
 0x1c8   : > { %v1064_v56 = vrot.slane %v931_v4, %v7370_v19  ;;  %v1330_v5 = vsel %vm611_vm2, %v1329_v22, %v1325_v61  ;;  %v1334_v4 = vrot.slane %v7643_v24, %v7370_v19  ;;  %v1051_v9 = vsel %vm611_vm2, %v1050_v14, %v1046_v55 }
 0x1c9   : > { %2776 = vperm.xlu1 %6736, %v7972_v1   ;;  %v1068_v1 = vrot.slane %v10570_v57, %v7368_v23  ;;  %v10572_v57 = vld [vmem:[#allocation44_spill] sm:$0xff]  ;;  %v1352_v22 = vrot.slane %v7655_v26, %v7370_v19  ;;  %v10576_v26 = vrot.slane %v10553_v21, %v7368_v23  ;;  %v1379_v14 = vrot.slane %v7673_v29, %v7370_v19 }
 0x1ca   : > { %v8006_v43 = vpop.permute.xlu1 %2025  ;;  %v1086_v54 = vrot.slane %v10572_v57, %v7368_v23 }
 0x1cb   : > { %10569 = vst [vmem:[#allocation4_spill] sm:$0xff] %v8006_v43  ;;  %v937_v7 = vpop.permute.xlu0 %936  ;;  %v1312_v43 = vsel %vm611_vm2, %v1311_v59, %v1307_v50  ;;  %v1430_v50 = vsel %vm748_vm3, %v1303_v48, %v1294_v41  ;;  %v1343_v41 = vrot.slane %v7649_v25, %v7370_v19  ;;  %v1069_v24 = vsel %vm611_vm2, %v1068_v1, %v1064_v56  ;;  %v8069_v25 = vld [vmem:[%s10348_s6 + $0x88] sm:$0xff] }
 0x1cc   : > { %v1073_v38 = vrot.slane %v937_v7, %v7370_v19  ;;  %v1431_v45 = vsel %vm750_vm4, %v1312_v43, %v1430_v50  ;;  %v1060_v7 = vsel %vm611_vm2, %v1059_v53, %v1055_v15  ;;  %v1104_v43 = vsel %vm748_vm3, %v1042_v0, %v1033_v20 }
 0x1cd   : > { %2782 = vperm.xlu1 %6736, %v8011_v46   ;;  %v1432_v47 = vsel %vm752_vm5, %v1321_v18, %v1431_v45  ;;  %v1105_v15 = vsel %vm750_vm4, %v1051_v9, %v1104_v43  ;;  %v1339_v1 = vsel %vm611_vm2, %v10576_v26, %v1334_v4  ;;  %v1361_v18 = vrot.slane %v7661_v27, %v7370_v19  ;;  %v10585_v43 = vld [vmem:[#allocation27_spill] sm:$0xff] }
 0x1ce   : > { %v8036_v59 = vpop.permute.xlu1 %2031  ;;  %v1433_v55 = vsel %vm754_vm6, %v1330_v5, %v1432_v47  ;;  %v1078_v52 = vsel %vm611_vm2, %v1077_v49, %v1073_v38  ;;  %v1106_v28 = vsel %vm752_vm5, %v1060_v7, %v1105_v15  ;;  %v1388_v56 = vrot.slane %v7679_v30, %v7370_v19 }
 0x1cf   : > { %10574 = vst [vmem:[#allocation5_spill] sm:$0xff] %v8036_v59  ;;  %v943_v48 = vpop.permute.xlu0 %942  ;;  %v1107_v6 = vsel %vm754_vm6, %v1069_v24, %v1106_v28  ;;  %v10577_v50 = vrot.slane %v10554_v58, %v7368_v23  ;;  %v1397_v0 = vrot.slane %v7685_v31, %v7370_v19  ;;  %v10578_v27 = vrot.slane %v10555_v3, %v7368_v23  ;;  %v8110_v3 = vld [vmem:[%s10348_s6 + $0x98] sm:$0xff] }
 0x1d0   : > { %v1082_v57 = vrot.slane %v943_v48, %v7370_v19  ;;  %v10579_v38 = vrot.slane %v10559_v63, %v7368_v23  ;;  %v1406_v58 = vrot.slane %v7691_v32, %v7370_v19  ;;  %v10581_v9 = vrot.slane %v10560_v16, %v7368_v23 }
 0x1d1   : > { %2788 = vperm.xlu1 %6736, %v8041_v37   ;;  %v1348_v29 = vsel %vm611_vm2, %v10577_v50, %v1343_v41  ;;  %v1357_v30 = vsel %vm611_vm2, %v10578_v27, %v1352_v22  ;;  %v1415_v48 = vrot.slane %v7697_v33, %v7370_v19  ;;  %v10582_v47 = vrot.slane %v10558_v36, %v7368_v23  ;;  %v8194_v50 = vld [vmem:[%s10348_s6 + $0xe8] sm:$0xff] }
 0x1d2   : > { %v8064_v53 = vpop.permute.xlu1 %2037  ;;  %v1087_v61 = vsel %vm611_vm2, %v1086_v54, %v1082_v57  ;;  %v1108_v54 = vsel %vm756_vm7, %v1078_v52, %v1107_v6  ;;  %v1375_v45 = vsel %vm611_vm2, %v10579_v38, %v1370_v13  ;;  %v1384_v63 = vsel %vm611_vm2, %v10581_v9, %v1379_v14  ;;  %v8186_v6 = vld [vmem:[%s10348_s6 + $0xd8] sm:$0xff] }
 0x1d3   : > { %10575 = vst [vmem:[#allocation6_spill] sm:$0xff] %v8064_v53  ;;  %v949_v49 = vpop.permute.xlu0 %948  ;;  %v1109_v4 = vsel %vm758_vm8, %v1087_v61, %v1108_v54  ;;  %v1366_v20 = vsel %vm611_vm2, %v10582_v47, %v1361_v18  ;;  %v10583_v7 = vrot.slane %v10561_v40, %v7368_v23  ;;  %v1424_v16 = vrot.slane %v7703_v34, %v7370_v19  ;;  %v8178_v18 = vld [vmem:[%s10348_s6 + $0xc8] sm:$0xff] }
 0x1d4   : > { %v1091_v21 = vrot.slane %v949_v49, %v7370_v19  ;;  %v1437_v41 = vsel %vm748_vm3, %v1375_v45, %v1366_v20  ;;  %v10584_v22 = vrot.slane %v10562_v42, %v7368_v23  ;;  %v1428_v34 = vrot.slane %v10585_v43, %v7368_v23  ;;  %v8170_v49 = vld [vmem:[%s10348_s6 + $0xb8] sm:$0xff] }
 0x1d5   : > { %2794 = vperm.xlu1 %6736, %v8069_v25   ;;  %v1393_v57 = vsel %vm611_vm2, %v10583_v7, %v1388_v56  ;;  %v1438_v24 = vsel %vm750_vm4, %v1384_v63, %v1437_v41  ;;  %v10588_v52 = vrot.slane %v10564_v62, %v7368_v23 }
 0x1d6   : > { %v1096_v5 = vsel %vm611_vm2, %v1095_v51, %v1091_v21  ;;  %v8104_v31 = vpop.permute.xlu1 %2043  ;;  %v1434_v51 = vsel %vm756_vm7, %v1339_v1, %v1433_v55  ;;  %v1402_v36 = vsel %vm611_vm2, %v10584_v22, %v1397_v0  ;;  %v10586_v55 = vrot.slane %v10563_v17, %v7368_v23 }
 0x1d7   : > { %10580 = vst [vmem:[#allocation7_spill] sm:$0xff] %v8104_v31  ;;  %v1110_v32 = vsel %vm760_vm9, %v1096_v5, %v1109_v4  ;;  %v1435_v33 = vsel %vm758_vm8, %v1348_v29, %v1434_v51  ;;  %v1439_v15 = vsel %vm752_vm5, %v1393_v57, %v1438_v24  ;;  %v1420_v26 = vsel %vm611_vm2, %v10588_v52, %v1415_v48  ;;  %v8242_v24 = vld [vmem:[%s10348_s6 + $0x8] sm:$0xff] }
 0x1d8   : > { %6491 = vmatmul.mubr.msk.f32.vlgmr.msra.gmra.mrb[0].mxu0 %vm777_vm10, %v1110_v32  ;;  %v1436_v40 = vsel %vm760_vm9, %v1357_v30, %v1435_v33  ;;  %v1411_v13 = vsel %vm611_vm2, %v10586_v55, %v1406_v58  ;;  %v1440_v17 = vsel %vm754_vm6, %v1402_v36, %v1439_v15  ;;  %v1429_v1 = vsel %vm611_vm2, %v1428_v34, %v1424_v16  ;;  %v8250_v15 = vld [vmem:[%s10348_s6 + $0x20] sm:$0xff] }
 0x1d9   : > { %6604 = vmatpush3.bf16.msra.mxu0 %v7715_v39  ;;  %2800 = vperm.xlu1 %6736, %v8110_v3   ;;  %v8153_v39 = vld [vmem:[%s10348_s6 + $0xa8] sm:$0xff]  ;;  %v1441_v14 = vsel %vm756_vm7, %v1411_v13, %v1440_v17  ;;  %v8245_v13 = vpop.permute.xlu0 %1533 }
 0x1da   : > { %6497 = vmatprep.mubr.msk.f32.mxu0 %vm777_vm10, %v1436_v40  ;;  %v8148_v42 = vpop.permute.xlu1 %2049  ;;  %v1442_v61 = vsel %vm758_vm8, %v1420_v26, %v1441_v14  ;;  %v8256_v26 = vld [vmem:[%s10348_s6 + $0x30] sm:$0xff]  ;;  %v8264_v14 = vld [vmem:[%s10348_s6 + $0x40] sm:$0xff] }
 0x1db   : > { %10587 = vst [vmem:[#allocation8_spill] sm:$0xff] %v8148_v42  ;;  %v1443_v62 = vsel %vm760_vm9, %v1429_v1, %v1442_v61 }
 0x1dd   : > { %2806 = vperm.xlu1 %6736, %v8153_v39   ;;  %v8259_v1 = vpop.permute.xlu0 %1965 }
 0x1de   : > { %v8164_v28 = vpop.permute.xlu1 %2055  ;;  %10608 = vst [vmem:[#allocation70_spill] sm:$0xff] %v8259_v1 }
 0x1df   : > { %10589 = vst [vmem:[#allocation10_spill] sm:$0xff] %v8164_v28 }
 0x1e0   : > { %6498 = vmatmul.mubr.msk.f32.vlgmr.msra.gmra.mrb[0].mxu0 %vm777_vm10, %v1443_v62 }
 0x1e1   : > { %2812 = vperm.xlu1 %6736, %v8170_v49   ;;  %v8267_v62 = vpop.permute.xlu0 %1974 }
 0x1e2   : > { %10609 = vst [vmem:[#allocation71_spill] sm:$0xff] %v8267_v62 }
 0x1e3   : > { %v8180_v56 = vpop.permute.xlu1 %2298 }
 0x1e4   : > { %10590 = vst [vmem:[#allocation12_spill] sm:$0xff] %v8180_v56 }
 0x1e5   : > { %2818 = vperm.xlu1 %6736, %v8178_v18  }
 0x1e7   : > { %v8188_v21 = vpop.permute.xlu1 %2304 }
 0x1e8   : > { %10591 = vst [vmem:[#allocation14_spill] sm:$0xff] %v8188_v21 }
 0x1e9   : > { %2824 = vperm.xlu1 %6736, %v8186_v6  }
 0x1eb   : > { %v8196_v29 = vpop.permute.xlu1 %2307 }
 0x1ec   : > { %10592 = vst [vmem:[#allocation16_spill] sm:$0xff] %v8196_v29 }
 0x1ed   : > { %2830 = vperm.xlu1 %6736, %v8194_v50  }
 0x1ef   : > { %v8199_v0 = vpop.permute.xlu1 %2313 }
 0x1f0   : > { %10593 = vst [vmem:[#allocation18_spill] sm:$0xff] %v8199_v0 }
 0x1f3   : > { %v8201_v54 = vpop.permute.xlu1 %2319 }
 0x1f4   : > { %10594 = vst [vmem:[#allocation20_spill] sm:$0xff] %v8201_v54  ;;  %v10634_v54 = vld [vmem:[#allocation65_spill] sm:$0xff] }
 0x1f7   : > { %v8203_v27 = vpop.permute.xlu1 %2325 }
 0x1f8   : > { %10595 = vst [vmem:[#allocation22_spill] sm:$0xff] %v8203_v27 }
 0x1fb   : > { %v8205_v30 = vpop.permute.xlu1 %2331 }
 0x1fc   : > { %10596 = vst [vmem:[#allocation24_spill] sm:$0xff] %v8205_v30  ;;  %v10631_v30 = vld [vmem:[#allocation55_spill] sm:$0xff] }
 0x1ff   : > { %v8207_v38 = vpop.permute.xlu1 %2337 }
 0x200   : > { %10597 = vst [vmem:[#allocation37_spill] sm:$0xff] %v8207_v38  ;;  %v6862_v38 = vld [vmem:[%s10346_s4 + $0xe0] sm:$0xff] }
 0x203   : > { %v8209_v45 = vpop.permute.xlu1 %2343 }
 0x204   : > { %10598 = vst [vmem:[#allocation38_spill] sm:$0xff] %v8209_v45 }
 0x207   : > { %v8211_v58 = vpop.permute.xlu1 %2349 }
 0x208   : > { %10599 = vst [vmem:[#allocation39_spill] sm:$0xff] %v8211_v58  ;;  %v6861_v58 = vld [vmem:[%s10346_s4 + $0xd0] sm:$0xff] }
 0x20b   : > { %v8213_v5 = vpop.permute.xlu1 %2355 }
 0x20c   : > { %10600 = vst [vmem:[#allocation40_spill] sm:$0xff] %v8213_v5  ;;  %v6859_v5 = vld [vmem:[%s10346_s4 + $0xb0] sm:$0xff] }
 0x20f   : > { %v8215_v4 = vpop.permute.xlu1 %2361 }
 0x210   : > { %10601 = vst [vmem:[#allocation41_spill] sm:$0xff] %v8215_v4  ;;  %v6858_v4 = vld [vmem:[%s10346_s4 + $0xa0] sm:$0xff] }
 0x213   : > { %v8217_v9 = vpop.permute.xlu1 %2367 }
 0x214   : > { %10602 = vst [vmem:[#allocation42_spill] sm:$0xff] %v8217_v9  ;;  %v6856_v9 = vld [vmem:[%s10346_s4 + $0x80] sm:$0xff] }
 0x217   : > { %v8219_v63 = vpop.permute.xlu1 %2373 }
 0x218   : > { %10603 = vst [vmem:[#allocation44_spill] sm:$0xff] %v8219_v63 }
 0x21b   : > { %v8221_v48 = vpop.permute.xlu1 %2379 }
 0x21c   : > { %10604 = vst [vmem:[#allocation45_spill] sm:$0xff] %v8221_v48  ;;  %v2895_v48 = vrot.slane %v7742_v44, %v7370_v19 }
 0x21f   : > { %v8223_v32 = vpop.permute.xlu1 %2385 }
 0x220   : > { %10605 = vst [vmem:[#allocation27_spill] sm:$0xff] %v8223_v32 }
 0x223   : > { %v8225_v51 = vpop.permute.xlu1 %2391 }
 0x224   : > { %10606 = vst [vmem:[#allocation68_spill] sm:$0xff] %v8225_v51  ;;  %v2868_v51 = vrot.slane %v7730_v2, %v7370_v19  ;;  %v2886_v2 = vrot.slane %v7738_v8, %v7370_v19  ;;  %v8314_v8 = vld [vmem:[%s10348_s6 + $0x70] sm:$0xff] }
 0x228   : > { %v8227_v47 = vpop.permute.xlu1 %2640 }
 0x229   : > { %10607 = vst [vmem:[#allocation69_spill] sm:$0xff] %v8227_v47  ;;  %v2859_v47 = vrot.slane %v7725_v10, %v7370_v19  ;;  %v2877_v10 = vrot.slane %v7734_v12, %v7370_v19 }
 0x22c   : > { %v6733_v20 = vpop.permute.xlu1 %6732 }
 0x22d   : > { %v6735_v7 = vunpack.i.h.bf16 %v6733_v20  ;;  %v6734_v57 = vunpack.i.l.bf16 %v6733_v20 }
 0x22f   : > { %v2706_v16 = vsel %vm2704_vm12, 0.0, %v6735_v7  ;;  %v2705_v33 = vsel %vm2704_vm12, 0.0, %v6734_v57  ;;  %v8274_v57 = vld [vmem:[%s10348_s6 + $0x50] sm:$0xff] }
 0x230   : > { %v2709_v41 = vsel %vm2707_vm13, %v2706_v16, 0.0  ;;  %v2708_v22 = vsel %vm2707_vm13, %v2705_v33, 0.0  ;;  %v8233_v36 = vpack.c.bf16 %v2706_v16, %v2705_v33  ;;  %v2744_v40 = vpop.permute.xlu1 %2743 }
 0x231   : > { %v8235_v43 = vpack.i.bf16 %v2709_v41, %v2708_v22  ;;  %v2841_v41 = vrot.slane %v2744_v40, %v7370_v19  ;;  %v8292_v40 = vld [vmem:[%s10348_s6 + $0x60] sm:$0xff] }
 0x233   : > { %6744 = vrot.lane.b32.xlu0 %v8235_v43, %s6906_s15 }
 0x234   : > { %v2750_v34 = vpop.permute.xlu1 %2749 }
 0x235   : > { %v2850_v20 = vrot.slane %v2750_v34, %v7370_v19 }
 0x237   : > { %3087 = vperm.xlu0 %6737, %v8242_v24  }
 0x238   : > { %v2753_v55 = vpop.permute.xlu1 %2752 }
 0x239   : > { %v2854_v7 = vrot.slane %v2753_v55, %v7368_v23  ;;  %v2845_v55 = vrot.slane %v7721_v60, %v7368_v23 }
 0x23b   : > { %3096 = vperm.xlu0 %6737, %v8250_v15   ;;  %v2855_v32 = vsel %vm611_vm2, %v2854_v7, %v2850_v20  ;;  %v2846_v20 = vsel %vm611_vm2, %v2845_v55, %v2841_v41 }
 0x23c   : > { %v2759_v52 = vpop.permute.xlu1 %2758  ;;  %v2982_v63 = vsel %vm748_vm3, %v2855_v32, %v2846_v20  ;;  %v2904_v32 = vrot.slane %v7752_v35, %v7370_v19 }
 0x23d   : > { %v2863_v16 = vrot.slane %v2759_v52, %v7368_v23 }
 0x23f   : > { %3102 = vperm.xlu0 %6737, %v8256_v26  }
 0x240   : > { %v2765_v17 = vpop.permute.xlu1 %2764 }
 0x241   : > { %v2872_v22 = vrot.slane %v2765_v17, %v7368_v23  ;;  %v2864_v17 = vsel %vm611_vm2, %v2863_v16, %v2859_v47 }
 0x242   : > { %v2983_v47 = vsel %vm750_vm4, %v2864_v17, %v2982_v63  ;;  %v8339_v17 = vld [vmem:[%s10348_s6 + $0x90] sm:$0xff] }
 0x243   : > { %3108 = vperm.xlu0 %6737, %v8264_v14   ;;  %v2873_v7 = vsel %vm611_vm2, %v2872_v22, %v2868_v51 }
 0x244   : > { %v2771_v61 = vpop.permute.xlu1 %2770  ;;  %v2984_v51 = vsel %vm752_vm5, %v2873_v7, %v2983_v47  ;;  %v8355_v7 = vld [vmem:[%s10348_s6 + $0xb0] sm:$0xff] }
 0x245   : > { %v2881_v34 = vrot.slane %v2771_v61, %v7368_v23  ;;  %v8300_v61 = vpop.permute.xlu0 %1980  ;;  %v8369_v47 = vld [vmem:[%s10348_s6 + $0xd0] sm:$0xff] }
 0x246   : > { %10610 = vst [vmem:[#allocation72_spill] sm:$0xff] %v8300_v61 }
 0x247   : > { %3114 = vperm.xlu0 %6737, %v8274_v57   ;;  %v2882_v12 = vsel %vm611_vm2, %v2881_v34, %v2877_v10 }
 0x248   : > { %v2777_v33 = vpop.permute.xlu1 %2776  ;;  %v2985_v22 = vsel %vm754_vm6, %v2882_v12, %v2984_v51  ;;  %v8377_v51 = vld [vmem:[%s10348_s6 + $0xe0] sm:$0xff] }
 0x249   : > { %v2890_v52 = vrot.slane %v2777_v33, %v7368_v23  ;;  %v8324_v55 = vpop.permute.xlu0 %1986 }
 0x24a   : > { %10611 = vst [vmem:[#allocation73_spill] sm:$0xff] %v8324_v55 }
 0x24b   : > { %3120 = vperm.xlu0 %6737, %v8292_v40   ;;  %v2891_v16 = vsel %vm611_vm2, %v2890_v52, %v2886_v2  ;;  %v8329_v52 = vld [vmem:[%s10348_s6 + $0x80] sm:$0xff] }
 0x24c   : > { %v2783_v60 = vpop.permute.xlu1 %2782  ;;  %v2986_v34 = vsel %vm756_vm7, %v2891_v16, %v2985_v22  ;;  %v8347_v2 = vld [vmem:[%s10348_s6 + $0xa0] sm:$0xff] }
 0x24d   : > { %v2899_v33 = vrot.slane %v2783_v60, %v7368_v23  ;;  %v8342_v60 = vpop.permute.xlu0 %1992  ;;  %10613 = vst [vmem:[#allocation75_spill] sm:$0xff] %v8347_v2 }
 0x24e   : > { %10612 = vst [vmem:[#allocation74_spill] sm:$0xff] %v8342_v60 }
 0x24f   : > { %3126 = vperm.xlu0 %6737, %v8314_v8   ;;  %v2900_v41 = vsel %vm611_vm2, %v2899_v33, %v2895_v48  ;;  %v8361_v33 = vld [vmem:[%s10348_s6 + $0xc0] sm:$0xff] }
 0x250   : > { %v2789_v44 = vpop.permute.xlu1 %2788  ;;  %v2987_v10 = vsel %vm758_vm8, %v2900_v41, %v2986_v34 }
 0x251   : > { %v2908_v63 = vrot.slane %v2789_v44, %v7368_v23  ;;  %v8350_v20 = vpop.permute.xlu0 %1998  ;;  %v10618_v44 = vmov 2  }
 0x252   : > { %10614 = vst [vmem:[#allocation76_spill] sm:$0xff] %v8350_v20 }
 0x253   : > { %3132 = vperm.xlu0 %6737, %v8329_v52   ;;  %v2909_v48 = vsel %vm611_vm2, %v2908_v63, %v2904_v32  ;;  %v6849_v32 = vld [vmem:[%s10346_s4 + $0x8] sm:$0xff]  ;;  %v6850_v63 = vld [vmem:[%s10346_s4 + $0x20] sm:$0xff] }
 0x254   : > { %v2988_v35 = vsel %vm760_vm9, %v2909_v48, %v2987_v10  ;;  %v6852_v48 = vld [vmem:[%s10346_s4 + $0x40] sm:$0xff] }
 0x255   : > { %6525 = vmatprep.mubr.msk.f32.mxu0 %vm777_vm10, %v2988_v35  ;;  %v8364_v12 = vpop.permute.xlu0 %2004  ;;  %v6853_v35 = vld [vmem:[%s10346_s4 + $0x50] sm:$0xff] }
 0x256   : > { %10615 = vst [vmem:[#allocation77_spill] sm:$0xff] %v8364_v12 }
 0x257   : > { %3138 = vperm.xlu0 %6737, %v8339_v17  }
 0x259   : > { %v8372_v16 = vpop.permute.xlu0 %2010 }
 0x25a   : > { %10616 = vst [vmem:[#allocation78_spill] sm:$0xff] %v8372_v16 }
 0x25b   : > { %3144 = vperm.xlu0 %6737, %v8347_v2  }
 0x25d   : > { %v8381_v41 = vpop.permute.xlu0 %2016 }
 0x25e   : > { %10617 = vst [vmem:[#allocation79_spill] sm:$0xff] %v8381_v41  ;;  %v2795_v41 = vpop.permute.xlu1 %2794 }
 0x25f   : > { %3150 = vperm.xlu0 %6737, %v8355_v7  }
 0x261   : > { %v8387_v22 = vpop.permute.xlu0 %2022 }
 0x262   : > { %10619 = vst [vmem:[#allocation80_spill] sm:$0xff] %v8387_v22  ;;  %v2801_v16 = vpop.permute.xlu1 %2800 }
 0x263   : > { %3156 = vperm.xlu0 %6737, %v8361_v33  }
 0x265   : > { %v8395_v34 = vpop.permute.xlu0 %2028 }
 0x266   : > { %10620 = vst [vmem:[#allocation81_spill] sm:$0xff] %v8395_v34  ;;  %v2807_v21 = vpop.permute.xlu1 %2806 }
 0x267   : > { %3162 = vperm.xlu0 %6737, %v8369_v47  }
 0x269   : > { %v8400_v10 = vpop.permute.xlu0 %2034 }
 0x26a   : > { %10621 = vst [vmem:[#allocation82_spill] sm:$0xff] %v8400_v10  ;;  %v2813_v12 = vpop.permute.xlu1 %2812 }
 0x26b   : > { %3168 = vperm.xlu0 %6737, %v8377_v51  }
 0x26e   : > { %v2819_v31 = vpop.permute.xlu1 %2818 }
 0x26f   : > { %3174 = vperm.xlu0 %6737, %v7568_v11   ;;  %v6851_v11 = vld [vmem:[%s10346_s4 + $0x30] sm:$0xff] }
 0x272   : > { %v2825_v60 = vpop.permute.xlu1 %2824 }
 0x273   : > { %6749 = vset.pattern.permute.xlu0 %v10618_v44 }
 0x274   : > { %2301 = vperm.xlu0 %6749, %v6849_v32   ;;  %v6854_v32 = vld [vmem:[%s10346_s4 + $0x60] sm:$0xff] }
 0x276   : > { %v2831_v59 = vpop.permute.xlu1 %2830 }
 0x278   : > { %2310 = vperm.xlu0 %6749, %v6850_v63   ;;  %v8408_v63 = vpop.permute.xlu0 %2040 }
 0x279   : > { %10622 = vst [vmem:[#allocation83_spill] sm:$0xff] %v8408_v63  ;;  %v10633_v63 = vld [vmem:[#allocation35_spill] sm:$0xff] }
 0x27c   : > { %2316 = vperm.xlu0 %6749, %v6851_v11   ;;  %v6855_v11 = vld [vmem:[%s10346_s4 + $0x70] sm:$0xff] }
 0x280   : > { %2322 = vperm.xlu0 %6749, %v6852_v48   ;;  %v8413_v48 = vpop.permute.xlu0 %2046 }
 0x281   : > { %10623 = vst [vmem:[#allocation84_spill] sm:$0xff] %v8413_v48 }
 0x284   : > { %2328 = vperm.xlu0 %6749, %v6853_v35   ;;  %v6857_v35 = vld [vmem:[%s10346_s4 + $0x90] sm:$0xff] }
 0x288   : > { %2334 = vperm.xlu0 %6749, %v6854_v32   ;;  %v8421_v32 = vpop.permute.xlu0 %2052 }
 0x289   : > { %10624 = vst [vmem:[#allocation85_spill] sm:$0xff] %v8421_v32 }
 0x28c   : > { %2340 = vperm.xlu0 %6749, %v6855_v11   ;;  %v8426_v11 = vpop.permute.xlu0 %2058 }
 0x28d   : > { %10625 = vst [vmem:[#allocation86_spill] sm:$0xff] %v8426_v11 }
 0x290   : > { %2346 = vperm.xlu0 %6749, %v6856_v9   ;;  %v6860_v9 = vld [vmem:[%s10346_s4 + $0xc0] sm:$0xff] }
 0x294   : > { %2352 = vperm.xlu0 %6749, %v6857_v35   ;;  %v8434_v35 = vpop.permute.xlu0 %2645 }
 0x295   : > { %10626 = vst [vmem:[#allocation87_spill] sm:$0xff] %v8434_v35  ;;  %v10629_v35 = vld [vmem:[#allocation46_spill] sm:$0xff] }
 0x298   : > { %2358 = vperm.xlu0 %6749, %v6858_v4  }
 0x29c   : > { %2364 = vperm.xlu0 %6749, %v6859_v5  }
 0x2a0   : > { %2370 = vperm.xlu0 %6749, %v6860_v9  }
 0x2a4   : > { %2376 = vperm.xlu0 %6749, %v6861_v58   ;;  %v10630_v58 = vld [vmem:[#allocation28_spill] sm:$0xff] }
 0x2a5   : > { %v6745_v4 = vpop.permute.xlu0 %6744 }
 0x2a6   : > { %v6747_v45 = vunpack.i.h.bf16 %v6745_v4  ;;  %v6746_v11 = vunpack.i.l.bf16 %v6745_v4 }
 0x2a8   : > { %2382 = vperm.xlu0 %6749, %v6862_v38   ;;  %v6619_v5 = vpack.c.bf16 %v6747_v45, %v6746_v11  ;;  %v10632_v11 = vld [vmem:[#allocation33_spill] sm:$0xff] }
 0x2aa   : > { %6620 = vmatprep.subr.bf16.mxu0 %v6619_v5 }
 0x2ab   : > { %6622 = vmatpush3.bf16.msra.mxu0 %v6619_v5 }
 0x2ac   : > { %2388 = vperm.xlu0 %6749, %v10629_v35   ;;  %6625 = vmatprep.subr.msk.bf16.mxu0 %vm8444_vm14, %v8233_v36  ;;  %v8461_v35 = vld [vmem:[%s10348_s6 + $0xf8] sm:$0xff] }
 0x2b0   : > { %3417 = vperm.xlu0 %6749, %v10630_v58  }
 0x2b3   : > { %v6499_v4 = vpop.f32.mrb[0].mxu0 }
 0x2b4   : > { %v1542_v38 = vadd.f32 %v6499_v4, %v10631_v30  ;;  %v1520_v45 = vpop.f32.mrb[1].mxu0  ;;  %3426 = vperm.xlu0 %6749, %v10632_v11   ;;  %v10635_v30 = vld [vmem:[#allocation67_spill] sm:$0xff]  ;;  %v10636_v4 = vmov 0  }
 0x2b5   : > { %v1541_v32 = vadd.f32 %v8245_v13, %v1520_v45  ;;  %v10637_v13 = vld [vmem:[#allocation3_spill] sm:$0xff] }
 0x2b6   : > { %v1544_v48 = vmax.f32 %v1542_v38, 0.0 }
 0x2b7   : > { %v1543_v27 = vmax.f32 %v1541_v32, 0.0 }
 0x2b8   : > { %3432 = vperm.xlu0 %6749, %v10633_v63  }
 0x2b9   : > { %v6738_v5 = vpack.i.bf16 %v1544_v48, %v1543_v27  ;;  %v8469_v27 = vpop.permute.xlu0 %3087  ;;  %v10638_v48 = vld [vmem:[#allocation31_spill] sm:$0xff] }
 0x2bb   : > { %6739 = vrot.lane.b32.xlu1 %v6738_v5, %s6904_s29 }
 0x2bc   : > { %3438 = vperm.xlu0 %6749, %v10634_v54  }
 0x2bd   : > { %v8475_v32 = vpop.permute.xlu0 %3096 }
 0x2bf   : > { %2836 = vperm.xlu1 %6736, %v8461_v35  }
 0x2c0   : > { %3444 = vperm.xlu0 %6749, %v10635_v30  }
 0x2c1   : > { %v8479_v38 = vpop.permute.xlu0 %3102 }
 0x2c3   : > { %6748 = vset.pattern.permute.xlu1 %v10636_v4 }
 0x2c4   : > { %3084 = vperm.xlu1 %6748, %v10630_v58   ;;  %3450 = vperm.xlu0 %6749, %v10637_v13  }
 0x2c5   : > { %v8483_v45 = vpop.permute.xlu0 %3108 }
 0x2c8   : > { %3090 = vperm.xlu1 %6748, %v10638_v48   ;;  %3456 = vperm.xlu0 %6749, %v8011_v46  }
 0x2c9   : > { %v8486_v5 = vpop.permute.xlu0 %3114 }
 0x2cc   : > { %3093 = vperm.xlu1 %6748, %v10632_v11   ;;  %3462 = vperm.xlu0 %6749, %v8041_v37  }
 0x2cd   : > { %v8490_v4 = vpop.permute.xlu0 %3120 }
 0x2d0   : > { %3099 = vperm.xlu1 %6748, %v10633_v63   ;;  %3468 = vperm.xlu0 %6749, %v8069_v25  }
 0x2d1   : > { %v8493_v0 = vpop.permute.xlu0 %3126 }
 0x2d4   : > { %3105 = vperm.xlu1 %6748, %v10634_v54  }
 0x2d5   : > { %v8497_v10 = vpop.permute.xlu0 %3132 }
 0x2d6   : > { %10639 = vst [vmem:[#allocation46_spill] sm:$0xff] %v8497_v10  ;;  %v2917_v10 = vrot.slane %v2795_v41, %v7368_v23  ;;  %v2962_v41 = vrot.slane %v2825_v60, %v7368_v23 }
 0x2d8   : > { %3111 = vperm.xlu1 %6748, %v10635_v30  }
 0x2d9   : > { %v8500_v56 = vpop.permute.xlu0 %3138 }
 0x2da   : > { %10640 = vst [vmem:[#allocation28_spill] sm:$0xff] %v8500_v56 }
 0x2dc   : > { %3117 = vperm.xlu1 %6748, %v10637_v13  }
 0x2dd   : > { %v8504_v28 = vpop.permute.xlu0 %3144 }
 0x2de   : > { %10641 = vst [vmem:[#allocation55_spill] sm:$0xff] %v8504_v28  ;;  %v2944_v28 = vrot.slane %v2813_v12, %v7368_v23  ;;  %v10656_v12 = vld [vmem:[#allocation57_spill] sm:$0xff] }
 0x2e0   : > { %3123 = vperm.xlu1 %6748, %v8011_v46  }
 0x2e1   : > { %v8507_v34 = vpop.permute.xlu0 %3150 }
 0x2e2   : > { %10642 = vst [vmem:[#allocation33_spill] sm:$0xff] %v8507_v34 }
 0x2e4   : > { %3129 = vperm.xlu1 %6748, %v8041_v37  }
 0x2e5   : > { %v8512_v22 = vpop.permute.xlu0 %3156 }
 0x2e6   : > { %10643 = vst [vmem:[#allocation35_spill] sm:$0xff] %v8512_v22 }
 0x2e8   : > { %3135 = vperm.xlu1 %6748, %v8069_v25  }
 0x2e9   : > { %v8515_v29 = vpop.permute.xlu0 %3162 }
 0x2ea   : > { %10644 = vst [vmem:[#allocation65_spill] sm:$0xff] %v8515_v29 }
 0x2ec   : > { %3141 = vperm.xlu1 %6748, %v8110_v3  }
 0x2ed   : > { %v8519_v42 = vpop.permute.xlu0 %3168 }
 0x2ee   : > { %10645 = vst [vmem:[#allocation67_spill] sm:$0xff] %v8519_v42 }
 0x2f0   : > { %3147 = vperm.xlu1 %6748, %v8153_v39  }
 0x2f4   : > { %3153 = vperm.xlu1 %6748, %v8170_v49  }
 0x2f8   : > { %3159 = vperm.xlu1 %6748, %v8178_v18  }
 0x2fc   : > { %3165 = vperm.xlu1 %6748, %v8186_v6  }
 0x300   : > { %3171 = vperm.xlu1 %6748, %v8194_v50  }
 0x304   : > { %3177 = vperm.xlu1 %6748, %v8461_v35  }
 0x308   : > { %6750 = vset.pattern.permute.xlu1 %v10618_v44  ;;  %v8522_v44 = vpop.permute.xlu0 %3174 }
 0x309   : > { %3420 = vperm.xlu1 %6750, %v8242_v24   ;;  %10646 = vst [vmem:[#allocation3_spill] sm:$0xff] %v8522_v44 }
 0x30c   : > { %v8526_v20 = vpop.permute.xlu0 %2301 }
 0x30d   : > { %3423 = vperm.xlu1 %6750, %v10638_v48   ;;  %10647 = vst [vmem:[#allocation31_spill] sm:$0xff] %v8526_v20 }
 0x310   : > { %v8529_v53 = vpop.permute.xlu0 %2310 }
 0x311   : > { %3429 = vperm.xlu1 %6750, %v8250_v15   ;;  %10648 = vst [vmem:[#allocation88_spill] sm:$0xff] %v8529_v53 }
 0x314   : > { %v8533_v61 = vpop.permute.xlu0 %2316 }
 0x315   : > { %3435 = vperm.xlu1 %6750, %v8256_v26   ;;  %10649 = vst [vmem:[#allocation89_spill] sm:$0xff] %v8533_v61  ;;  %v2926_v61 = vrot.slane %v2801_v16, %v7368_v23 }
 0x318   : > { %v8541_v34 = vpop.permute.xlu0 %2322 }
 0x319   : > { %3441 = vperm.xlu1 %6750, %v8264_v14   ;;  %10651 = vst [vmem:[#allocation91_spill] sm:$0xff] %v8541_v34 }
 0x31c   : > { %v8566_v34 = vpop.permute.xlu0 %2328 }
 0x31d   : > { %3447 = vperm.xlu1 %6750, %v8274_v57  }
 0x321   : > { %3453 = vperm.xlu1 %6750, %v8292_v40  }
 0x325   : > { %3459 = vperm.xlu1 %6750, %v8314_v8  }
 0x329   : > { %3465 = vperm.xlu1 %6750, %v8329_v52  }
 0x32d   : > { %3471 = vperm.xlu1 %6750, %v8339_v17   ;;  %v6740_v55 = vpop.permute.xlu1 %6739 }
 0x32e   : > { %v6742_v1 = vunpack.i.h.bf16 %v6740_v55  ;;  %v6741_v62 = vunpack.i.l.bf16 %v6740_v55  ;;  %v2935_v55 = vrot.slane %v2807_v21, %v7368_v23  ;;  %v10655_v21 = vld [vmem:[#allocation56_spill] sm:$0xff] }
 0x330   : > { %v1588_v44 = vsel %vm466_vm0, 0.0, %v6742_v1  ;;  %v1587_v42 = vsel %vm466_vm0, 0.0, %v6741_v62  ;;  %v10652_v1 = vld [vmem:[#allocation11_spill] sm:$0xff] }
 0x331   : > { %v1590_v20 = vsel %vm469_vm1, %v1588_v44, 0.0  ;;  %v1589_v29 = vsel %vm469_vm1, %v1587_v42, 0.0  ;;  %v8539_v22 = vpack.c.bf16 %v1588_v44, %v1587_v42  ;;  %v2922_v62 = vrot.slane %v10652_v1, %v7370_v19  ;;  %v10653_v42 = vld [vmem:[#allocation15_spill] sm:$0xff] }
 0x332   : > { %v6756_v53 = vpack.i.bf16 %v1590_v20, %v1589_v29  ;;  %v2931_v29 = vrot.slane %v10653_v42, %v7370_v19  ;;  %v2953_v20 = vrot.slane %v2819_v31, %v7368_v23  ;;  %v2940_v44 = vrot.slane %v10655_v21, %v7370_v19 }
 0x333   : > { %10650 = vst [vmem:[#allocation90_spill] sm:$0xff] %v8539_v22  ;;  %v2927_v1 = vsel %vm611_vm2, %v2926_v61, %v2922_v62  ;;  %v2949_v22 = vrot.slane %v10656_v12, %v7370_v19  ;;  %v2971_v31 = vrot.slane %v2831_v59, %v7368_v23  ;;  %v10658_v61 = vld [vmem:[#allocation59_spill] sm:$0xff] }
 0x334   : > { %6757 = vrot.lane.b32.xlu0 %v6756_v53, %s6907_s26  ;;  %6752 = vrot.lane.b32.xlu1 %v6756_v53, %s6906_s15  ;;  %v10654_v53 = vld [vmem:[#allocation9_spill] sm:$0xff]  ;;  %v2936_v42 = vsel %vm611_vm2, %v2935_v55, %v2931_v29  ;;  %v2945_v21 = vsel %vm611_vm2, %v2944_v28, %v2940_v44  ;;  %v2967_v62 = vrot.slane %v10658_v61, %v7370_v19  ;;  %v10659_v29 = vld [vmem:[#allocation60_spill] sm:$0xff] }
 0x335   : > { %v2913_v16 = vrot.slane %v10654_v53, %v7370_v19  ;;  %v2954_v12 = vsel %vm611_vm2, %v2953_v20, %v2949_v22 }
 0x337   : > { %v2918_v53 = vsel %vm611_vm2, %v2917_v10, %v2913_v16  ;;  %v2972_v10 = vsel %vm611_vm2, %v2971_v31, %v2967_v62  ;;  %v2976_v16 = vrot.slane %v10659_v29, %v7370_v19 }
 0x338   : > { %3474 = vperm.xlu0 %6749, %v8110_v3   ;;  %3477 = vperm.xlu1 %6750, %v8347_v2   ;;  %v10657_v2 = vld [vmem:[#allocation58_spill] sm:$0xff]  ;;  %v2989_v60 = vsel %vm748_vm3, %v2927_v1, %v2918_v53  ;;  %v8587_v1 = vpop.permute.xlu0 %2334 }
 0x339   : > { %v2958_v56 = vrot.slane %v10657_v2, %v7370_v19  ;;  %v2990_v59 = vsel %vm750_vm4, %v2936_v42, %v2989_v60 }
 0x33a   : > { %v2991_v2 = vsel %vm752_vm5, %v2945_v21, %v2990_v59  ;;  %v10429_v59 = vmov 3  }
 0x33b   : > { %v2963_v55 = vsel %vm611_vm2, %v2962_v41, %v2958_v56  ;;  %v2992_v44 = vsel %vm754_vm6, %v2954_v12, %v2991_v2 }
 0x33c   : > { %3480 = vperm.xlu0 %6749, %v8153_v39   ;;  %3483 = vperm.xlu1 %6750, %v8355_v7   ;;  %v2993_v20 = vsel %vm756_vm7, %v2963_v55, %v2992_v44  ;;  %v8600_v53 = vpop.permute.xlu0 %2340 }
 0x33d   : > { %v2994_v41 = vsel %vm758_vm8, %v2972_v10, %v2993_v20 }
 0x33e   : > { %v2837_v28 = vpop.permute.xlu1 %2836 }
 0x33f   : > { %v2980_v22 = vrot.slane %v2837_v28, %v7368_v23 }
 0x340   : > { %3486 = vperm.xlu0 %6749, %v8170_v49   ;;  %3489 = vperm.xlu1 %6750, %v8361_v33   ;;  %v8604_v62 = vpop.permute.xlu0 %2346 }
 0x341   : > { %v2981_v56 = vsel %vm611_vm2, %v2980_v22, %v2976_v16 }
 0x342   : > { %v2995_v42 = vsel %vm760_vm9, %v2981_v56, %v2994_v41 }
 0x343   : > { %6526 = vmatmul.mubr.msk.f32.vlgmr.msra.gmra.mrb[2].mxu0 %vm777_vm10, %v2995_v42  ;;  %v3085_v31 = vpop.permute.xlu1 %3084 }
 0x344   : > { %6628 = vmatpush3.bf16.msk.msra.mxu0 %vm8444_vm14, %v8233_v36  ;;  %3492 = vperm.xlu0 %6749, %v8178_v18   ;;  %v8610_v36 = vld [vmem:[%s10348_s6 + $0xf0] sm:$0xff]  ;;  %v8616_v12 = vpop.permute.xlu0 %2352  ;;  %v3182_v44 = vrot.slane %v3085_v31, %v7370_v19 }
 0x345   : > { %3495 = vperm.xlu1 %6750, %v8369_v47  }
 0x347   : > { %v3091_v21 = vpop.permute.xlu1 %3090 }
 0x348   : > { %3498 = vperm.xlu0 %6749, %v8186_v6   ;;  %v8622_v10 = vpop.permute.xlu0 %2358  ;;  %v3191_v22 = vrot.slane %v3091_v21, %v7370_v19 }
 0x349   : > { %3501 = vperm.xlu1 %6750, %v8377_v51  }
 0x34b   : > { %v3094_v61 = vpop.permute.xlu1 %3093 }
 0x34c   : > { %3504 = vperm.xlu0 %6749, %v8194_v50   ;;  %v3195_v28 = vrot.slane %v3094_v61, %v7368_v23  ;;  %v8640_v41 = vpop.permute.xlu0 %2364 }
 0x34d   : > { %3507 = vperm.xlu1 %6750, %v8610_v36  }
 0x34e   : > { %v3196_v42 = vsel %vm611_vm2, %v3195_v28, %v3191_v22 }
 0x34f   : > { %v3100_v60 = vpop.permute.xlu1 %3099 }
 0x350   : > { %3510 = vperm.xlu0 %6749, %v8461_v35   ;;  %v3204_v29 = vrot.slane %v3100_v60, %v7368_v23  ;;  %v8664_v22 = vpop.permute.xlu0 %2370 }
 0x351   : > { %6762 = vrot.lane.b32.xlu1 %v8235_v43, %s6907_s26 }
 0x352   : > { %6767 = vset.pattern.permute.xlu1 %v10429_v59 }
 0x353   : > { %v3106_v55 = vpop.permute.xlu1 %3105 }
 0x354   : > { %6766 = vset.pattern.permute.xlu0 %v10429_v59  ;;  %v3213_v20 = vrot.slane %v3106_v55, %v7368_v23  ;;  %v3236_v55 = vrot.slane %v8490_v4, %v7370_v19  ;;  %v3245_v4 = vrot.slane %v8493_v0, %v7370_v19  ;;  %v8677_v0 = vpop.permute.xlu0 %2376 }
 0x355   : > { %3761 = vperm.xlu1 %6767, %v8242_v24   ;;  %3758 = vperm.xlu0 %6766, %v10630_v58   ;;  %v3200_v58 = vrot.slane %v8475_v32, %v7370_v19  ;;  %v3218_v32 = vrot.slane %v8483_v45, %v7370_v19 }
 0x357   : > { %v3112_v2 = vpop.permute.xlu1 %3111  ;;  %v3205_v21 = vsel %vm611_vm2, %v3204_v29, %v3200_v58 }
 0x358   : > { %v3222_v56 = vrot.slane %v3112_v2, %v7368_v23 }
 0x359   : > { %3764 = vperm.xlu1 %6767, %v10638_v48   ;;  %3767 = vperm.xlu0 %6766, %v10632_v11   ;;  %v3186_v11 = vrot.slane %v8469_v27, %v7368_v23  ;;  %v3209_v48 = vrot.slane %v8479_v38, %v7370_v19 }
 0x35a   : > { %v3223_v28 = vsel %vm611_vm2, %v3222_v56, %v3218_v32  ;;  %v8681_v32 = vpop.permute.xlu0 %2382 }
 0x35b   : > { %v3118_v16 = vpop.permute.xlu1 %3117  ;;  %v3187_v27 = vsel %vm611_vm2, %v3186_v11, %v3182_v44  ;;  %v3214_v60 = vsel %vm611_vm2, %v3213_v20, %v3209_v48 }
 0x35c   : > { %v3231_v31 = vrot.slane %v3118_v16, %v7368_v23  ;;  %v3323_v2 = vsel %vm748_vm3, %v3196_v42, %v3187_v27 }
 0x35d   : > { %3770 = vperm.xlu1 %6767, %v8250_v15   ;;  %3773 = vperm.xlu0 %6766, %v10633_v63   ;;  %v3227_v63 = vrot.slane %v8486_v5, %v7370_v19  ;;  %v3324_v45 = vsel %vm750_vm4, %v3205_v21, %v3323_v2  ;;  %v10661_v2 = vld [vmem:[#allocation55_spill] sm:$0xff] }
 0x35e   : > { %v3325_v29 = vsel %vm752_vm5, %v3214_v60, %v3324_v45  ;;  %v10663_v45 = vld [vmem:[#allocation46_spill] sm:$0xff] }
 0x35f   : > { %v3124_v61 = vpop.permute.xlu1 %3123  ;;  %v3232_v5 = vsel %vm611_vm2, %v3231_v31, %v3227_v63  ;;  %v3326_v20 = vsel %vm754_vm6, %v3223_v28, %v3325_v29  ;;  %v3272_v28 = vrot.slane %v10661_v2, %v7370_v19  ;;  %v10664_v29 = vld [vmem:[#allocation33_spill] sm:$0xff]  ;;  %v10668_v2 = vld [vmem:[#allocation3_spill] sm:$0xff] }
 0x360   : > { %v3240_v38 = vrot.slane %v3124_v61, %v7368_v23 }
 0x361   : > { %3776 = vperm.xlu1 %6767, %v8256_v26   ;;  %3779 = vperm.xlu0 %6766, %v10634_v54   ;;  %v3327_v54 = vsel %vm756_vm7, %v3232_v5, %v3326_v20  ;;  %v3254_v5 = vrot.slane %v10663_v45, %v7370_v19  ;;  %v10665_v20 = vld [vmem:[#allocation35_spill] sm:$0xff] }
 0x362   : > { %v3241_v16 = vsel %vm611_vm2, %v3240_v38, %v3236_v55 }
 0x363   : > { %v3130_v44 = vpop.permute.xlu1 %3129  ;;  %v3328_v11 = vsel %vm758_vm8, %v3241_v16, %v3327_v54  ;;  %v3281_v16 = vrot.slane %v10664_v29, %v7370_v19 }
 0x364   : > { %v3249_v58 = vrot.slane %v3130_v44, %v7368_v23 }
 0x365   : > { %3782 = vperm.xlu1 %6767, %v8264_v14   ;;  %3785 = vperm.xlu0 %6766, %v10635_v30  }
 0x366   : > { %v3250_v56 = vsel %vm611_vm2, %v3249_v58, %v3245_v4  ;;  %v3290_v58 = vrot.slane %v10665_v20, %v7370_v19  ;;  %v10670_v20 = vld [vmem:[#allocation19_spill] sm:$0xff] }
 0x367   : > { %v3136_v48 = vpop.permute.xlu1 %3135  ;;  %v3329_v42 = vsel %vm760_vm9, %v3250_v56, %v3328_v11  ;;  %v10666_v11 = vld [vmem:[#allocation65_spill] sm:$0xff] }
 0x368   : > { %6532 = vmatprep.mubr.msk.f32.mxu0 %vm777_vm10, %v3329_v42  ;;  %v3258_v55 = vrot.slane %v3136_v48, %v7368_v23  ;;  %v3299_v48 = vrot.slane %v10666_v11, %v7370_v19  ;;  %v10673_v11 = vld [vmem:[#allocation21_spill] sm:$0xff] }
 0x369   : > { %3788 = vperm.xlu1 %6767, %v8274_v57   ;;  %3791 = vperm.xlu0 %6766, %v10637_v13   ;;  %v8687_v13 = vpop.permute.xlu0 %2388 }
 0x36a   : > { %v3259_v42 = vsel %vm611_vm2, %v3258_v55, %v3254_v5 }
 0x36b   : > { %v3142_v31 = vpop.permute.xlu1 %3141 }
 0x36c   : > { %v3267_v63 = vrot.slane %v3142_v31, %v7368_v23 }
 0x36d   : > { %3794 = vperm.xlu1 %6767, %v8292_v40   ;;  %3797 = vperm.xlu0 %6766, %v8011_v46   ;;  %v8691_v46 = vpop.permute.xlu0 %3417 }
 0x36f   : > { %v3148_v30 = vpop.permute.xlu1 %3147 }
 0x370   : > { %v3276_v27 = vrot.slane %v3148_v30, %v7368_v23 }
 0x371   : > { %3800 = vperm.xlu1 %6767, %v8314_v8   ;;  %3803 = vperm.xlu0 %6766, %v8041_v37   ;;  %v10660_v37 = vld [vmem:[#allocation28_spill] sm:$0xff] }
 0x372   : > { %v3263_v38 = vrot.slane %v10660_v37, %v7370_v19  ;;  %v3277_v54 = vsel %vm611_vm2, %v3276_v27, %v3272_v28  ;;  %v3317_v28 = vrot.slane %v10668_v2, %v7370_v19 }
 0x373   : > { %v3154_v21 = vpop.permute.xlu1 %3153 }
 0x374   : > { %v3268_v44 = vsel %vm611_vm2, %v3267_v63, %v3263_v38 }
 0x375   : > { %3806 = vperm.xlu1 %6767, %v8329_v52   ;;  %3809 = vperm.xlu0 %6766, %v8069_v25   ;;  %v3285_v25 = vrot.slane %v3154_v21, %v7368_v23  ;;  %v10667_v21 = vld [vmem:[#allocation67_spill] sm:$0xff]  ;;  %v3330_v63 = vsel %vm748_vm3, %v3268_v44, %v3259_v42 }
 0x376   : > { %v3331_v27 = vsel %vm750_vm4, %v3277_v54, %v3330_v63  ;;  %v10671_v54 = vld [vmem:[#allocation48_spill] sm:$0xff]  ;;  %v10677_v63 = vld [vmem:[#allocation50_spill] sm:$0xff] }
 0x377   : > { %v3160_v61 = vpop.permute.xlu1 %3159  ;;  %v3286_v31 = vsel %vm611_vm2, %v3285_v25, %v3281_v16 }
 0x378   : > { %v3332_v38 = vsel %vm752_vm5, %v3286_v31, %v3331_v27  ;;  %v10675_v31 = vld [vmem:[#allocation49_spill] sm:$0xff] }
 0x379   : > { %3812 = vperm.xlu1 %6767, %v8339_v17   ;;  %3815 = vperm.xlu0 %6766, %v8110_v3   ;;  %v3294_v17 = vrot.slane %v3160_v61, %v7368_v23  ;;  %v10662_v3 = vld [vmem:[#allocation75_spill] sm:$0xff]  ;;  %v3308_v61 = vrot.slane %v10667_v21, %v7370_v19 }
 0x37a   : > { %v10676_v21 = vld [vmem:[#allocation23_spill] sm:$0xff] }
 0x37b   : > { %v3166_v60 = vpop.permute.xlu1 %3165 }
 0x37c   : > { %v3303_v4 = vrot.slane %v3166_v60, %v7368_v23  ;;  %v3295_v60 = vsel %vm611_vm2, %v3294_v17, %v3290_v58  ;;  %v1812_v58 = vrot.slane %v10670_v20, %v7370_v19  ;;  %v10683_v20 = vld [vmem:[#allocation53_spill] sm:$0xff] }
 0x37d   : > { %3818 = vperm.xlu1 %6767, %v10662_v3   ;;  %3821 = vperm.xlu0 %6766, %v8153_v39   ;;  %v8715_v39 = vpop.permute.xlu0 %3426  ;;  %v3333_v3 = vsel %vm754_vm6, %v3295_v60, %v3332_v38  ;;  %v1825_v60 = vrot.slane %v10677_v63, %v7368_v23 }
 0x37e   : > { %v3304_v37 = vsel %vm611_vm2, %v3303_v4, %v3299_v48  ;;  %v1821_v48 = vrot.slane %v10673_v11, %v7370_v19 }
 0x37f   : > { %v3172_v56 = vpop.permute.xlu1 %3171 }
 0x380   : > { %v3312_v30 = vrot.slane %v3172_v56, %v7368_v23  ;;  %v1807_v56 = vrot.slane %v10671_v54, %v7368_v23  ;;  %v1852_v54 = vrot.slane %v10683_v20, %v7368_v23  ;;  %v10689_v20 = vld [vmem:[#allocation30_spill] sm:$0xff] }
 0x381   : > { %3824 = vperm.xlu1 %6767, %v8355_v7   ;;  %3827 = vperm.xlu0 %6766, %v8170_v49   ;;  %v3334_v7 = vsel %vm756_vm7, %v3304_v37, %v3333_v3  ;;  %v8737_v49 = vpop.permute.xlu0 %3432  ;;  %v10678_v37 = vld [vmem:[#allocation26_spill] sm:$0xff]  ;;  %v10680_v3 = vld [vmem:[#allocation29_spill] sm:$0xff] }
 0x382   : > { %v3313_v55 = vsel %vm611_vm2, %v3312_v30, %v3308_v61  ;;  %v1816_v30 = vrot.slane %v10675_v31, %v7368_v23  ;;  %v1830_v61 = vrot.slane %v10676_v21, %v7370_v19  ;;  %v1839_v38 = vrot.slane %v10678_v37, %v7370_v19  ;;  %v6865_v37 = vld [vmem:[%s10348_s6 + $0x18] sm:$0xff] }
 0x383   : > { %v3178_v25 = vpop.permute.xlu1 %3177  ;;  %v3335_v5 = vsel %vm758_vm8, %v3313_v55, %v3334_v7 }
 0x384   : > { %v3321_v17 = vrot.slane %v3178_v25, %v7368_v23  ;;  %v10679_v25 = vld [vmem:[#allocation51_spill] sm:$0xff] }
 0x385   : > { %3830 = vperm.xlu1 %6767, %v8361_v33   ;;  %3833 = vperm.xlu0 %6766, %v8178_v18   ;;  %v8747_v44 = vpop.permute.xlu0 %3438  ;;  %v10669_v18 = vld [vmem:[#allocation17_spill] sm:$0xff]  ;;  %v1834_v2 = vrot.slane %v10679_v25, %v7368_v23  ;;  %v10685_v25 = vld [vmem:[#allocation62_spill] sm:$0xff] }
 0x386   : > { %v3322_v45 = vsel %vm611_vm2, %v3321_v17, %v3317_v28  ;;  %v1803_v4 = vrot.slane %v10669_v18, %v7370_v19  ;;  %v1817_v28 = vsel %vm611_vm2, %v1816_v30, %v1812_v58  ;;  %v1848_v17 = vrot.slane %v10680_v3, %v7370_v19 }
 0x387   : > { %v3336_v29 = vsel %vm760_vm9, %v3322_v45, %v3335_v5  ;;  %v1826_v5 = vsel %vm611_vm2, %v1825_v60, %v1821_v48  ;;  %v1835_v58 = vsel %vm611_vm2, %v1834_v2, %v1830_v61  ;;  %v2067_v2 = vrot.slane %v10685_v25, %v7368_v23 }
 0x388   : > { %6533 = vmatmul.mubr.msk.f32.vlgmr.msra.gmra.mrb[2].mxu0 %vm777_vm10, %v3336_v29  ;;  %v8743_v16 = vpop.permute.xlu1 %3420  ;;  %v1808_v27 = vsel %vm611_vm2, %v1807_v56, %v1803_v4  ;;  %v10682_v29 = vld [vmem:[#allocation61_spill] sm:$0xff]  ;;  %v1853_v30 = vsel %vm611_vm2, %v1852_v54, %v1848_v17  ;;  %v2099_v54 = vrot.slane %v10689_v20, %v7370_v19 }
 0x389   : > { %3836 = vperm.xlu1 %6767, %v8369_v47   ;;  %3839 = vperm.xlu0 %6766, %v8186_v6   ;;  %v10672_v47 = vld [vmem:[#allocation13_spill] sm:$0xff]  ;;  %v8778_v55 = vpop.permute.xlu0 %3444  ;;  %v1857_v18 = vrot.slane %v10682_v29, %v7370_v19 }
 0x38a   : > { %v1794_v6 = vrot.slane %v10672_v47, %v7370_v19  ;;  %v10427_v47 = vmov 4  }
 0x38c   : > { %v8749_v33 = vpop.permute.xlu1 %3423 }
 0x38d   : > { %3842 = vperm.xlu1 %6767, %v8377_v51   ;;  %3845 = vperm.xlu0 %6766, %v8194_v50   ;;  %v10674_v51 = vld [vmem:[#allocation47_spill] sm:$0xff]  ;;  %v3451_v61 = vpop.permute.xlu0 %3450 }
 0x38e   : > { %v1798_v50 = vrot.slane %v10674_v51, %v7368_v23 }
 0x390   : > { %v8763_v42 = vpop.permute.xlu1 %3429  ;;  %v1799_v45 = vsel %vm611_vm2, %v1798_v50, %v1794_v6  ;;  %v10684_v6 = vld [vmem:[#allocation54_spill] sm:$0xff] }
 0x391   : > { %3848 = vperm.xlu1 %6767, %v8610_v36   ;;  %3851 = vperm.xlu0 %6766, %v8461_v35   ;;  %v10681_v35 = vld [vmem:[#allocation52_spill] sm:$0xff]  ;;  %v1870_v56 = vsel %vm748_vm3, %v1808_v27, %v1799_v45  ;;  %v1861_v11 = vrot.slane %v10684_v6, %v7368_v23  ;;  %v6864_v50 = vld [vmem:[%s10348_s6] sm:$0xff]  ;;  %v10688_v45 = vld [vmem:[#allocation25_spill] sm:$0xff]  ;;  %v3533_v29 = vrot.slane %v8763_v42, %v7370_v19 }
 0x392   : > { %v1843_v7 = vrot.slane %v10681_v35, %v7368_v23  ;;  %v1871_v48 = vsel %vm750_vm4, %v1817_v28, %v1870_v56  ;;  %v3524_v28 = vrot.slane %v8749_v33, %v7370_v19  ;;  %v10687_v35 = vld [vmem:[#allocation64_spill] sm:$0xff]  ;;  %v3528_v33 = vrot.slane %v8715_v39, %v7368_v23  ;;  %v3457_v39 = vpop.permute.xlu0 %3456 }
 0x393   : > { %v1872_v31 = vsel %vm752_vm5, %v1826_v5, %v1871_v48  ;;  %v1862_v60 = vsel %vm611_vm2, %v1861_v11, %v1857_v18  ;;  %v2090_v5 = vrot.slane %v10688_v45, %v7370_v19  ;;  %v3519_v56 = vrot.slane %v8743_v16, %v7368_v23  ;;  %v6866_v6 = vld [vmem:[%s10348_s6 + $0x10] sm:$0xff]  ;;  %v10691_v48 = vld [vmem:[#allocation34_spill] sm:$0xff]  ;;  %v6867_v16 = vld [vmem:[%s10348_s6 + $0x28] sm:$0xff] }
 0x394   : > { %v3436_v4 = vpop.permute.xlu1 %3435  ;;  %v1844_v51 = vsel %vm611_vm2, %v1843_v7, %v1839_v38  ;;  %v1873_v21 = vsel %vm754_vm6, %v1835_v58, %v1872_v31  ;;  %v2081_v7 = vrot.slane %v10687_v35, %v7370_v19  ;;  %v10690_v11 = vld [vmem:[#allocation32_spill] sm:$0xff]  ;;  %v6870_v45 = vld [vmem:[%s10348_s6 + $0x58] sm:$0xff] }
 0x395   : > { %6769 = vrot.lane.b32.xlu1 %v8235_v43, %s6910_s13  ;;  %6773 = vset.pattern.permute.xlu0 %v10427_v47  ;;  %v1874_v27 = vsel %vm756_vm7, %v1844_v51, %v1873_v21  ;;  %v3542_v58 = vrot.slane %v3436_v4, %v7370_v19  ;;  %v2108_v42 = vrot.slane %v10690_v11, %v7370_v19  ;;  %v10712_v11 = vld [vmem:[#allocation81_spill] sm:$0xff] }
 0x396   : > { %4099 = vperm.xlu0 %6773, %v6864_v50   ;;  %6774 = vset.pattern.permute.xlu1 %v10427_v47  ;;  %v1875_v38 = vsel %vm758_vm8, %v1853_v30, %v1874_v27  ;;  %v2117_v51 = vrot.slane %v10691_v48, %v7370_v19  ;;  %v3537_v50 = vrot.slane %v8737_v49, %v7368_v23  ;;  %v10692_v49 = vld [vmem:[#allocation36_spill] sm:$0xff]  ;;  %v10715_v48 = vld [vmem:[#allocation82_spill] sm:$0xff] }
 0x397   : > { %v8821_v3 = vsel %vm760_vm9, %v1862_v60, %v1875_v38  ;;  %v3515_v4 = vrot.slane %v8691_v46, %v7370_v19  ;;  %v3546_v30 = vrot.slane %v8747_v44, %v7368_v23  ;;  %v3529_v21 = vsel %vm611_vm2, %v3528_v33, %v3524_v28  ;;  %v10694_v33 = vld [vmem:[#allocation2_spill] sm:$0xff] }
 0x398   : > { %v3442_v63 = vpop.permute.xlu1 %3441  ;;  %v2126_v27 = vrot.slane %v10692_v49, %v7370_v19  ;;  %v3555_v38 = vrot.slane %v8778_v55, %v7368_v23  ;;  %v3564_v46 = vrot.slane %v3451_v61, %v7368_v23  ;;  %v3573_v47 = vrot.slane %v3457_v39, %v7368_v23  ;;  %v6868_v61 = vld [vmem:[%s10348_s6 + $0x38] sm:$0xff]  ;;  %v10697_v39 = vld [vmem:[#allocation70_spill] sm:$0xff] }
 0x399   : > { %4102 = vperm.xlu1 %6774, %v8242_v24   ;;  %v10686_v24 = vld [vmem:[#allocation63_spill] sm:$0xff]  ;;  %v3551_v31 = vrot.slane %v3442_v63, %v7370_v19  ;;  %v10693_v63 = vld [vmem:[#allocation66_spill] sm:$0xff]  ;;  %v3520_v44 = vsel %vm611_vm2, %v3519_v56, %v3515_v4  ;;  %v3547_v28 = vsel %vm611_vm2, %v3546_v30, %v3542_v58  ;;  %v10695_v56 = vld [vmem:[#allocation4_spill] sm:$0xff] }
 0x39a   : > { %4108 = vperm.xlu0 %6773, %v6865_v37   ;;  %v2072_v17 = vrot.slane %v10686_v24, %v7370_v19  ;;  %v3538_v24 = vsel %vm611_vm2, %v3537_v50, %v3533_v29  ;;  %v3656_v55 = vsel %vm748_vm3, %v3529_v21, %v3520_v44  ;;  %v10696_v50 = vld [vmem:[#allocation71_spill] sm:$0xff]  ;;  %v2063_v21 = vrot.slane %v10697_v39, %v7370_v19  ;;  %v10699_v58 = vld [vmem:[#allocation73_spill] sm:$0xff]  ;;  %v10701_v39 = vld [vmem:[#allocation6_spill] sm:$0xff] }
 0x39b   : > { %v3556_v29 = vsel %vm611_vm2, %v3555_v38, %v3551_v31  ;;  %v3657_v4 = vsel %vm750_vm4, %v3538_v24, %v3656_v55  ;;  %v10698_v31 = vld [vmem:[#allocation72_spill] sm:$0xff]  ;;  %v2094_v37 = vrot.slane %v10699_v58, %v7368_v23  ;;  %v6869_v58 = vld [vmem:[%s10348_s6 + $0x48] sm:$0xff] }
 0x39c   : > { %v3448_v18 = vpop.permute.xlu1 %3447  ;;  %v2085_v38 = vrot.slane %v10698_v31, %v7368_v23  ;;  %v3658_v44 = vsel %vm752_vm5, %v3547_v28, %v3657_v4  ;;  %v2171_v28 = vrot.slane %v10701_v39, %v7370_v19 }
 0x39d   : > { %4105 = vperm.xlu1 %6774, %v6866_v6   ;;  %v3560_v60 = vrot.slane %v3448_v18, %v7370_v19  ;;  %v3659_v24 = vsel %vm754_vm6, %v3556_v29, %v3658_v44  ;;  %v10704_v44 = vld [vmem:[#allocation7_spill] sm:$0xff]  ;;  %v2095_v35 = vsel %vm611_vm2, %v2094_v37, %v2090_v5  ;;  %v10709_v37 = vld [vmem:[#allocation78_spill] sm:$0xff] }
 0x39e   : > { %4114 = vperm.xlu0 %6773, %v6867_v16   ;;  %v2144_v16 = vrot.slane %v10694_v33, %v7370_v19  ;;  %v2130_v20 = vrot.slane %v10709_v37, %v7368_v23 }
 0x39f   : > { %v3565_v30 = vsel %vm611_vm2, %v3564_v46, %v3560_v60  ;;  %v10700_v46 = vld [vmem:[#allocation5_spill] sm:$0xff] }
 0x3a0   : > { %v3454_v6 = vpop.permute.xlu1 %3453  ;;  %v2162_v55 = vrot.slane %v10700_v46, %v7370_v19  ;;  %v3660_v29 = vsel %vm756_vm7, %v3565_v30, %v3659_v24  ;;  %v2180_v46 = vrot.slane %v10704_v44, %v7370_v19 }
 0x3a1   : > { %v3569_v18 = vrot.slane %v3454_v6, %v7370_v19  ;;  %4111 = vperm.xlu1 %6774, %v8250_v15   ;;  %v2076_v15 = vrot.slane %v10696_v50, %v7368_v23  ;;  %v3463_v6 = vpop.permute.xlu0 %3462 }
 0x3a2   : > { %4120 = vperm.xlu0 %6773, %v6868_v61   ;;  %v3582_v50 = vrot.slane %v3463_v6, %v7368_v23 }
 0x3a3   : > { %v3574_v61 = vsel %vm611_vm2, %v3573_v47, %v3569_v18  ;;  %v10702_v47 = vld [vmem:[#allocation74_spill] sm:$0xff] }
 0x3a4   : > { %v3460_v59 = vpop.permute.xlu1 %3459  ;;  %v2103_v18 = vrot.slane %v10702_v47, %v7368_v23  ;;  %v3661_v6 = vsel %vm758_vm8, %v3574_v61, %v3660_v29  ;;  %v2086_v47 = vsel %vm611_vm2, %v2085_v38, %v2081_v7  ;;  %v10706_v61 = vld [vmem:[#allocation8_spill] sm:$0xff]  ;;  %v10707_v38 = vld [vmem:[#allocation14_spill] sm:$0xff] }
 0x3a5   : > { %v3578_v60 = vrot.slane %v3460_v59, %v7370_v19  ;;  %4117 = vperm.xlu1 %6774, %v8256_v26   ;;  %v2077_v59 = vsel %vm611_vm2, %v2076_v15, %v2072_v17  ;;  %v10703_v26 = vld [vmem:[#allocation76_spill] sm:$0xff]  ;;  %v2068_v15 = vsel %vm611_vm2, %v2067_v2, %v2063_v21 }
 0x3a6   : > { %4126 = vperm.xlu0 %6773, %v6869_v58   ;;  %v2112_v4 = vrot.slane %v10703_v26, %v7368_v23  ;;  %v10705_v58 = vld [vmem:[#allocation77_spill] sm:$0xff]  ;;  %v2204_v7 = vsel %vm748_vm3, %v2077_v59, %v2068_v15  ;;  %v2104_v25 = vsel %vm611_vm2, %v2103_v18, %v2099_v54  ;;  %v10708_v2 = vld [vmem:[#allocation16_spill] sm:$0xff]  ;;  %v10711_v26 = vld [vmem:[#allocation79_spill] sm:$0xff] }
 0x3a7   : > { %v3583_v31 = vsel %vm611_vm2, %v3582_v50, %v3578_v60  ;;  %v2121_v30 = vrot.slane %v10705_v58, %v7368_v23  ;;  %v2189_v50 = vrot.slane %v10706_v61, %v7370_v19  ;;  %v2405_v60 = vrot.slane %v10707_v38, %v7370_v19  ;;  %v10710_v54 = vld [vmem:[#allocation80_spill] sm:$0xff] }
 0x3a8   : > { %v8918_v24 = vpop.permute.xlu1 %3465  ;;  %v3662_v17 = vsel %vm760_vm9, %v3583_v31, %v3661_v6  ;;  %v2409_v21 = vrot.slane %v10708_v2, %v7368_v23  ;;  %v2113_v5 = vsel %vm611_vm2, %v2112_v4, %v2108_v42  ;;  %v2148_v18 = vrot.slane %v10710_v54, %v7368_v23  ;;  %v10713_v4 = vld [vmem:[#allocation10_spill] sm:$0xff]  ;;  %v10714_v58 = vld [vmem:[#allocation12_spill] sm:$0xff]  ;;  %v8980_v2 = vpop.permute.xlu0 %3468 }
 0x3a9   : > { %4123 = vperm.xlu1 %6774, %v8264_v14   ;;  %6539 = vmatprep.mubr.msk.f32.mxu0 %vm777_vm10, %v3662_v17  ;;  %v2205_v14 = vsel %vm750_vm4, %v2086_v47, %v2204_v7  ;;  %v2122_v59 = vsel %vm611_vm2, %v2121_v30, %v2117_v51  ;;  %v2139_v31 = vrot.slane %v10711_v26, %v7368_v23  ;;  %v10716_v30 = vld [vmem:[#allocation18_spill] sm:$0xff]  ;;  %v10717_v7 = vld [vmem:[#allocation20_spill] sm:$0xff] }
 0x3aa   : > { %4132 = vperm.xlu0 %6773, %v6870_v45   ;;  %v2206_v29 = vsel %vm752_vm5, %v2095_v35, %v2205_v14  ;;  %v2157_v6 = vrot.slane %v10712_v11, %v7368_v23  ;;  %v2198_v47 = vrot.slane %v10713_v4, %v7370_v19  ;;  %v2396_v17 = vrot.slane %v10714_v58, %v7370_v19  ;;  %v10719_v54 = vld [vmem:[#allocation22_spill] sm:$0xff]  ;;  %v10722_v26 = vld [vmem:[#allocation84_spill] sm:$0xff] }
 0x3ab   : > { %v2207_v15 = vsel %vm754_vm6, %v2104_v25, %v2206_v29  ;;  %v2166_v61 = vrot.slane %v10715_v48, %v7368_v23  ;;  %v8974_v51 = vsel %vm611_vm2, %v2409_v21, %v2405_v60  ;;  %v2418_v35 = vrot.slane %v10716_v30, %v7368_v23  ;;  %v6871_v25 = vld [vmem:[%s10348_s6 + $0x68] sm:$0xff] }
 0x3ac   : > { %v8963_v42 = vpop.permute.xlu1 %3471  ;;  %v2427_v38 = vrot.slane %v10717_v7, %v7368_v23  ;;  %v2208_v45 = vsel %vm756_vm7, %v2113_v5, %v2207_v15  ;;  %v10718_v60 = vld [vmem:[#allocation83_spill] sm:$0xff]  ;;  %v2131_v14 = vsel %vm611_vm2, %v2130_v20, %v2126_v27  ;;  %v2436_v29 = vrot.slane %v10719_v54, %v7368_v23  ;;  %v10723_v20 = vld [vmem:[#allocation85_spill] sm:$0xff]  ;;  %v6758_v30 = vpop.permute.xlu0 %6757  ;;  %v10727_v54 = vld [vmem:[#allocation38_spill] sm:$0xff] }
 0x3ad   : > { %4129 = vperm.xlu1 %6774, %v8274_v57   ;;  %v2149_v57 = vsel %vm611_vm2, %v2148_v18, %v2144_v16  ;;  %v2175_v21 = vrot.slane %v10718_v60, %v7368_v23  ;;  %v2209_v37 = vsel %vm758_vm8, %v2122_v59, %v2208_v45  ;;  %v10720_v5 = vrot.slane %v10693_v63, %v7370_v19  ;;  %v10726_v45 = vld [vmem:[#allocation31_spill] sm:$0xff]  ;;  %v10738_v7 = vld [vmem:[#allocation44_spill] sm:$0xff] }
 0x3ae   : > { %4138 = vperm.xlu0 %6773, %v6871_v25   ;;  %v10721_v16 = vrot.slane %v10695_v56, %v7370_v19  ;;  %v2184_v49 = vrot.slane %v10722_v26, %v7368_v23  ;;  %v2167_v27 = vsel %vm611_vm2, %v2166_v61, %v2162_v55  ;;  %v2193_v59 = vrot.slane %v10723_v20, %v7368_v23  ;;  %v6872_v55 = vld [vmem:[%s10348_s6 + $0x78] sm:$0xff] }
 0x3af   : > { %v2140_v33 = vsel %vm611_vm2, %v2139_v31, %v10720_v5  ;;  %v10724_v31 = vld [vmem:[#allocation24_spill] sm:$0xff]  ;;  %v2210_v61 = vsel %vm760_vm9, %v2131_v14, %v2209_v37  ;;  %v2176_v25 = vsel %vm611_vm2, %v2175_v21, %v2171_v28  ;;  %v2463_v5 = vrot.slane %v10727_v54, %v7368_v23 }
 0x3b0   : > { %v2158_v18 = vsel %vm611_vm2, %v2157_v6, %v10721_v16  ;;  %v6753_v11 = vpop.permute.xlu1 %6752  ;;  %v2445_v15 = vrot.slane %v10724_v31, %v7368_v23  ;;  %v2211_v56 = vsel %vm748_vm3, %v2149_v57, %v2140_v33  ;;  %v10725_v6 = vld [vmem:[#allocation37_spill] sm:$0xff]  ;;  %v2400_v57 = vrot.slane %v10726_v45, %v7368_v23  ;;  %v10728_v16 = vld [vmem:[#allocation39_spill] sm:$0xff]  ;;  %v10729_v28 = vld [vmem:[#allocation88_spill] sm:$0xff] }
 0x3b1   : > { %4135 = vperm.xlu1 %6774, %v8292_v40   ;;  %v6755_v58 = vunpack.i.h.bf16 %v6753_v11  ;;  %v6754_v63 = vunpack.i.l.bf16 %v6753_v11  ;;  %v2454_v48 = vrot.slane %v10725_v6, %v7368_v23  ;;  %v2212_v40 = vsel %vm750_vm4, %v2158_v18, %v2211_v56  ;;  %v10737_v45 = vld [vmem:[#allocation42_spill] sm:$0xff] }
 0x3b2   : > { %4144 = vperm.xlu0 %6773, %v6872_v55   ;;  %v2213_v33 = vsel %vm752_vm5, %v2167_v27, %v2212_v40  ;;  %v2472_v26 = vrot.slane %v10728_v16, %v7368_v23  ;;  %v2185_v14 = vsel %vm611_vm2, %v2184_v49, %v2180_v46  ;;  %v2194_v39 = vsel %vm611_vm2, %v2193_v59, %v2189_v50  ;;  %v10730_v27 = vld [vmem:[#allocation86_spill] sm:$0xff]  ;;  %v6873_v46 = vld [vmem:[%s10348_s6 + $0x88] sm:$0xff]  ;;  %v10732_v50 = vld [vmem:[#allocation40_spill] sm:$0xff] }
 0x3b3   : > { %v6605_v60 = vpack.c.bf16 %v6755_v58, %v6754_v63  ;;  %v2414_v21 = vrot.slane %v10729_v28, %v7370_v19  ;;  %v6760_v37 = vunpack.i.h.bf16 %v6758_v30  ;;  %v6759_v18 = vunpack.i.l.bf16 %v6758_v30  ;;  %v10731_v58 = vld [vmem:[#allocation89_spill] sm:$0xff]  ;;  %v10733_v63 = vld [vmem:[#allocation91_spill] sm:$0xff]  ;;  %v10734_v30 = vld [vmem:[#allocation90_spill] sm:$0xff] }
 0x3b4   : > { %v2214_v11 = vsel %vm754_vm6, %v2176_v25, %v2213_v33  ;;  %v2202_v20 = vrot.slane %v10730_v27, %v7368_v23  ;;  %v2423_v44 = vrot.slane %v10731_v58, %v7370_v19  ;;  %v2481_v49 = vrot.slane %v10732_v50, %v7368_v23  ;;  %v10736_v40 = vld [vmem:[#allocation41_spill] sm:$0xff] }
 0x3b5   : > { %4141 = vperm.xlu1 %6774, %v8314_v8   ;;  %6606 = vmatprep.subr.bf16.mxu1 %v6605_v60  ;;  %v2215_v8 = vsel %vm756_vm7, %v2185_v14, %v2214_v11  ;;  %v2401_v59 = vsel %vm611_vm2, %v2400_v57, %v2396_v17  ;;  %v2432_v31 = vrot.slane %v10733_v63, %v7370_v19  ;;  %v6878_v16 = vld [vmem:[%s10348_s6 + $0xb8] sm:$0xff] }
 0x3b6   : > { %4150 = vperm.xlu0 %6773, %v6873_v46   ;;  %6608 = vmatpush3.bf16.msra.mxu1 %v6605_v60  ;;  %v2490_v25 = vrot.slane %v10736_v40, %v7368_v23  ;;  %v2499_v60 = vrot.slane %v10737_v45, %v7368_v23  ;;  %v2441_v17 = vrot.slane %v8566_v34, %v7370_v19 }
 0x3b7   : > { %v9056_v56 = vpop.permute.xlu0 %3474  ;;  %v9058_v6 = vpop.permute.xlu1 %3477  ;;  %6611 = vmatprep.subr.msk.bf16.mxu1 %vm7528_vm11, %v10734_v30  ;;  %v2216_v57 = vsel %vm758_vm8, %v2194_v39, %v2215_v8  ;;  %v2419_v33 = vsel %vm611_vm2, %v2418_v35, %v2414_v21  ;;  %v2450_v14 = vrot.slane %v8587_v1, %v7370_v19  ;;  %v6615_v28 = vpack.c.bf16 %v6760_v37, %v6759_v18  ;;  %v6875_v18 = vld [vmem:[%s10348_s6 + $0x90] sm:$0xff]  ;;  %v10740_v8 = vld [vmem:[#allocation27_spill] sm:$0xff] }
 0x3b8   : > { %v2203_v11 = vsel %vm611_vm2, %v2202_v20, %v2198_v47  ;;  %v2537_v34 = vsel %vm748_vm3, %v8974_v51, %v2401_v59  ;;  %v2428_v35 = vsel %vm611_vm2, %v2427_v38, %v2423_v44  ;;  %v2437_v1 = vsel %vm611_vm2, %v2436_v29, %v2432_v31 }
 0x3b9   : > { %4147 = vperm.xlu1 %6774, %v8329_v52   ;;  %6505 = vmatmul.mubr.msk.f32.vlgmr.msra.gmra.mrb[0].mxu1 %vm777_vm10, %v8821_v3  ;;  %v6874_v52 = vld [vmem:[%s10348_s6 + $0x98] sm:$0xff]  ;;  %v2459_v3 = vrot.slane %v8600_v53, %v7370_v19  ;;  %v2477_v4 = vrot.slane %v8616_v12, %v7370_v19  ;;  %v2508_v38 = vrot.slane %v10738_v7, %v7368_v23  ;;  %v6881_v7 = vld [vmem:[%s10348_s6 + $0xc0] sm:$0xff] }
 0x3ba   : > { %4156 = vperm.xlu0 %6773, %v6874_v52   ;;  %6614 = vmatpush3.bf16.msk.msra.mxu1 %vm7528_vm11, %v10734_v30  ;;  %v2538_v39 = vsel %vm750_vm4, %v2419_v33, %v2537_v34  ;;  %v2446_v29 = vsel %vm611_vm2, %v2445_v15, %v2441_v17  ;;  %v2486_v53 = vrot.slane %v8622_v10, %v7370_v19  ;;  %v10739_v15 = vld [vmem:[#allocation45_spill] sm:$0xff]  ;;  %v6877_v30 = vld [vmem:[%s10348_s6 + $0xa0] sm:$0xff] }
 0x3bb   : > { %6511 = vmatprep.mubr.msk.f32.mxu1 %vm777_vm10, %v2210_v61  ;;  %v9098_v47 = vpop.permute.xlu0 %3480  ;;  %v9100_v51 = vpop.permute.xlu1 %3483  ;;  %6616 = vmatprep.subr.bf16.mxu1 %v6615_v28  ;;  %v2539_v21 = vsel %vm752_vm5, %v2428_v35, %v2538_v39  ;;  %v2455_v12 = vsel %vm611_vm2, %v2454_v48, %v2450_v14  ;;  %v2468_v61 = vrot.slane %v8604_v62, %v7370_v19  ;;  %v6876_v62 = vld [vmem:[%s10348_s6 + $0xa8] sm:$0xff] }
 0x3bc   : > { %v2495_v37 = vrot.slane %v8640_v41, %v7370_v19  ;;  %v2517_v27 = vrot.slane %v10739_v15, %v7368_v23  ;;  %v2540_v10 = vsel %vm754_vm6, %v2437_v1, %v2539_v21  ;;  %v2504_v20 = vrot.slane %v8664_v22, %v7370_v19  ;;  %v6880_v35 = vld [vmem:[%s10348_s6 + $0xc8] sm:$0xff] }
 0x3bd   : > { %4153 = vperm.xlu1 %6774, %v6875_v18   ;;  %v2217_v41 = vsel %vm760_vm9, %v2203_v11, %v2216_v57  ;;  %v2482_v48 = vsel %vm611_vm2, %v2481_v49, %v2477_v4  ;;  %v2513_v58 = vrot.slane %v8677_v0, %v7370_v19  ;;  %v2464_v22 = vsel %vm611_vm2, %v2463_v5, %v2459_v3  ;;  %v6879_v11 = vld [vmem:[%s10348_s6 + $0xb0] sm:$0xff] }
 0x3be   : > { %4162 = vperm.xlu0 %6773, %v6876_v62   ;;  %v2541_v50 = vsel %vm756_vm7, %v2446_v29, %v2540_v10  ;;  %v2526_v59 = vrot.slane %v10740_v8, %v7368_v23  ;;  %v2491_v63 = vsel %vm611_vm2, %v2490_v25, %v2486_v53  ;;  %v2522_v49 = vrot.slane %v8681_v32, %v7370_v19  ;;  %v6885_v8 = vld [vmem:[%s10348_s6 + $0xe0] sm:$0xff] }
 0x3bf   : > { %v9129_v44 = vpop.permute.xlu0 %3486  ;;  %v9131_v46 = vpop.permute.xlu1 %3489  ;;  %v2542_v0 = vsel %vm758_vm8, %v2455_v12, %v2541_v50  ;;  %v2473_v31 = vsel %vm611_vm2, %v2472_v26, %v2468_v61  ;;  %v2500_v54 = vsel %vm611_vm2, %v2499_v60, %v2495_v37  ;;  %v2531_v5 = vrot.slane %v8687_v13, %v7370_v19  ;;  %v10741_v13 = vld [vmem:[#allocation68_spill] sm:$0xff] }
 0x3c0   : > { %v2544_v32 = vsel %vm748_vm3, %v2482_v48, %v2473_v31  ;;  %v2509_v55 = vsel %vm611_vm2, %v2508_v38, %v2504_v20  ;;  %v2543_v26 = vsel %vm760_vm9, %v2464_v22, %v2542_v0  ;;  %v2535_v40 = vrot.slane %v10741_v13, %v7368_v23  ;;  %v6882_v38 = vld [vmem:[%s10348_s6 + $0xd8] sm:$0xff] }
 0x3c1   : > { %4159 = vperm.xlu1 %6774, %v6877_v30   ;;  %6512 = vmatmul.mubr.msk.f32.vlgmr.msra.gmra.mrb[0].mxu1 %vm777_vm10, %v2217_v41  ;;  %v2545_v25 = vsel %vm750_vm4, %v2491_v63, %v2544_v32  ;;  %v2518_v45 = vsel %vm611_vm2, %v2517_v27, %v2513_v58  ;;  %v2527_v57 = vsel %vm611_vm2, %v2526_v59, %v2522_v49  ;;  %v6886_v49 = vld [vmem:[%s10348_s6 + $0xf8] sm:$0xff] }
 0x3c2   : > { %6618 = vmatpush3.bf16.msra.mxu1 %v6615_v28  ;;  %4168 = vperm.xlu0 %6773, %v6878_v16   ;;  %v2546_v17 = vsel %vm752_vm5, %v2500_v54, %v2545_v25  ;;  %v2536_v28 = vsel %vm611_vm2, %v2535_v40, %v2531_v5  ;;  %v3587_v39 = vrot.slane %v8918_v24, %v7370_v19  ;;  %v6883_v24 = vld [vmem:[%s10348_s6 + $0xd0] sm:$0xff]  ;;  %v10742_v25 = vmov 0  }
 0x3c3   : > { %6518 = vmatprep.mubr.msk.f32.mxu1 %vm777_vm10, %v2543_v26  ;;  %v3493_v60 = vpop.permute.xlu0 %3492  ;;  %v2547_v14 = vsel %vm754_vm6, %v2509_v55, %v2546_v17  ;;  %v3600_v29 = vrot.slane %v9056_v56, %v7368_v23  ;;  %v3609_v21 = vrot.slane %v9098_v47, %v7368_v23  ;;  %v3618_v12 = vrot.slane %v9129_v44, %v7368_v23 }
 0x3c4   : > { %v3496_v33 = vpop.permute.xlu1 %3495  ;;  %v2548_v34 = vsel %vm756_vm7, %v2518_v45, %v2547_v14  ;;  %v3591_v37 = vrot.slane %v8980_v2, %v7368_v23  ;;  %v3596_v18 = vrot.slane %v8963_v42, %v7370_v19  ;;  %v3605_v56 = vrot.slane %v9058_v6, %v7370_v19  ;;  %v6884_v2 = vld [vmem:[%s10348_s6 + $0xe8] sm:$0xff] }
 0x3c5   : > { %4165 = vperm.xlu1 %6774, %v6879_v11   ;;  %v2549_v1 = vsel %vm758_vm8, %v2527_v57, %v2548_v34  ;;  %v3614_v47 = vrot.slane %v9100_v51, %v7370_v19  ;;  %v3627_v15 = vrot.slane %v3493_v60, %v7368_v23  ;;  %v3623_v51 = vrot.slane %v9131_v46, %v7370_v19  ;;  %v2694_v11 = vld [vmem:[%s10349_s7] sm:$0xff] }
 0x3c6   : > { %4174 = vperm.xlu0 %6773, %v6880_v35   ;;  %v2550_v4 = vsel %vm760_vm9, %v2536_v28, %v2549_v1  ;;  %v3592_v42 = vsel %vm611_vm2, %v3591_v37, %v3587_v39  ;;  %v3601_v27 = vsel %vm611_vm2, %v3600_v29, %v3596_v18  ;;  %v3610_v62 = vsel %vm611_vm2, %v3609_v21, %v3605_v56  ;;  %v9261_v29 = vld [vmem:[%s10350_s8 + $0x18] sm:$0xff] }
 0x3c7   : > { %v3499_v52 = vpop.permute.xlu0 %3498  ;;  %v3619_v6 = vsel %vm611_vm2, %v3618_v12, %v3614_v47  ;;  %v3632_v58 = vrot.slane %v3496_v33, %v7370_v19  ;;  %v3663_v59 = vsel %vm748_vm3, %v3601_v27, %v3592_v42  ;;  %v3628_v63 = vsel %vm611_vm2, %v3627_v15, %v3623_v51  ;;  %v9277_v27 = vld [vmem:[%s10350_s8 + $0x28] sm:$0xff] }
 0x3c8   : > { %v3502_v3 = vpop.permute.xlu1 %3501  ;;  %v3636_v10 = vrot.slane %v3499_v52, %v7368_v23  ;;  %v3664_v0 = vsel %vm750_vm4, %v3610_v62, %v3663_v59  ;;  %v9250_v52 = vld [vmem:[%s10350_s8] sm:$0xff]  ;;  %v9293_v59 = vld [vmem:[%s10350_s8 + $0x38] sm:$0xff] }
 0x3c9   : > { %4171 = vperm.xlu1 %6774, %v6881_v7   ;;  %6519 = vmatmul.mubr.msk.f32.vlgmr.msra.gmra.mrb[0].mxu1 %vm777_vm10, %v2550_v4  ;;  %v3641_v46 = vrot.slane %v3502_v3, %v7370_v19  ;;  %v3665_v30 = vsel %vm752_vm5, %v3619_v6, %v3664_v0 }
 0x3ca   : > { %4180 = vperm.xlu0 %6773, %v6882_v38   ;;  %v3637_v31 = vsel %vm611_vm2, %v3636_v10, %v3632_v58  ;;  %v3666_v26 = vsel %vm754_vm6, %v3628_v63, %v3665_v30 }
 0x3cb   : > { %v3505_v53 = vpop.permute.xlu0 %3504  ;;  %v3667_v40 = vsel %vm756_vm7, %v3637_v31, %v3666_v26 }
 0x3cc   : > { %v3508_v61 = vpop.permute.xlu1 %3507  ;;  %v3645_v41 = vrot.slane %v3505_v53, %v7368_v23 }
 0x3cd   : > { %4177 = vperm.xlu1 %6774, %v6883_v24   ;;  %v3650_v54 = vrot.slane %v3508_v61, %v7370_v19 }
 0x3ce   : > { %4186 = vperm.xlu0 %6773, %v6884_v2   ;;  %v3646_v32 = vsel %vm611_vm2, %v3645_v41, %v3641_v46 }
 0x3cf   : > { %v3511_v20 = vpop.permute.xlu0 %3510  ;;  %v3668_v45 = vsel %vm758_vm8, %v3646_v32, %v3667_v40 }
 0x3d0   : > { %v6763_v48 = vpop.permute.xlu1 %6762  ;;  %v3654_v44 = vrot.slane %v3511_v20, %v7368_v23 }
 0x3d1   : > { %v6765_v22 = vunpack.i.h.bf16 %v6763_v48  ;;  %v6764_v50 = vunpack.i.l.bf16 %v6763_v48  ;;  %4183 = vperm.xlu1 %6774, %v6885_v8  }
 0x3d2   : > { %4192 = vperm.xlu0 %6773, %v6886_v49   ;;  %v3655_v13 = vsel %vm611_vm2, %v3654_v44, %v3650_v54 }
 0x3d3   : > { %v6629_v5 = vpack.c.bf16 %v6765_v22, %v6764_v50  ;;  %v3669_v57 = vsel %vm760_vm9, %v3655_v13, %v3668_v45  ;;  %v9313_v13 = vld [vmem:[%s10350_s8 + $0x58] sm:$0xff] }
 0x3d4   : > { %v3762_v55 = vpop.permute.xlu1 %3761  ;;  %v3759_v16 = vpop.permute.xlu0 %3758 }
 0x3d5   : > { %4189 = vperm.xlu1 %6774, %v8610_v36   ;;  %6630 = vmatprep.subr.bf16.mxu0 %v6629_v5  ;;  %v3860_v53 = vrot.slane %v3762_v55, %v7368_v23  ;;  %v3856_v21 = vrot.slane %v3759_v16, %v7370_v19  ;;  %v9306_v55 = vld [vmem:[%s10350_s8 + $0x48] sm:$0xff] }
 0x3d6   : > { %6632 = vmatpush3.bf16.msra.mxu0 %v6629_v5  ;;  %6780 = vset.pattern.permute.xlu0 %v10742_v25 }
 0x3d7   : > { %4441 = vperm.xlu0 %6780, %v2694_v11   ;;  %v3861_v10 = vsel %vm611_vm2, %v3860_v53, %v3856_v21 }
 0x3d8   : > { %v3765_v60 = vpop.permute.xlu1 %3764  ;;  %v3768_v17 = vpop.permute.xlu0 %3767 }
 0x3d9   : > { %6776 = vrot.lane.b32.xlu1 %v8235_v43, %s6912_s24  ;;  %6540 = vmatmul.mubr.msk.f32.vlgmr.msra.gmra.mrb[2].mxu0 %vm777_vm10, %v3669_v57  ;;  %v10743_v43 = vmov 1   ;;  %v3865_v1 = vrot.slane %v3765_v60, %v7370_v19  ;;  %v3869_v3 = vrot.slane %v3768_v17, %v7368_v23  ;;  %v9319_v60 = vld [vmem:[%s10350_s8 + $0x68] sm:$0xff] }
 0x3da   : > { %6781 = vset.pattern.permute.xlu1 %v10742_v25 }
 0x3db   : > { %6787 = vset.pattern.permute.xlu0 %v10743_v43  ;;  %v3870_v24 = vsel %vm611_vm2, %v3869_v3, %v3865_v1 }
 0x3dc   : > { %v3771_v36 = vpop.permute.xlu1 %3770  ;;  %v3774_v33 = vpop.permute.xlu0 %3773  ;;  %4532 = vperm.xlu0 %6787, %v9250_v52   ;;  %v3997_v51 = vsel %vm748_vm3, %v3870_v24, %v3861_v10 }
 0x3dd   : > { %v3874_v4 = vrot.slane %v3771_v36, %v7370_v19  ;;  %v3878_v7 = vrot.slane %v3774_v33, %v7368_v23  ;;  %v9325_v36 = vld [vmem:[%s10350_s8 + $0x78] sm:$0xff] }
 0x3df   : > { %v3879_v15 = vsel %vm611_vm2, %v3878_v7, %v3874_v4  ;;  %v9343_v4 = vld [vmem:[%s10350_s8 + $0xa8] sm:$0xff] }
 0x3e0   : > { %v3777_v14 = vpop.permute.xlu1 %3776  ;;  %v3780_v28 = vpop.permute.xlu0 %3779  ;;  %4541 = vperm.xlu0 %6787, %v9261_v29   ;;  %v3998_v48 = vsel %vm750_vm4, %v3879_v15, %v3997_v51 }
 0x3e1   : > { %v3883_v12 = vrot.slane %v3777_v14, %v7370_v19  ;;  %v3887_v61 = vrot.slane %v3780_v28, %v7368_v23  ;;  %v9331_v28 = vld [vmem:[%s10350_s8 + $0x88] sm:$0xff] }
 0x3e3   : > { %v3888_v20 = vsel %vm611_vm2, %v3887_v61, %v3883_v12 }
 0x3e4   : > { %v3783_v34 = vpop.permute.xlu1 %3782  ;;  %v3786_v35 = vpop.permute.xlu0 %3785  ;;  %4547 = vperm.xlu0 %6787, %v9277_v27   ;;  %v3999_v44 = vsel %vm752_vm5, %v3888_v20, %v3998_v48 }
 0x3e5   : > { %v3892_v37 = vrot.slane %v3783_v34, %v7370_v19  ;;  %v3896_v18 = vrot.slane %v3786_v35, %v7368_v23  ;;  %v9337_v35 = vld [vmem:[%s10350_s8 + $0x98] sm:$0xff] }
 0x3e7   : > { %v3897_v41 = vsel %vm611_vm2, %v3896_v18, %v3892_v37 }
 0x3e8   : > { %v3789_v38 = vpop.permute.xlu1 %3788  ;;  %v3792_v39 = vpop.permute.xlu0 %3791  ;;  %v4000_v63 = vsel %vm754_vm6, %v3897_v41, %v3999_v44  ;;  %4553 = vperm.xlu0 %6787, %v9293_v59  }
 0x3e9   : > { %v3901_v56 = vrot.slane %v3789_v38, %v7370_v19  ;;  %v3905_v47 = vrot.slane %v3792_v39, %v7368_v23 }
 0x3eb   : > { %v3906_v58 = vsel %vm611_vm2, %v3905_v47, %v3901_v56  ;;  %v9357_v56 = vld [vmem:[%s10350_s8 + $0xb8] sm:$0xff] }
 0x3ec   : > { %v3795_v2 = vpop.permute.xlu1 %3794  ;;  %v3798_v42 = vpop.permute.xlu0 %3797  ;;  %v4001_v0 = vsel %vm756_vm7, %v3906_v58, %v4000_v63  ;;  %4559 = vperm.xlu0 %6787, %v9306_v55   ;;  %v9373_v58 = vld [vmem:[%s10350_s8 + $0xc8] sm:$0xff] }
 0x3ed   : > { %v3910_v62 = vrot.slane %v3795_v2, %v7370_v19  ;;  %v3914_v6 = vrot.slane %v3798_v42, %v7368_v23 }
 0x3ef   : > { %v3915_v22 = vsel %vm611_vm2, %v3914_v6, %v3910_v62 }
 0x3f0   : > { %v3801_v50 = vpop.permute.xlu1 %3800  ;;  %v3804_v8 = vpop.permute.xlu0 %3803  ;;  %v4002_v54 = vsel %vm758_vm8, %v3915_v22, %v4001_v0  ;;  %4565 = vperm.xlu0 %6787, %v9313_v13  }
 0x3f1   : > { %v3919_v46 = vrot.slane %v3801_v50, %v7370_v19  ;;  %v3923_v49 = vrot.slane %v3804_v8, %v7368_v23 }
 0x3f3   : > { %v3924_v31 = vsel %vm611_vm2, %v3923_v49, %v3919_v46 }
 0x3f4   : > { %v3807_v5 = vpop.permute.xlu1 %3806  ;;  %v3810_v30 = vpop.permute.xlu0 %3809  ;;  %v4003_v32 = vsel %vm760_vm9, %v3924_v31, %v4002_v54  ;;  %4571 = vperm.xlu0 %6787, %v9319_v60  }
 0x3f5   : > { %6546 = vmatprep.mubr.msk.f32.mxu0 %vm777_vm10, %v4003_v32  ;;  %v3928_v7 = vrot.slane %v3807_v5, %v7370_v19  ;;  %v3932_v38 = vrot.slane %v3810_v30, %v7368_v23 }
 0x3f7   : > { %v3933_v2 = vsel %vm611_vm2, %v3932_v38, %v3928_v7  ;;  %v9405_v7 = vld [vmem:[%s10350_s8 + $0xf8] sm:$0xff] }
 0x3f8   : > { %v3813_v16 = vpop.permute.xlu1 %3812  ;;  %v3816_v26 = vpop.permute.xlu0 %3815  ;;  %4577 = vperm.xlu0 %6787, %v9325_v36  }
 0x3f9   : > { %v3937_v39 = vrot.slane %v3813_v16, %v7370_v19  ;;  %v3941_v53 = vrot.slane %v3816_v26, %v7368_v23  ;;  %v9387_v16 = vld [vmem:[%s10350_s8 + $0xd8] sm:$0xff] }
 0x3fb   : > { %v3942_v42 = vsel %vm611_vm2, %v3941_v53, %v3937_v39 }
 0x3fc   : > { %v3819_v40 = vpop.permute.xlu1 %3818  ;;  %v3822_v45 = vpop.permute.xlu0 %3821  ;;  %4583 = vperm.xlu0 %6787, %v9331_v28   ;;  %v4004_v46 = vsel %vm748_vm3, %v3942_v42, %v3933_v2 }
 0x3fd   : > { %v3946_v21 = vrot.slane %v3819_v40, %v7370_v19  ;;  %v3950_v12 = vrot.slane %v3822_v45, %v7368_v23 }
 0x3ff   : > { %v3951_v62 = vsel %vm611_vm2, %v3950_v12, %v3946_v21 }
 0x400   : > { %v3825_v17 = vpop.permute.xlu1 %3824  ;;  %v3828_v57 = vpop.permute.xlu0 %3827  ;;  %4589 = vperm.xlu0 %6787, %v9337_v35   ;;  %v4005_v0 = vsel %vm750_vm4, %v3951_v62, %v4004_v46 }
 0x401   : > { %v3955_v61 = vrot.slane %v3825_v17, %v7370_v19  ;;  %v3959_v37 = vrot.slane %v3828_v57, %v7368_v23 }
 0x403   : > { %v3960_v6 = vsel %vm611_vm2, %v3959_v37, %v3955_v61 }
 0x404   : > { %v3831_v33 = vpop.permute.xlu1 %3830  ;;  %v3834_v14 = vpop.permute.xlu0 %3833  ;;  %4595 = vperm.xlu0 %6787, %v9343_v4   ;;  %v4006_v5 = vsel %vm752_vm5, %v3960_v6, %v4005_v0 }
 0x405   : > { %v3964_v47 = vrot.slane %v3831_v33, %v7370_v19  ;;  %v3968_v15 = vrot.slane %v3834_v14, %v7368_v23 }
 0x407   : > { %v3969_v49 = vsel %vm611_vm2, %v3968_v15, %v3964_v47 }
 0x408   : > { %v3837_v11 = vpop.permute.xlu1 %3836  ;;  %v3840_v34 = vpop.permute.xlu0 %3839  ;;  %4601 = vperm.xlu0 %6787, %v9357_v56   ;;  %v4007_v26 = vsel %vm754_vm6, %v3969_v49, %v4006_v5 }
 0x409   : > { %v3973_v10 = vrot.slane %v3837_v11, %v7370_v19  ;;  %v3977_v20 = vrot.slane %v3840_v34, %v7368_v23  ;;  %v9399_v34 = vld [vmem:[%s10350_s8 + $0xe8] sm:$0xff] }
 0x40b   : > { %v3978_v31 = vsel %vm611_vm2, %v3977_v20, %v3973_v10 }
 0x40c   : > { %v3843_v1 = vpop.permute.xlu1 %3842  ;;  %v3846_v3 = vpop.permute.xlu0 %3845  ;;  %4607 = vperm.xlu0 %6787, %v9373_v58   ;;  %v4008_v17 = vsel %vm756_vm7, %v3978_v31, %v4007_v26  ;;  %v2695_v26 = vld [vmem:[%s10349_s7 + $0x8] sm:$0xff] }
 0x40d   : > { %v3982_v51 = vrot.slane %v3843_v1, %v7370_v19  ;;  %v3986_v41 = vrot.slane %v3846_v3, %v7368_v23  ;;  %4446 = vperm.xlu1 %6781, %v2695_v26  }
 0x40f   : > { %v3987_v30 = vsel %vm611_vm2, %v3986_v41, %v3982_v51 }
 0x410   : > { %v3849_v18 = vpop.permute.xlu1 %3848  ;;  %v3852_v24 = vpop.permute.xlu0 %3851  ;;  %v4009_v57 = vsel %vm758_vm8, %v3987_v30, %v4008_v17  ;;  %4613 = vperm.xlu0 %6787, %v9387_v16  }
 0x411   : > { %v3991_v44 = vrot.slane %v3849_v18, %v7370_v19  ;;  %v3995_v22 = vrot.slane %v3852_v24, %v7368_v23  ;;  %6788 = vset.pattern.permute.xlu1 %v10743_v43 }
 0x413   : > { %v3996_v40 = vsel %vm611_vm2, %v3995_v22, %v3991_v44 }
 0x414   : > { %v6770_v48 = vpop.permute.xlu1 %6769  ;;  %v4010_v14 = vsel %vm760_vm9, %v3996_v40, %v4009_v57  ;;  %4619 = vperm.xlu0 %6787, %v9399_v34  }
 0x415   : > { %v6772_v50 = vunpack.i.h.bf16 %v6770_v48  ;;  %v6771_v8 = vunpack.i.l.bf16 %v6770_v48  ;;  %v4100_v63 = vpop.permute.xlu0 %4099 }
 0x416   : > { %v4197_v47 = vrot.slane %v4100_v63, %v7370_v19 }
 0x417   : > { %v6633_v54 = vpack.c.bf16 %v6772_v50, %v6771_v8 }
 0x418   : > { %v4103_v32 = vpop.permute.xlu1 %4102  ;;  %4625 = vperm.xlu0 %6787, %v9405_v7  }
 0x419   : > { %6634 = vmatprep.subr.bf16.mxu0 %v6633_v54  ;;  %v4109_v45 = vpop.permute.xlu0 %4108  ;;  %v4201_v15 = vrot.slane %v4103_v32, %v7368_v23 }
 0x41a   : > { %6636 = vmatpush3.bf16.msra.mxu0 %v6633_v54  ;;  %v4210_v12 = vrot.slane %v4109_v45, %v7368_v23 }
 0x41b   : > { %v4202_v44 = vsel %vm611_vm2, %v4201_v15, %v4197_v47 }
 0x41c   : > { %v4106_v33 = vpop.permute.xlu1 %4105  ;;  %6794 = vset.pattern.permute.xlu0 %v10742_v25 }
 0x41d   : > { %6547 = vmatmul.mubr.msk.f32.vlgmr.msra.gmra.mrb[2].mxu0 %vm777_vm10, %v4010_v14  ;;  %v4115_v11 = vpop.permute.xlu0 %4114  ;;  %4873 = vperm.xlu0 %6794, %v9250_v52   ;;  %v4206_v61 = vrot.slane %v4106_v33, %v7370_v19 }
 0x41e   : > { %v4219_v37 = vrot.slane %v4115_v11, %v7368_v23 }
 0x41f   : > { %v4211_v20 = vsel %vm611_vm2, %v4210_v12, %v4206_v61 }
 0x420   : > { %v4112_v1 = vpop.permute.xlu1 %4111  ;;  %v4338_v46 = vsel %vm748_vm3, %v4211_v20, %v4202_v44 }
 0x421   : > { %v4121_v3 = vpop.permute.xlu0 %4120  ;;  %v4215_v18 = vrot.slane %v4112_v1, %v7370_v19  ;;  %4882 = vperm.xlu0 %6794, %v9261_v29  }
 0x422   : > { %v4228_v62 = vrot.slane %v4121_v3, %v7368_v23 }
 0x423   : > { %v4220_v51 = vsel %vm611_vm2, %v4219_v37, %v4215_v18 }
 0x424   : > { %v4118_v38 = vpop.permute.xlu1 %4117  ;;  %v4339_v31 = vsel %vm750_vm4, %v4220_v51, %v4338_v46 }
 0x425   : > { %v4127_v39 = vpop.permute.xlu0 %4126  ;;  %v4224_v2 = vrot.slane %v4118_v38, %v7370_v19  ;;  %4888 = vperm.xlu0 %6794, %v9277_v27  }
 0x426   : > { %v4237_v41 = vrot.slane %v4127_v39, %v7368_v23 }
 0x427   : > { %v4229_v22 = vsel %vm611_vm2, %v4228_v62, %v4224_v2 }
 0x428   : > { %v4124_v53 = vpop.permute.xlu1 %4123  ;;  %v4340_v5 = vsel %vm752_vm5, %v4229_v22, %v4339_v31 }
 0x429   : > { %v4133_v21 = vpop.permute.xlu0 %4132  ;;  %v4233_v10 = vrot.slane %v4124_v53, %v7370_v19  ;;  %4894 = vperm.xlu0 %6794, %v9293_v59  }
 0x42a   : > { %v4246_v50 = vrot.slane %v4133_v21, %v7368_v23 }
 0x42b   : > { %v4238_v49 = vsel %vm611_vm2, %v4237_v41, %v4233_v10 }
 0x42c   : > { %v4130_v24 = vpop.permute.xlu1 %4129  ;;  %v4341_v40 = vsel %vm754_vm6, %v4238_v49, %v4340_v5 }
 0x42d   : > { %v4139_v42 = vpop.permute.xlu0 %4138  ;;  %v4242_v6 = vrot.slane %v4130_v24, %v7370_v19  ;;  %4900 = vperm.xlu0 %6794, %v9306_v55  }
 0x42e   : > { %v4255_v0 = vrot.slane %v4139_v42, %v7368_v23 }
 0x42f   : > { %v4247_v54 = vsel %vm611_vm2, %v4246_v50, %v4242_v6 }
 0x430   : > { %v4136_v48 = vpop.permute.xlu1 %4135  ;;  %v4342_v33 = vsel %vm756_vm7, %v4247_v54, %v4341_v40 }
 0x431   : > { %v4251_v8 = vrot.slane %v4136_v48, %v7370_v19  ;;  %v4145_v63 = vpop.permute.xlu0 %4144  ;;  %4906 = vperm.xlu0 %6794, %v9313_v13  }
 0x432   : > { %v4264_v45 = vrot.slane %v4145_v63, %v7368_v23 }
 0x433   : > { %v4256_v30 = vsel %vm611_vm2, %v4255_v0, %v4251_v8 }
 0x434   : > { %v4142_v32 = vpop.permute.xlu1 %4141  ;;  %v4343_v11 = vsel %vm758_vm8, %v4256_v30, %v4342_v33 }
 0x435   : > { %v4260_v17 = vrot.slane %v4142_v32, %v7370_v19  ;;  %v4151_v57 = vpop.permute.xlu0 %4150  ;;  %4912 = vperm.xlu0 %6794, %v9319_v60  }
 0x436   : > { %v4273_v6 = vrot.slane %v4151_v57, %v7368_v23 }
 0x437   : > { %v4265_v14 = vsel %vm611_vm2, %v4264_v45, %v4260_v17 }
 0x438   : > { %v4148_v1 = vpop.permute.xlu1 %4147  ;;  %v4344_v3 = vsel %vm760_vm9, %v4265_v14, %v4343_v11 }
 0x439   : > { %6553 = vmatprep.mubr.msk.f32.mxu0 %vm777_vm10, %v4344_v3  ;;  %v4157_v38 = vpop.permute.xlu0 %4156  ;;  %4918 = vperm.xlu0 %6794, %v9325_v36   ;;  %v4269_v2 = vrot.slane %v4148_v1, %v7370_v19 }
 0x43a   : > { %v4282_v51 = vrot.slane %v4157_v38, %v7368_v23 }
 0x43b   : > { %v4274_v22 = vsel %vm611_vm2, %v4273_v6, %v4269_v2  ;;  %v9525_v2 = vld [vmem:[%s10350_s8 + $0x50] sm:$0xff]  ;;  %v9547_v6 = vld [vmem:[%s10350_s8 + $0x80] sm:$0xff] }
 0x43c   : > { %v4154_v39 = vpop.permute.xlu1 %4153 }
 0x43d   : > { %v4163_v53 = vpop.permute.xlu0 %4162  ;;  %4924 = vperm.xlu0 %6794, %v9331_v28   ;;  %v4278_v42 = vrot.slane %v4154_v39, %v7370_v19 }
 0x43e   : > { %v4291_v41 = vrot.slane %v4163_v53, %v7368_v23 }
 0x43f   : > { %v4283_v50 = vsel %vm611_vm2, %v4282_v51, %v4278_v42  ;;  %v9531_v42 = vld [vmem:[%s10350_s8 + $0x60] sm:$0xff]  ;;  %v9553_v51 = vld [vmem:[%s10350_s8 + $0x90] sm:$0xff] }
 0x440   : > { %v4160_v21 = vpop.permute.xlu1 %4159  ;;  %v4345_v40 = vsel %vm748_vm3, %v4283_v50, %v4274_v22  ;;  %v9569_v22 = vld [vmem:[%s10350_s8 + $0xb0] sm:$0xff]  ;;  %v9575_v50 = vld [vmem:[%s10350_s8 + $0xc0] sm:$0xff] }
 0x441   : > { %v4169_v12 = vpop.permute.xlu0 %4168  ;;  %4930 = vperm.xlu0 %6794, %v9337_v35   ;;  %v4287_v10 = vrot.slane %v4160_v21, %v7370_v19 }
 0x442   : > { %v4300_v48 = vrot.slane %v4169_v12, %v7368_v23 }
 0x443   : > { %v4292_v63 = vsel %vm611_vm2, %v4291_v41, %v4287_v10 }
 0x444   : > { %v4166_v61 = vpop.permute.xlu1 %4165  ;;  %v4346_v57 = vsel %vm750_vm4, %v4292_v63, %v4345_v40  ;;  %v9583_v63 = vld [vmem:[%s10350_s8 + $0xd0] sm:$0xff] }
 0x445   : > { %v4175_v37 = vpop.permute.xlu0 %4174  ;;  %4936 = vperm.xlu0 %6794, %v9343_v4   ;;  %v4296_v20 = vrot.slane %v4166_v61, %v7370_v19  ;;  %v9496_v61 = vld [vmem:[%s10350_s8 + $0x8] sm:$0xff]  ;;  %v9599_v40 = vld [vmem:[%s10350_s8 + $0xf0] sm:$0xff] }
 0x446   : > { %v4309_v49 = vrot.slane %v4175_v37, %v7368_v23  ;;  %v10744_v37 = vmov 2  }
 0x447   : > { %v4301_v46 = vsel %vm611_vm2, %v4300_v48, %v4296_v20  ;;  %v9539_v20 = vld [vmem:[%s10350_s8 + $0x70] sm:$0xff]  ;;  %v9561_v48 = vld [vmem:[%s10350_s8 + $0xa0] sm:$0xff] }
 0x448   : > { %v4172_v18 = vpop.permute.xlu1 %4171  ;;  %v4347_v1 = vsel %vm752_vm5, %v4301_v46, %v4346_v57 }
 0x449   : > { %v4181_v24 = vpop.permute.xlu0 %4180  ;;  %4942 = vperm.xlu0 %6794, %v9357_v56   ;;  %v4305_v44 = vrot.slane %v4172_v18, %v7370_v19  ;;  %v9503_v18 = vld [vmem:[%s10350_s8 + $0x20] sm:$0xff] }
 0x44a   : > { %v4318_v5 = vrot.slane %v4181_v24, %v7368_v23  ;;  %10745 = vst [vmem:[#allocation11_spill] sm:$0xff] %v9503_v18  ;;  %v9509_v24 = vld [vmem:[%s10350_s8 + $0x30] sm:$0xff] }
 0x44b   : > { %v4310_v45 = vsel %vm611_vm2, %v4309_v49, %v4305_v44  ;;  %10746 = vst [vmem:[#allocation15_spill] sm:$0xff] %v9509_v24  ;;  %v9591_v49 = vld [vmem:[%s10350_s8 + $0xe0] sm:$0xff] }
 0x44c   : > { %v4178_v47 = vpop.permute.xlu1 %4177  ;;  %v4348_v38 = vsel %vm754_vm6, %v4310_v45, %v4347_v1 }
 0x44d   : > { %v4187_v15 = vpop.permute.xlu0 %4186  ;;  %v4314_v8 = vrot.slane %v4178_v47, %v7370_v19  ;;  %4948 = vperm.xlu0 %6794, %v9373_v58  }
 0x44e   : > { %v4327_v17 = vrot.slane %v4187_v15, %v7368_v23 }
 0x44f   : > { %v4319_v33 = vsel %vm611_vm2, %v4318_v5, %v4314_v8 }
 0x450   : > { %v4184_v43 = vpop.permute.xlu1 %4183  ;;  %v4349_v53 = vsel %vm756_vm7, %v4319_v33, %v4348_v38 }
 0x451   : > { %v4323_v0 = vrot.slane %v4184_v43, %v7370_v19  ;;  %v4193_v31 = vpop.permute.xlu0 %4192  ;;  %4954 = vperm.xlu0 %6794, %v9387_v16   ;;  %v9517_v43 = vld [vmem:[%s10350_s8 + $0x40] sm:$0xff] }
 0x452   : > { %v4336_v14 = vrot.slane %v4193_v31, %v7368_v23  ;;  %v10747_v31 = vld [vmem:[#allocation87_spill] sm:$0xff] }
 0x453   : > { %v4328_v3 = vsel %vm611_vm2, %v4327_v17, %v4323_v0 }
 0x454   : > { %v4190_v62 = vpop.permute.xlu1 %4189  ;;  %v4350_v21 = vsel %vm758_vm8, %v4328_v3, %v4349_v53 }
 0x455   : > { %v4332_v30 = vrot.slane %v4190_v62, %v7370_v19  ;;  %4960 = vperm.xlu0 %6794, %v9399_v34  }
 0x456   : > { %v9511_v47 = vpop.permute.xlu0 %4441 }
 0x457   : > { %v4337_v39 = vsel %vm611_vm2, %v4336_v14, %v4332_v30  ;;  %v10748_v30 = vld [vmem:[#allocation69_spill] sm:$0xff] }
 0x458   : > { %v6777_v54 = vpop.permute.xlu1 %6776  ;;  %v4351_v12 = vsel %vm760_vm9, %v4337_v39, %v4350_v21 }
 0x459   : > { %v6779_v32 = vunpack.i.h.bf16 %v6777_v54  ;;  %v6778_v26 = vunpack.i.l.bf16 %v6777_v54  ;;  %4966 = vperm.xlu0 %6794, %v9405_v7  }
 0x45b   : > { %v6637_v11 = vpack.c.bf16 %v6779_v32, %v6778_v26  ;;  %v9519_v15 = vpop.permute.xlu0 %4532 }
 0x45d   : > { %6638 = vmatprep.subr.bf16.mxu0 %v6637_v11  ;;  %6797 = vset.pattern.permute.xlu0 %v10744_v37 }
 0x45e   : > { %6640 = vmatpush3.bf16.msra.mxu0 %v6637_v11  ;;  %5209 = vperm.xlu0 %6797, %v9496_v61   ;;  %v10749_v11 = vmov 3  }
 0x45f   : > { %v9533_v10 = vpop.permute.xlu0 %4541 }
 0x461   : > { %6554 = vmatmul.mubr.msk.f32.vlgmr.msra.gmra.mrb[2].mxu0 %vm777_vm10, %v4351_v12 }
 0x462   : > { %5218 = vperm.xlu0 %6797, %v9503_v18  }
 0x463   : > { %v9541_v62 = vpop.permute.xlu0 %4547 }
 0x466   : > { %5224 = vperm.xlu0 %6797, %v9509_v24  }
 0x467   : > { %v9555_v41 = vpop.permute.xlu0 %4553 }
 0x46a   : > { %5230 = vperm.xlu0 %6797, %v9517_v43  }
 0x46b   : > { %v9563_v44 = vpop.permute.xlu0 %4559 }
 0x46e   : > { %5236 = vperm.xlu0 %6797, %v9525_v2  }
 0x46f   : > { %v9577_v8 = vpop.permute.xlu0 %4565 }
 0x472   : > { %5242 = vperm.xlu0 %6797, %v9531_v42  }
 0x473   : > { %v9585_v46 = vpop.permute.xlu0 %4571 }
 0x476   : > { %5248 = vperm.xlu0 %6797, %v9539_v20  }
 0x477   : > { %v9601_v17 = vpop.permute.xlu0 %4577 }
 0x47a   : > { %5254 = vperm.xlu0 %6797, %v9547_v6  }
 0x47b   : > { %v9604_v14 = vpop.permute.xlu0 %4583 }
 0x47e   : > { %5260 = vperm.xlu0 %6797, %v9553_v51  }
 0x47f   : > { %v9609_v1 = vpop.permute.xlu0 %4589 }
 0x482   : > { %5266 = vperm.xlu0 %6797, %v9561_v48  }
 0x483   : > { %v9612_v21 = vpop.permute.xlu0 %4595 }
 0x486   : > { %5272 = vperm.xlu0 %6797, %v9569_v22  }
 0x487   : > { %v9620_v12 = vpop.permute.xlu0 %4601 }
 0x48a   : > { %5278 = vperm.xlu0 %6797, %v9575_v50  }
 0x48e   : > { %5284 = vperm.xlu0 %6797, %v9583_v63  }
 0x492   : > { %5290 = vperm.xlu0 %6797, %v9591_v49  }
 0x496   : > { %5296 = vperm.xlu0 %6797, %v9599_v40  }
 0x49a   : > { %6798 = vset.pattern.permute.xlu0 %v10749_v11 }
 0x49b   : > { %5547 = vperm.xlu0 %6798, %v9250_v52  }
 0x49c   : > { %v6520_v0 = vpop.f32.mrb[0].mxu1 }
 0x49d   : > { %v2649_v54 = vadd.f32 %v6520_v0, %v10747_v31  ;;  %v2627_v5 = vpop.f32.mrb[1].mxu1 }
 0x49e   : > { %v2648_v32 = vadd.f32 %v10748_v30, %v2627_v5 }
 0x49f   : > { %v2651_v26 = vsub.f32 0.0, %v2649_v54  ;;  %5556 = vperm.xlu0 %6798, %v9261_v29   ;;  %v9625_v54 = vpop.permute.xlu0 %4607 }
 0x4a0   : > { %v2650_v45 = vsub.f32 0.0, %v2648_v32 }
 0x4a1   : > { %v2654_v57 = vmul.f32 1.442695, %v2651_v26 }
 0x4a2   : > { %v2652_v33 = vmul.f32 1.442695, %v2650_v45 }
 0x4a3   : > { %6819 = vpow2.f32 %v2654_v57  ;;  %5562 = vperm.xlu0 %6798, %v9277_v27   ;;  %v9629_v5 = vpop.permute.xlu0 %4613 }
 0x4a4   : > { %6821 = vpow2.f32 %v2652_v33  ;;  %v10753_v33 = vmov 4  }
 0x4a7   : > { %5598 = vperm.xlu0 %6798, %v9331_v28   ;;  %v9632_v30 = vpop.permute.xlu0 %4619 }
 0x4ab   : > { %5604 = vperm.xlu0 %6798, %v9337_v35   ;;  %v9636_v32 = vpop.permute.xlu0 %4625 }
 0x4ad   : > { %v6820_v3 = vpop.eup %6819 }
 0x4ae   : > { %v6822_v38 = vpop.eup %6821  ;;  %v2657_v39 = vadd.f32 1.0, %v6820_v3 }
 0x4af   : > { %v2656_v53 = vadd.f32 1.0, %v6822_v38  ;;  %5568 = vperm.xlu0 %6798, %v9293_v59   ;;  %v9639_v26 = vpop.permute.xlu0 %4873 }
 0x4b0   : > { %6823 = vrcp.f32 %v2657_v39  ;;  %10750 = vst [vmem:[#allocation9_spill] sm:$0xff] %v9639_v26 }
 0x4b1   : > { %6825 = vrcp.f32 %v2656_v53 }
 0x4b3   : > { %5610 = vperm.xlu0 %6798, %v9343_v4   ;;  %v9643_v45 = vpop.permute.xlu0 %4882 }
 0x4b4   : > { %10751 = vst [vmem:[#allocation56_spill] sm:$0xff] %v9643_v45 }
 0x4b7   : > { %5574 = vperm.xlu0 %6798, %v9306_v55   ;;  %v9646_v57 = vpop.permute.xlu0 %4888 }
 0x4b8   : > { %10752 = vst [vmem:[#allocation57_spill] sm:$0xff] %v9646_v57 }
 0x4ba   : > { %v6824_v0 = vpop.eup %6823 }
 0x4bb   : > { %v6826_v31 = vpop.eup %6825  ;;  %6253 = vst.msk [vmem:[%s414_s19 + $0x8] sm:$0xff] %vm777_vm10, %v6824_v0  ;;  %5616 = vperm.xlu0 %6798, %v9357_v56   ;;  %v9650_v3 = vpop.permute.xlu0 %4894 }
 0x4bc   : > { %6252 = vst.msk [vmem:[%s414_s19] sm:$0xff] %vm777_vm10, %v6826_v31  ;;  %10754 = vst [vmem:[#allocation58_spill] sm:$0xff] %v9650_v3 }
 0x4bf   : > { %5577 = vperm.xlu0 %6798, %v9525_v2   ;;  %v9654_v38 = vpop.permute.xlu0 %4900 }
 0x4c0   : > { %10755 = vst [vmem:[#allocation59_spill] sm:$0xff] %v9654_v38 }
 0x4c3   : > { %5619 = vperm.xlu0 %6798, %v9575_v50   ;;  %v9657_v39 = vpop.permute.xlu0 %4906 }
 0x4c4   : > { %10756 = vst [vmem:[#allocation60_spill] sm:$0xff] %v9657_v39 }
 0x4c7   : > { %5583 = vperm.xlu0 %6798, %v9531_v42   ;;  %v9661_v53 = vpop.permute.xlu0 %4912 }
 0x4c8   : > { %10757 = vst [vmem:[#allocation28_spill] sm:$0xff] %v9661_v53 }
 0x4cb   : > { %5625 = vperm.xlu0 %6798, %v9583_v63   ;;  %v9664_v0 = vpop.permute.xlu0 %4918 }
 0x4cc   : > { %10758 = vst [vmem:[#allocation55_spill] sm:$0xff] %v9664_v0 }
 0x4cf   : > { %5589 = vperm.xlu0 %6798, %v9539_v20   ;;  %v9668_v31 = vpop.permute.xlu0 %4924 }
 0x4d0   : > { %10759 = vst [vmem:[#allocation75_spill] sm:$0xff] %v9668_v31 }
 0x4d3   : > { %5631 = vperm.xlu0 %6798, %v9591_v49  }
 0x4d7   : > { %5637 = vperm.xlu0 %6798, %v9599_v40  }
 0x4db   : > { %6805 = vset.pattern.permute.xlu0 %v10753_v33  ;;  %v9671_v33 = vpop.permute.xlu0 %4930 }
 0x4dc   : > { %5888 = vperm.xlu0 %6805, %v9250_v52   ;;  %10760 = vst [vmem:[#allocation46_spill] sm:$0xff] %v9671_v33  ;;  %v4447_v33 = vpop.permute.xlu1 %4446 }
 0x4df   : > { %v9675_v39 = vpop.permute.xlu0 %4936 }
 0x4e0   : > { %5897 = vperm.xlu0 %6805, %v9261_v29   ;;  %10761 = vst [vmem:[#allocation33_spill] sm:$0xff] %v9675_v39 }
 0x4e3   : > { %v9678_v53 = vpop.permute.xlu0 %4942 }
 0x4e4   : > { %5903 = vperm.xlu0 %6805, %v9277_v27   ;;  %10762 = vst [vmem:[#allocation35_spill] sm:$0xff] %v9678_v53 }
 0x4e7   : > { %v9682_v0 = vpop.permute.xlu0 %4948 }
 0x4e8   : > { %5939 = vperm.xlu0 %6805, %v9331_v28   ;;  %10763 = vst [vmem:[#allocation65_spill] sm:$0xff] %v9682_v0 }
 0x4eb   : > { %v9685_v31 = vpop.permute.xlu0 %4954 }
 0x4ec   : > { %5945 = vperm.xlu0 %6805, %v9337_v35   ;;  %10764 = vst [vmem:[#allocation67_spill] sm:$0xff] %v9685_v31  ;;  %v9695_v31 = vld [vmem:[%s10350_s8 + $0x10] sm:$0xff] }
 0x4ef   : > { %v9721_v0 = vpop.permute.xlu0 %4960 }
 0x4f0   : > { %5909 = vperm.xlu0 %6805, %v9293_v59   ;;  %10766 = vst [vmem:[#allocation17_spill] sm:$0xff] %v9721_v0 }
 0x4f4   : > { %5951 = vperm.xlu0 %6805, %v9343_v4  }
 0x4f8   : > { %5915 = vperm.xlu0 %6805, %v9306_v55  }
 0x4fc   : > { %5957 = vperm.xlu0 %6805, %v9357_v56  }
 0x500   : > { %5918 = vperm.xlu0 %6805, %v9525_v2  }
 0x504   : > { %5960 = vperm.xlu0 %6805, %v9575_v50  }
 0x508   : > { %5924 = vperm.xlu0 %6805, %v9531_v42  }
 0x50c   : > { %5966 = vperm.xlu0 %6805, %v9583_v63  }
 0x510   : > { %5930 = vperm.xlu0 %6805, %v9539_v20  }
 0x514   : > { %5972 = vperm.xlu0 %6805, %v9591_v49  }
 0x518   : > { %5978 = vperm.xlu0 %6805, %v9599_v40  }
 0x51c   : > { %6818 = vset.pattern.permute.xlu0 %v10742_v25 }
 0x534   : > { %v6555_v39 = vpop.f32.mrb[2].mxu0 }
 0x535   : > { %v4450_v38 = vadd.f32 %v6555_v39, %v4447_v33  ;;  %v4428_v3 = vpop.f32.mrb[3].mxu0 }
 0x536   : > { %v4449_v53 = vadd.f32 %v9511_v47, %v4428_v3 }
 0x537   : > { %v4452_v26 = vmax.f32 %v4450_v38, 0.0 }
 0x538   : > { %v4451_v57 = vmax.f32 %v4449_v53, 0.0 }
 0x53a   : > { %v6782_v45 = vpack.i.bf16 %v4452_v26, %v4451_v57 }
 0x53c   : > { %6783 = vrot.lane.b32.xlu1 %v6782_v45, %s6908_s12 }
 0x540   : > { %4535 = vperm.xlu1 %6788, %v9496_v61  }
 0x544   : > { %4538 = vperm.xlu1 %6788, %v9695_v31  }
 0x548   : > { %4544 = vperm.xlu1 %6788, %v9503_v18  }
 0x54c   : > { %4550 = vperm.xlu1 %6788, %v9509_v24  }
 0x550   : > { %4556 = vperm.xlu1 %6788, %v9517_v43  }
 0x554   : > { %4562 = vperm.xlu1 %6788, %v9525_v2  }
 0x558   : > { %4568 = vperm.xlu1 %6788, %v9531_v42  }
 0x55c   : > { %4574 = vperm.xlu1 %6788, %v9539_v20  }
 0x560   : > { %4580 = vperm.xlu1 %6788, %v9547_v6  }
 0x564   : > { %4586 = vperm.xlu1 %6788, %v9553_v51  }
 0x568   : > { %4592 = vperm.xlu1 %6788, %v9561_v48  }
 0x56c   : > { %4598 = vperm.xlu1 %6788, %v9569_v22  }
 0x570   : > { %4604 = vperm.xlu1 %6788, %v9575_v50  }
 0x574   : > { %4610 = vperm.xlu1 %6788, %v9583_v63  }
 0x578   : > { %4616 = vperm.xlu1 %6788, %v9591_v49  }
 0x57c   : > { %4622 = vperm.xlu1 %6788, %v9599_v40  }
 0x580   : > { %6795 = vset.pattern.permute.xlu1 %v10742_v25  ;;  %v4652_v25 = vrot.slane %v9541_v62, %v7368_v23  ;;  %v4670_v62 = vrot.slane %v9563_v44, %v7368_v23 }
 0x5ae   : > { %v6784_v47 = vpop.permute.xlu1 %6783 }
 0x5af   : > { %v6786_v26 = vunpack.i.h.bf16 %v6784_v47  ;;  %v6785_v45 = vunpack.i.l.bf16 %v6784_v47 }
 0x5b1   : > { %v4496_v57 = vsel %vm2704_vm12, 0.0, %v6786_v26  ;;  %v4495_v33 = vsel %vm2704_vm12, 0.0, %v6785_v45  ;;  %v4630_v45 = vrot.slane %v9519_v15, %v7370_v19 }
 0x5b2   : > { %v4498_v3 = vsel %vm2707_vm13, %v4496_v57, 0.0  ;;  %v4497_v38 = vsel %vm2707_vm13, %v4495_v33, 0.0  ;;  %v9717_v39 = vpack.c.bf16 %v4496_v57, %v4495_v33  ;;  %v4643_v57 = vrot.slane %v9533_v10, %v7368_v23 }
 0x5b3   : > { %v9719_v53 = vpack.i.bf16 %v4498_v3, %v4497_v38  ;;  %v4661_v10 = vrot.slane %v9555_v41, %v7368_v23  ;;  %v4679_v41 = vrot.slane %v9577_v8, %v7368_v23 }
 0x5b5   : > { %10765 = vst [vmem:[#allocation3_spill] sm:$0xff] %v9719_v53  ;;  %6813 = vrot.lane.b32.xlu0 %v9719_v53, %s6912_s24  ;;  %6790 = vrot.lane.b32.xlu1 %v9719_v53, %s6906_s15  ;;  %s419_s24 = scalar_lea.vmem %s10353_s11, %s6994_s23 }
 0x5b9   : > { %4876 = vperm.xlu1 %6795, %v9496_v61  }
 0x5bd   : > { %4879 = vperm.xlu1 %6795, %v9695_v31  }
 0x5bf   : > { %v4536_v47 = vpop.permute.xlu1 %4535 }
 0x5c0   : > { %v4634_v33 = vrot.slane %v4536_v47, %v7368_v23 }
 0x5c1   : > { %4885 = vperm.xlu1 %6795, %v9503_v18  }
 0x5c2   : > { %v4635_v53 = vsel %vm611_vm2, %v4634_v33, %v4630_v45 }
 0x5c3   : > { %v4539_v26 = vpop.permute.xlu1 %4538 }
 0x5c4   : > { %v4639_v3 = vrot.slane %v4539_v26, %v7370_v19 }
 0x5c5   : > { %4891 = vperm.xlu1 %6795, %v9509_v24  }
 0x5c6   : > { %v4644_v24 = vsel %vm611_vm2, %v4643_v57, %v4639_v3 }
 0x5c7   : > { %v4545_v38 = vpop.permute.xlu1 %4544  ;;  %v4771_v26 = vsel %vm748_vm3, %v4644_v24, %v4635_v53 }
 0x5c8   : > { %v4648_v0 = vrot.slane %v4545_v38, %v7370_v19 }
 0x5c9   : > { %4897 = vperm.xlu1 %6795, %v9517_v43  }
 0x5ca   : > { %v4653_v18 = vsel %vm611_vm2, %v4652_v25, %v4648_v0 }
 0x5cb   : > { %v4551_v15 = vpop.permute.xlu1 %4550  ;;  %v4772_v45 = vsel %vm750_vm4, %v4653_v18, %v4771_v26  ;;  %v4688_v18 = vrot.slane %v9585_v46, %v7368_v23 }
 0x5cc   : > { %v4657_v47 = vrot.slane %v4551_v15, %v7370_v19  ;;  %v4697_v15 = vrot.slane %v9601_v17, %v7368_v23 }
 0x5cd   : > { %4903 = vperm.xlu1 %6795, %v9525_v2  }
 0x5ce   : > { %v4662_v57 = vsel %vm611_vm2, %v4661_v10, %v4657_v47 }
 0x5cf   : > { %v4557_v38 = vpop.permute.xlu1 %4556  ;;  %v4773_v24 = vsel %vm752_vm5, %v4662_v57, %v4772_v45  ;;  %v9787_v45 = vpop.permute.xlu0 %4966 }
 0x5d0   : > { %v4666_v33 = vrot.slane %v4557_v38, %v7370_v19 }
 0x5d1   : > { %4909 = vperm.xlu1 %6795, %v9531_v42  }
 0x5d2   : > { %v4671_v25 = vsel %vm611_vm2, %v4670_v62, %v4666_v33 }
 0x5d3   : > { %v4563_v2 = vpop.permute.xlu1 %4562  ;;  %v4774_v44 = vsel %vm754_vm6, %v4671_v25, %v4773_v24 }
 0x5d4   : > { %v4675_v0 = vrot.slane %v4563_v2, %v7370_v19  ;;  %v4742_v2 = vrot.slane %v9625_v54, %v7368_v23 }
 0x5d5   : > { %4915 = vperm.xlu1 %6795, %v9539_v20  }
 0x5d6   : > { %v4680_v53 = vsel %vm611_vm2, %v4679_v41, %v4675_v0 }
 0x5d7   : > { %v4569_v42 = vpop.permute.xlu1 %4568  ;;  %v4775_v8 = vsel %vm756_vm7, %v4680_v53, %v4774_v44  ;;  %v4751_v53 = vrot.slane %v9629_v5, %v7368_v23 }
 0x5d8   : > { %v4684_v3 = vrot.slane %v4569_v42, %v7370_v19 }
 0x5d9   : > { %4921 = vperm.xlu1 %6795, %v9547_v6  }
 0x5da   : > { %v4689_v10 = vsel %vm611_vm2, %v4688_v18, %v4684_v3 }
 0x5db   : > { %v4575_v20 = vpop.permute.xlu1 %4574  ;;  %v4776_v46 = vsel %vm758_vm8, %v4689_v10, %v4775_v8  ;;  %v4769_v10 = vrot.slane %v9636_v32, %v7368_v23 }
 0x5dc   : > { %v4693_v47 = vrot.slane %v4575_v20, %v7370_v19 }
 0x5dd   : > { %4927 = vperm.xlu1 %6795, %v9553_v51  }
 0x5de   : > { %v4698_v26 = vsel %vm611_vm2, %v4697_v15, %v4693_v47 }
 0x5df   : > { %v4777_v62 = vsel %vm760_vm9, %v4698_v26, %v4776_v46  ;;  %v4581_v17 = vpop.permute.xlu1 %4580 }
 0x5e0   : > { %6560 = vmatprep.mubr.msk.f32.mxu1 %vm777_vm10, %v4777_v62 }
 0x5e1   : > { %4933 = vperm.xlu1 %6795, %v9561_v48  }
 0x5e3   : > { %v4587_v38 = vpop.permute.xlu1 %4586 }
 0x5e5   : > { %4939 = vperm.xlu1 %6795, %v9569_v22  }
 0x5e7   : > { %v4593_v57 = vpop.permute.xlu1 %4592 }
 0x5e9   : > { %4945 = vperm.xlu1 %6795, %v9575_v50   ;;  %v9791_v50 = vpop.permute.xlu0 %5209 }
 0x5ed   : > { %4951 = vperm.xlu1 %6795, %v9583_v63   ;;  %v4599_v63 = vpop.permute.xlu1 %4598 }
 0x5ee   : > { %v4729_v25 = vrot.slane %v4599_v63, %v7370_v19 }
 0x5f1   : > { %4957 = vperm.xlu1 %6795, %v9591_v49  }
 0x5f5   : > { %4963 = vperm.xlu1 %6795, %v9599_v40   ;;  %v4702_v40 = vrot.slane %v4581_v17, %v7370_v19 }
 0x5f9   : > { %6796 = vset.pattern.permute.xlu1 %v10744_v37  ;;  %v9794_v37 = vpop.permute.xlu0 %5218 }
 0x5fa   : > { %5206 = vperm.xlu1 %6796, %v9250_v52   ;;  %v4605_v52 = vpop.permute.xlu1 %4604 }
 0x5fb   : > { %v4738_v18 = vrot.slane %v4605_v52, %v7370_v19 }
 0x5fd   : > { %v4743_v3 = vsel %vm611_vm2, %v4742_v2, %v4738_v18  ;;  %v10771_v18 = vld [vmem:[#allocation58_spill] sm:$0xff] }
 0x5fe   : > { %5212 = vperm.xlu1 %6796, %v9695_v31   ;;  %v4611_v49 = vpop.permute.xlu1 %4610 }
 0x5ff   : > { %v4747_v42 = vrot.slane %v4611_v49, %v7370_v19 }
 0x602   : > { %5215 = vperm.xlu1 %6796, %v9261_v29   ;;  %v9798_v29 = vpop.permute.xlu0 %5224  ;;  %v4617_v41 = vpop.permute.xlu1 %4616 }
 0x603   : > { %v4756_v8 = vrot.slane %v4617_v41, %v7370_v19 }
 0x606   : > { %5221 = vperm.xlu1 %6796, %v9277_v27   ;;  %v4706_v27 = vrot.slane %v9604_v14, %v7368_v23  ;;  %v9809_v33 = vpop.permute.xlu0 %5230  ;;  %v4623_v44 = vpop.permute.xlu1 %4622 }
 0x607   : > { %v4765_v20 = vrot.slane %v4623_v44, %v7370_v19  ;;  %v5002_v44 = vrot.slane %v10771_v18, %v7368_v23  ;;  %v9936_v18 = vld [vmem:[%s10350_s8 + $0x58] sm:$0xff] }
 0x608   : > { %v4707_v24 = vsel %vm611_vm2, %v4706_v27, %v4702_v40 }
 0x609   : > { %v4770_v17 = vsel %vm611_vm2, %v4769_v10, %v4765_v20 }
 0x60a   : > { %5227 = vperm.xlu1 %6796, %v9293_v59   ;;  %v4715_v59 = vrot.slane %v9609_v1, %v7368_v23  ;;  %v4733_v1 = vrot.slane %v9620_v12, %v7368_v23  ;;  %v9823_v0 = vpop.permute.xlu0 %5236 }
 0x60c   : > { %v4734_v12 = vsel %vm611_vm2, %v4733_v1, %v4729_v25 }
 0x60e   : > { %5233 = vperm.xlu1 %6796, %v9306_v55   ;;  %v4711_v55 = vrot.slane %v4587_v38, %v7370_v19  ;;  %v9840_v46 = vpop.permute.xlu0 %5242 }
 0x610   : > { %v4716_v14 = vsel %vm611_vm2, %v4715_v59, %v4711_v55 }
 0x612   : > { %5239 = vperm.xlu1 %6796, %v9313_v13   ;;  %v4724_v13 = vrot.slane %v9612_v21, %v7368_v23 }
 0x616   : > { %5245 = vperm.xlu1 %6796, %v9319_v60   ;;  %v4720_v60 = vrot.slane %v4593_v57, %v7370_v19  ;;  %v9853_v57 = vpop.permute.xlu0 %5248 }
 0x618   : > { %v4725_v21 = vsel %vm611_vm2, %v4724_v13, %v4720_v60 }
 0x61a   : > { %5251 = vperm.xlu1 %6796, %v9325_v36   ;;  %v4778_v36 = vsel %vm748_vm3, %v4716_v14, %v4707_v24  ;;  %v9861_v63 = vpop.permute.xlu0 %5254  ;;  %v10770_v14 = vld [vmem:[#allocation9_spill] sm:$0xff] }
 0x61b   : > { %v4971_v1 = vrot.slane %v10770_v14, %v7370_v19 }
 0x61e   : > { %5257 = vperm.xlu1 %6796, %v9331_v28   ;;  %v4779_v28 = vsel %vm750_vm4, %v4725_v21, %v4778_v36  ;;  %v9865_v49 = vpop.permute.xlu0 %5260 }
 0x61f   : > { %v4780_v54 = vsel %vm752_vm5, %v4734_v12, %v4779_v28 }
 0x622   : > { %5263 = vperm.xlu1 %6796, %v9337_v35   ;;  %v4760_v35 = vrot.slane %v9632_v30, %v7368_v23  ;;  %v4752_v30 = vsel %vm611_vm2, %v4751_v53, %v4747_v42  ;;  %v9869_v40 = vpop.permute.xlu0 %5266  ;;  %v10772_v53 = vld [vmem:[#allocation59_spill] sm:$0xff] }
 0x623   : > { %v5011_v42 = vrot.slane %v10772_v53, %v7368_v23 }
 0x624   : > { %v4761_v62 = vsel %vm611_vm2, %v4760_v35, %v4756_v8 }
 0x626   : > { %5269 = vperm.xlu1 %6796, %v9343_v4   ;;  %v4781_v4 = vsel %vm754_vm6, %v4743_v3, %v4780_v54  ;;  %v10773_v3 = vld [vmem:[#allocation60_spill] sm:$0xff] }
 0x627   : > { %v6791_v15 = vpop.permute.xlu1 %6790  ;;  %v4782_v32 = vsel %vm756_vm7, %v4752_v30, %v4781_v4  ;;  %v5020_v8 = vrot.slane %v10773_v3, %v7368_v23 }
 0x628   : > { %v6793_v5 = vunpack.i.h.bf16 %v6791_v15  ;;  %v6792_v47 = vunpack.i.l.bf16 %v6791_v15  ;;  %v4783_v38 = vsel %vm758_vm8, %v4761_v62, %v4782_v32  ;;  %v10775_v32 = vld [vmem:[#allocation15_spill] sm:$0xff] }
 0x62a   : > { %5275 = vperm.xlu1 %6796, %v9357_v56   ;;  %v6641_v26 = vpack.c.bf16 %v6793_v5, %v6792_v47  ;;  %v4784_v56 = vsel %vm760_vm9, %v4770_v17, %v4783_v38  ;;  %v10774_v5 = vld [vmem:[#allocation28_spill] sm:$0xff] }
 0x62b   : > { %v5029_v47 = vrot.slane %v10774_v5, %v7368_v23  ;;  %v10780_v5 = vld [vmem:[#allocation75_spill] sm:$0xff] }
 0x62c   : > { %6642 = vmatprep.subr.bf16.mxu1 %v6641_v26 }
 0x62d   : > { %6644 = vmatpush3.bf16.msra.mxu1 %v6641_v26 }
 0x62e   : > { %5281 = vperm.xlu1 %6796, %v9373_v58   ;;  %6647 = vmatprep.subr.msk.bf16.mxu1 %vm8444_vm14, %v9717_v39 }
 0x630   : > { %6561 = vmatmul.mubr.msk.f32.vlgmr.msra.gmra.mrb[2].mxu1 %vm777_vm10, %v4784_v56 }
 0x631   : > { %6650 = vmatpush3.bf16.msk.msra.mxu1 %vm8444_vm14, %v9717_v39  ;;  %v10767_v39 = vld [vmem:[#allocation11_spill] sm:$0xff] }
 0x632   : > { %5287 = vperm.xlu1 %6796, %v9387_v16   ;;  %v9872_v16 = vpop.permute.xlu0 %5272 }
 0x636   : > { %5293 = vperm.xlu1 %6796, %v9399_v34   ;;  %v9884_v25 = vpop.permute.xlu0 %5278 }
 0x638   : > { %v4877_v52 = vpop.permute.xlu1 %4876 }
 0x639   : > { %v4975_v36 = vrot.slane %v4877_v52, %v7368_v23 }
 0x63a   : > { %5299 = vperm.xlu1 %6796, %v9405_v7   ;;  %v10768_v7 = vld [vmem:[#allocation56_spill] sm:$0xff]  ;;  %v9906_v26 = vpop.permute.xlu0 %5284 }
 0x63b   : > { %v4984_v55 = vrot.slane %v10768_v7, %v7368_v23  ;;  %v4976_v15 = vsel %vm611_vm2, %v4975_v36, %v4971_v1  ;;  %v10777_v36 = vld [vmem:[#allocation3_spill] sm:$0xff] }
 0x63c   : > { %v4880_v27 = vpop.permute.xlu1 %4879 }
 0x63d   : > { %v4980_v13 = vrot.slane %v4880_v27, %v7370_v19  ;;  %v10776_v27 = vld [vmem:[#allocation55_spill] sm:$0xff] }
 0x63e   : > { %6799 = vset.pattern.permute.xlu1 %v10749_v11  ;;  %v10769_v11 = vld [vmem:[#allocation57_spill] sm:$0xff] }
 0x63f   : > { %5550 = vperm.xlu1 %6799, %v9496_v61   ;;  %v4993_v60 = vrot.slane %v10769_v11, %v7368_v23  ;;  %v4985_v28 = vsel %vm611_vm2, %v4984_v55, %v4980_v13 }
 0x640   : > { %v4886_v59 = vpop.permute.xlu1 %4885  ;;  %v5112_v4 = vsel %vm748_vm3, %v4985_v28, %v4976_v15  ;;  %v10779_v15 = vld [vmem:[#allocation33_spill] sm:$0xff] }
 0x641   : > { %v4989_v41 = vrot.slane %v4886_v59, %v7370_v19  ;;  %v5038_v59 = vrot.slane %v10776_v27, %v7368_v23 }
 0x643   : > { %5553 = vperm.xlu1 %6799, %v9695_v31   ;;  %v4994_v35 = vsel %vm611_vm2, %v4993_v60, %v4989_v41  ;;  %v9922_v41 = vpop.permute.xlu0 %5290 }
 0x644   : > { %v4892_v9 = vpop.permute.xlu1 %4891  ;;  %v5113_v62 = vsel %vm750_vm4, %v4994_v35, %v5112_v4  ;;  %v10778_v35 = vld [vmem:[#allocation46_spill] sm:$0xff] }
 0x645   : > { %v4998_v21 = vrot.slane %v4892_v9, %v7370_v19 }
 0x647   : > { %5559 = vperm.xlu1 %6799, %v10767_v39   ;;  %v5003_v10 = vsel %vm611_vm2, %v5002_v44, %v4998_v21  ;;  %v9926_v14 = vpop.permute.xlu0 %5296 }
 0x648   : > { %v4898_v34 = vpop.permute.xlu1 %4897  ;;  %v5114_v38 = vsel %vm752_vm5, %v5003_v10, %v5113_v62  ;;  %v5065_v10 = vrot.slane %v10779_v15, %v7368_v23 }
 0x649   : > { %v5007_v2 = vrot.slane %v4898_v34, %v7370_v19 }
 0x64b   : > { %5595 = vperm.xlu1 %6799, %v9547_v6   ;;  %v5012_v30 = vsel %vm611_vm2, %v5011_v42, %v5007_v2  ;;  %v9931_v2 = vpop.permute.xlu0 %5547 }
 0x64c   : > { %v4904_v24 = vpop.permute.xlu1 %4903  ;;  %v5115_v9 = vsel %vm754_vm6, %v5012_v30, %v5114_v38  ;;  %v10782_v38 = vld [vmem:[#allocation65_spill] sm:$0xff] }
 0x64d   : > { %v5016_v12 = vrot.slane %v4904_v24, %v7370_v19 }
 0x64f   : > { %5601 = vperm.xlu1 %6799, %v9553_v51   ;;  %v5021_v17 = vsel %vm611_vm2, %v5020_v8, %v5016_v12  ;;  %v9939_v28 = vpop.permute.xlu0 %5556 }
 0x650   : > { %v4910_v54 = vpop.permute.xlu1 %4909  ;;  %v5116_v7 = vsel %vm756_vm7, %v5021_v17, %v5115_v9  ;;  %v9960_v17 = vld [vmem:[%s10350_s8 + $0x68] sm:$0xff] }
 0x651   : > { %v5025_v20 = vrot.slane %v4910_v54, %v7370_v19  ;;  %v5056_v54 = vrot.slane %v10778_v35, %v7368_v23 }
 0x653   : > { %5565 = vperm.xlu1 %6799, %v10775_v32   ;;  %v5030_v56 = vsel %vm611_vm2, %v5029_v47, %v5025_v20  ;;  %v5047_v47 = vrot.slane %v10780_v5, %v7368_v23  ;;  %v9998_v5 = vld [vmem:[%s10350_s8 + $0x78] sm:$0xff] }
 0x654   : > { %v4916_v52 = vpop.permute.xlu1 %4915  ;;  %v5117_v13 = vsel %vm758_vm8, %v5030_v56, %v5116_v7  ;;  %v5083_v56 = vrot.slane %v10782_v38, %v7368_v23  ;;  %v10015_v38 = vld [vmem:[%s10350_s8 + $0xf8] sm:$0xff] }
 0x655   : > { %v5034_v34 = vrot.slane %v4916_v52, %v7370_v19 }
 0x657   : > { %5607 = vperm.xlu1 %6799, %v9561_v48   ;;  %v5039_v55 = vsel %vm611_vm2, %v5038_v59, %v5034_v34  ;;  %v10783_v59 = vld [vmem:[#allocation67_spill] sm:$0xff]  ;;  %v9968_v34 = vpop.permute.xlu0 %5562 }
 0x658   : > { %v4922_v11 = vpop.permute.xlu1 %4921  ;;  %v5118_v60 = vsel %vm760_vm9, %v5039_v55, %v5117_v13  ;;  %v5092_v9 = vrot.slane %v10783_v59, %v7368_v23 }
 0x659   : > { %6567 = vmatprep.mubr.msk.f32.mxu1 %vm777_vm10, %v5118_v60  ;;  %v5043_v3 = vrot.slane %v4922_v11, %v7370_v19  ;;  %v10784_v11 = vld [vmem:[#allocation17_spill] sm:$0xff] }
 0x65a   : > { %v5101_v60 = vrot.slane %v10784_v11, %v7368_v23 }
 0x65b   : > { %5571 = vperm.xlu1 %6799, %v9517_v43   ;;  %v5048_v7 = vsel %vm611_vm2, %v5047_v47, %v5043_v3 }
 0x65c   : > { %v4928_v24 = vpop.permute.xlu1 %4927 }
 0x65d   : > { %v5052_v12 = vrot.slane %v4928_v24, %v7370_v19 }
 0x65f   : > { %5613 = vperm.xlu1 %6799, %v9569_v22   ;;  %v5057_v30 = vsel %vm611_vm2, %v5056_v54, %v5052_v12  ;;  %v9982_v12 = vld [vmem:[%s10350_s8 + $0xd8] sm:$0xff]  ;;  %v5110_v54 = vrot.slane %v9787_v45, %v7368_v23 }
 0x660   : > { %v4934_v1 = vpop.permute.xlu1 %4933  ;;  %v5119_v24 = vsel %vm748_vm3, %v5057_v30, %v5048_v7 }
 0x661   : > { %v5061_v53 = vrot.slane %v4934_v1, %v7370_v19 }
 0x663   : > { %6801 = vrot.lane.b32.xlu1 %v10777_v36, %s6907_s26  ;;  %v5066_v52 = vsel %vm611_vm2, %v5065_v10, %v5061_v53  ;;  %v9992_v10 = vpop.permute.xlu0 %5598 }
 0x664   : > { %v4940_v21 = vpop.permute.xlu1 %4939 }
 0x665   : > { %v5070_v8 = vrot.slane %v4940_v21, %v7370_v19  ;;  %v5120_v21 = vsel %vm750_vm4, %v5066_v52, %v5119_v24 }
 0x667   : > { %5580 = vperm.xlu1 %6799, %v9936_v18   ;;  %v10010_v30 = vpop.permute.xlu0 %5604 }
 0x668   : > { %v4946_v44 = vpop.permute.xlu1 %4945 }
 0x669   : > { %v5079_v20 = vrot.slane %v4946_v44, %v7370_v19 }
 0x66b   : > { %5622 = vperm.xlu1 %6799, %v9373_v58   ;;  %v10781_v58 = vld [vmem:[#allocation35_spill] sm:$0xff]  ;;  %v5084_v1 = vsel %vm611_vm2, %v5083_v56, %v5079_v20  ;;  %v10018_v52 = vpop.permute.xlu0 %5568 }
 0x66c   : > { %v4952_v42 = vpop.permute.xlu1 %4951  ;;  %v5074_v4 = vrot.slane %v10781_v58, %v7368_v23 }
 0x66d   : > { %v5088_v62 = vrot.slane %v4952_v42, %v7370_v19 }
 0x66e   : > { %v5075_v55 = vsel %vm611_vm2, %v5074_v4, %v5070_v8  ;;  %v10007_v4 = vld [vmem:[%s10350_s8 + $0xe8] sm:$0xff] }
 0x66f   : > { %5586 = vperm.xlu1 %6799, %v9960_v17   ;;  %v5093_v44 = vsel %vm611_vm2, %v5092_v9, %v5088_v62  ;;  %v5121_v53 = vsel %vm752_vm5, %v5075_v55, %v5120_v21  ;;  %v10023_v9 = vpop.permute.xlu0 %5610 }
 0x670   : > { %v4958_v27 = vpop.permute.xlu1 %4957  ;;  %v5122_v3 = vsel %vm754_vm6, %v5084_v1, %v5121_v53 }
 0x671   : > { %v5097_v13 = vrot.slane %v4958_v27, %v7370_v19  ;;  %v5123_v15 = vsel %vm756_vm7, %v5093_v44, %v5122_v3  ;;  %v10785_v27 = vmov 4  }
 0x673   : > { %5628 = vperm.xlu1 %6799, %v9982_v12   ;;  %v5102_v42 = vsel %vm611_vm2, %v5101_v60, %v5097_v13  ;;  %v10026_v13 = vpop.permute.xlu0 %5574 }
 0x674   : > { %v4964_v35 = vpop.permute.xlu1 %4963  ;;  %v5124_v47 = vsel %vm758_vm8, %v5102_v42, %v5123_v15 }
 0x675   : > { %v5106_v8 = vrot.slane %v4964_v35, %v7370_v19 }
 0x677   : > { %v5111_v20 = vsel %vm611_vm2, %v5110_v54, %v5106_v8  ;;  %5592 = vperm.xlu1 %6799, %v9998_v5   ;;  %v10046_v35 = vpop.permute.xlu0 %5616 }
 0x678   : > { %v5125_v45 = vsel %vm760_vm9, %v5111_v20, %v5124_v47 }
 0x679   : > { %v5207_v58 = vpop.permute.xlu1 %5206  ;;  %6568 = vmatmul.mubr.msk.f32.vlgmr.msra.gmra.mrb[2].mxu1 %vm777_vm10, %v5125_v45 }
 0x67b   : > { %5634 = vperm.xlu1 %6799, %v10007_v4  }
 0x67d   : > { %v5213_v62 = vpop.permute.xlu1 %5212 }
 0x67e   : > { %v5313_v1 = vrot.slane %v5213_v62, %v7370_v19 }
 0x67f   : > { %5640 = vperm.xlu1 %6799, %v10015_v38  }
 0x681   : > { %v5216_v56 = vpop.permute.xlu1 %5215 }
 0x682   : > { %v5317_v11 = vrot.slane %v5216_v56, %v7368_v23  ;;  %v5367_v56 = vrot.slane %v9853_v57, %v7370_v19  ;;  %v5376_v57 = vrot.slane %v9861_v63, %v7370_v19 }
 0x683   : > { %6806 = vset.pattern.permute.xlu1 %v10785_v27 }
 0x684   : > { %5891 = vperm.xlu1 %6806, %v9496_v61   ;;  %v5308_v61 = vrot.slane %v9791_v50, %v7368_v23  ;;  %v5318_v53 = vsel %vm611_vm2, %v5317_v11, %v5313_v1  ;;  %v5340_v50 = vrot.slane %v9809_v33, %v7370_v19 }
 0x685   : > { %v5222_v59 = vpop.permute.xlu1 %5221 }
 0x686   : > { %v5326_v60 = vrot.slane %v5222_v59, %v7368_v23  ;;  %v10067_v59 = vpop.permute.xlu0 %5577 }
 0x688   : > { %5894 = vperm.xlu1 %6806, %v9695_v31   ;;  %v5304_v31 = vrot.slane %v5207_v58, %v7370_v19 }
 0x689   : > { %v5228_v7 = vpop.permute.xlu1 %5227 }
 0x68a   : > { %v5335_v21 = vrot.slane %v5228_v7, %v7368_v23  ;;  %v5309_v8 = vsel %vm611_vm2, %v5308_v61, %v5304_v31  ;;  %v10080_v31 = vpop.permute.xlu0 %5619 }
 0x68b   : > { %v5445_v20 = vsel %vm748_vm3, %v5318_v53, %v5309_v8 }
 0x68c   : > { %5900 = vperm.xlu1 %6806, %v10767_v39   ;;  %v5322_v39 = vrot.slane %v9794_v37, %v7370_v19  ;;  %v5349_v37 = vrot.slane %v9823_v0, %v7370_v19 }
 0x68d   : > { %v5234_v55 = vpop.permute.xlu1 %5233 }
 0x68e   : > { %v5344_v44 = vrot.slane %v5234_v55, %v7368_v23  ;;  %v5327_v54 = vsel %vm611_vm2, %v5326_v60, %v5322_v39  ;;  %v10091_v53 = vpop.permute.xlu0 %5583 }
 0x68f   : > { %v5446_v47 = vsel %vm750_vm4, %v5327_v54, %v5445_v20  ;;  %v5421_v20 = vrot.slane %v9906_v26, %v7370_v19 }
 0x690   : > { %5936 = vperm.xlu1 %6806, %v9547_v6   ;;  %v5331_v6 = vrot.slane %v9798_v29, %v7370_v19  ;;  %v5345_v33 = vsel %vm611_vm2, %v5344_v44, %v5340_v50 }
 0x691   : > { %v5240_v24 = vpop.permute.xlu1 %5239 }
 0x692   : > { %v5353_v42 = vrot.slane %v5240_v24, %v7368_v23  ;;  %v5336_v29 = vsel %vm611_vm2, %v5335_v21, %v5331_v6  ;;  %v5394_v6 = vrot.slane %v9869_v40, %v7370_v19  ;;  %v10102_v40 = vpop.permute.xlu0 %5625 }
 0x693   : > { %v5447_v0 = vsel %vm752_vm5, %v5336_v29, %v5446_v47 }
 0x694   : > { %5942 = vperm.xlu1 %6806, %v9553_v51   ;;  %v5358_v51 = vrot.slane %v9840_v46, %v7370_v19  ;;  %v5354_v45 = vsel %vm611_vm2, %v5353_v42, %v5349_v37  ;;  %v5448_v46 = vsel %vm754_vm6, %v5345_v33, %v5447_v0 }
 0x695   : > { %v5246_v3 = vpop.permute.xlu1 %5245  ;;  %v5449_v7 = vsel %vm756_vm7, %v5354_v45, %v5448_v46 }
 0x696   : > { %v5362_v15 = vrot.slane %v5246_v3, %v7368_v23  ;;  %v10116_v47 = vpop.permute.xlu0 %5589 }
 0x698   : > { %5906 = vperm.xlu1 %6806, %v10775_v32   ;;  %v5363_v58 = vsel %vm611_vm2, %v5362_v15, %v5358_v51 }
 0x699   : > { %v5252_v62 = vpop.permute.xlu1 %5251  ;;  %v5450_v32 = vsel %vm758_vm8, %v5363_v58, %v5449_v7  ;;  %v5430_v58 = vrot.slane %v9922_v41, %v7370_v19 }
 0x69a   : > { %v5371_v27 = vrot.slane %v5252_v62, %v7368_v23  ;;  %v10126_v26 = vpop.permute.xlu0 %5631 }
 0x69c   : > { %v5372_v55 = vsel %vm611_vm2, %v5371_v27, %v5367_v56  ;;  %5948 = vperm.xlu1 %6806, %v9561_v48   ;;  %v5385_v48 = vrot.slane %v9865_v49, %v7370_v19 }
 0x69d   : > { %v5258_v11 = vpop.permute.xlu1 %5257  ;;  %v5451_v60 = vsel %vm760_vm9, %v5372_v55, %v5450_v32 }
 0x69e   : > { %v5380_v24 = vrot.slane %v5258_v11, %v7368_v23  ;;  %6574 = vmatprep.mubr.msk.f32.mxu1 %vm777_vm10, %v5451_v60  ;;  %v10135_v11 = vpop.permute.xlu0 %5637 }
 0x6a0   : > { %v5381_v61 = vsel %vm611_vm2, %v5380_v24, %v5376_v57  ;;  %5912 = vperm.xlu1 %6806, %v9517_v43  }
 0x6a1   : > { %v5264_v1 = vpop.permute.xlu1 %5263 }
 0x6a2   : > { %v5389_v21 = vrot.slane %v5264_v1, %v7368_v23 }
 0x6a4   : > { %v5390_v39 = vsel %vm611_vm2, %v5389_v21, %v5385_v48  ;;  %5954 = vperm.xlu1 %6806, %v9569_v22   ;;  %v5403_v22 = vrot.slane %v9872_v16, %v7370_v19  ;;  %v6893_v16 = vld [vmem:[%s10350_s8 + $0xc8] sm:$0xff] }
 0x6a5   : > { %v5452_v63 = vsel %vm748_vm3, %v5390_v39, %v5381_v61  ;;  %v5270_v44 = vpop.permute.xlu1 %5269  ;;  %v10786_v39 = vmov 0  }
 0x6a6   : > { %v5398_v43 = vrot.slane %v5270_v44, %v7368_v23 }
 0x6a8   : > { %v5399_v42 = vsel %vm611_vm2, %v5398_v43, %v5394_v6  ;;  %6808 = vrot.lane.b32.xlu1 %v10777_v36, %s6910_s13  ;;  %v5412_v36 = vrot.slane %v9884_v25, %v7370_v19 }
 0x6a9   : > { %v5453_v49 = vsel %vm750_vm4, %v5399_v42, %v5452_v63  ;;  %v5276_v50 = vpop.permute.xlu1 %5275 }
 0x6aa   : > { %v5407_v54 = vrot.slane %v5276_v50, %v7368_v23 }
 0x6ac   : > { %v5408_v3 = vsel %vm611_vm2, %v5407_v54, %v5403_v22  ;;  %5921 = vperm.xlu1 %6806, %v9936_v18   ;;  %v5730_v22 = vrot.slane %v10010_v30, %v7368_v23 }
 0x6ad   : > { %v5454_v37 = vsel %vm752_vm5, %v5408_v3, %v5453_v49  ;;  %v5282_v8 = vpop.permute.xlu1 %5281 }
 0x6ae   : > { %v5416_v29 = vrot.slane %v5282_v8, %v7368_v23 }
 0x6b0   : > { %v5417_v15 = vsel %vm611_vm2, %v5416_v29, %v5412_v36  ;;  %5963 = vperm.xlu1 %6806, %v6893_v16   ;;  %v5739_v29 = vrot.slane %v10023_v9, %v7368_v23 }
 0x6b1   : > { %v5455_v51 = vsel %vm754_vm6, %v5417_v15, %v5454_v37  ;;  %v5288_v18 = vpop.permute.xlu1 %5287 }
 0x6b2   : > { %v5425_v33 = vrot.slane %v5288_v18, %v7368_v23 }
 0x6b4   : > { %v5426_v25 = vsel %vm611_vm2, %v5425_v33, %v5421_v20  ;;  %5927 = vperm.xlu1 %6806, %v9960_v17   ;;  %v5439_v17 = vrot.slane %v9926_v14, %v7370_v19  ;;  %v5658_v14 = vrot.slane %v9939_v28, %v7368_v23  ;;  %v4486_v28 = vld [vmem:[%s10351_s9 + $0x8] sm:$0xff] }
 0x6b5   : > { %v5456_v45 = vsel %vm756_vm7, %v5426_v25, %v5455_v51  ;;  %v5294_v0 = vpop.permute.xlu1 %5293  ;;  %6235 = vperm.xlu0 %6818, %v4486_v28   ;;  %v5748_v25 = vrot.slane %v10046_v35, %v7368_v23  ;;  %v5753_v35 = vrot.slane %v10080_v31, %v7370_v19 }
 0x6b6   : > { %v5434_v62 = vrot.slane %v5294_v0, %v7368_v23 }
 0x6b8   : > { %v5435_v56 = vsel %vm611_vm2, %v5434_v62, %v5430_v58  ;;  %5969 = vperm.xlu1 %6806, %v9982_v12   ;;  %v5645_v12 = vrot.slane %v9931_v2, %v7370_v19  ;;  %v5667_v2 = vrot.slane %v9968_v34, %v7368_v23  ;;  %v5721_v34 = vrot.slane %v9992_v10, %v7368_v23 }
 0x6b9   : > { %v5457_v46 = vsel %vm758_vm8, %v5435_v56, %v5456_v45  ;;  %v5300_v27 = vpop.permute.xlu1 %5299 }
 0x6ba   : > { %v5443_v7 = vrot.slane %v5300_v27, %v7368_v23 }
 0x6bc   : > { %v5444_v55 = vsel %vm611_vm2, %v5443_v7, %v5439_v17  ;;  %5933 = vperm.xlu1 %6806, %v9998_v5   ;;  %v10145_v5 = vpop.permute.xlu0 %5888 }
 0x6bd   : > { %v5458_v41 = vsel %vm760_vm9, %v5444_v55, %v5457_v46 }
 0x6be   : > { %v5551_v32 = vpop.permute.xlu1 %5550 }
 0x6bf   : > { %v5649_v60 = vrot.slane %v5551_v32, %v7368_v23 }
 0x6c0   : > { %5975 = vperm.xlu1 %6806, %v10007_v4   ;;  %v10164_v43 = vpop.permute.xlu0 %5897 }
 0x6c1   : > { %v5650_v61 = vsel %vm611_vm2, %v5649_v60, %v5645_v12 }
 0x6c2   : > { %v5554_v57 = vpop.permute.xlu1 %5553 }
 0x6c3   : > { %v5654_v24 = vrot.slane %v5554_v57, %v7370_v19 }
 0x6c4   : > { %5981 = vperm.xlu1 %6806, %v10015_v38   ;;  %v4485_v38 = vld [vmem:[%s10351_s9] sm:$0xff]  ;;  %v10171_v3 = vpop.permute.xlu0 %5903 }
 0x6c5   : > { %v5659_v1 = vsel %vm611_vm2, %v5658_v14, %v5654_v24 }
 0x6c6   : > { %v5786_v4 = vsel %vm748_vm3, %v5659_v1, %v5650_v61  ;;  %v5560_v48 = vpop.permute.xlu1 %5559  ;;  %v5676_v1 = vrot.slane %v10018_v52, %v7368_v23  ;;  %v5699_v52 = vrot.slane %v10091_v53, %v7370_v19 }
 0x6c7   : > { %v5663_v21 = vrot.slane %v5560_v48, %v7370_v19 }
 0x6c8   : > { %6817 = vset.pattern.permute.xlu1 %v10786_v39  ;;  %v10177_v15 = vpop.permute.xlu0 %5939 }
 0x6c9   : > { %v5668_v63 = vsel %vm611_vm2, %v5667_v2, %v5663_v21  ;;  %6230 = vperm.xlu1 %6817, %v4485_v38   ;;  %v5690_v2 = vrot.slane %v10067_v59, %v7370_v19  ;;  %v5762_v21 = vrot.slane %v10102_v40, %v7370_v19 }
 0x6ca   : > { %v5787_v44 = vsel %vm750_vm4, %v5668_v63, %v5786_v4  ;;  %v5596_v6 = vpop.permute.xlu1 %5595  ;;  %v5685_v4 = vrot.slane %v10026_v13, %v7368_v23 }
 0x6cb   : > { %v5717_v42 = vrot.slane %v5596_v6, %v7370_v19 }
 0x6cc   : > { %v10182_v20 = vpop.permute.xlu0 %5945 }
 0x6cd   : > { %v5722_v49 = vsel %vm611_vm2, %v5721_v34, %v5717_v42 }
 0x6ce   : > { %v5602_v50 = vpop.permute.xlu1 %5601 }
 0x6cf   : > { %v5726_v54 = vrot.slane %v5602_v50, %v7370_v19 }
 0x6d0   : > { %v10189_v62 = vpop.permute.xlu0 %5909 }
 0x6d1   : > { %v5731_v37 = vsel %vm611_vm2, %v5730_v22, %v5726_v54 }
 0x6d2   : > { %v5793_v8 = vsel %vm748_vm3, %v5731_v37, %v5722_v49  ;;  %v5566_v36 = vpop.permute.xlu1 %5565  ;;  %v5708_v49 = vrot.slane %v10116_v47, %v7370_v19 }
 0x6d3   : > { %v5672_v24 = vrot.slane %v5566_v36, %v7370_v19  ;;  %v5771_v36 = vrot.slane %v10126_v26, %v7370_v19 }
 0x6d4   : > { %v10191_v7 = vpop.permute.xlu0 %5951 }
 0x6d5   : > { %v5677_v28 = vsel %vm611_vm2, %v5676_v1, %v5672_v24 }
 0x6d6   : > { %v5608_v10 = vpop.permute.xlu1 %5607  ;;  %v5788_v59 = vsel %vm752_vm5, %v5677_v28, %v5787_v44 }
 0x6d7   : > { %v5735_v16 = vrot.slane %v5608_v10, %v7370_v19 }
 0x6d8   : > { %v10199_v14 = vpop.permute.xlu0 %5915 }
 0x6d9   : > { %v5740_v51 = vsel %vm611_vm2, %v5739_v29, %v5735_v16 }
 0x6da   : > { %v5794_v30 = vsel %vm750_vm4, %v5740_v51, %v5793_v8  ;;  %v5572_v18 = vpop.permute.xlu1 %5571 }
 0x6db   : > { %v5681_v61 = vrot.slane %v5572_v18, %v7370_v19 }
 0x6dc   : > { %v10218_v63 = vpop.permute.xlu0 %5957 }
 0x6dd   : > { %v5686_v38 = vsel %vm611_vm2, %v5685_v4, %v5681_v61  ;;  %v6071_v4 = vrot.slane %v10182_v20, %v7368_v23 }
 0x6de   : > { %v5614_v33 = vpop.permute.xlu1 %5613  ;;  %v5789_v53 = vsel %vm754_vm6, %v5686_v38, %v5788_v59 }
 0x6df   : > { %v5744_v45 = vrot.slane %v5614_v33, %v7370_v19 }
 0x6e0   : > { %v10235_v10 = vpop.permute.xlu0 %5918 }
 0x6e1   : > { %v5749_v0 = vsel %vm611_vm2, %v5748_v25, %v5744_v45 }
 0x6e2   : > { %v5795_v9 = vsel %vm752_vm5, %v5749_v0, %v5794_v30  ;;  %v6802_v58 = vpop.permute.xlu1 %6801  ;;  %v5780_v30 = vrot.slane %v10135_v11, %v7370_v19 }
 0x6e3   : > { %v6804_v56 = vunpack.i.h.bf16 %v6802_v58  ;;  %v6803_v46 = vunpack.i.l.bf16 %v6802_v58 }
 0x6e4   : > { %v10244_v33 = vpop.permute.xlu0 %5960 }
 0x6e5   : > { %v6651_v27 = vpack.c.bf16 %v6804_v56, %v6803_v46  ;;  %v5986_v56 = vrot.slane %v10145_v5, %v7370_v19  ;;  %v5999_v46 = vrot.slane %v10164_v43, %v7368_v23 }
 0x6e6   : > { %v5581_v17 = vpop.permute.xlu1 %5580 }
 0x6e7   : > { %6652 = vmatprep.subr.bf16.mxu1 %v6651_v27  ;;  %v5694_v31 = vrot.slane %v5581_v17, %v7368_v23 }
 0x6e8   : > { %6654 = vmatpush3.bf16.msra.mxu1 %v6651_v27 }
 0x6e9   : > { %v5695_v13 = vsel %vm611_vm2, %v5694_v31, %v5690_v2  ;;  %v6062_v31 = vrot.slane %v10177_v15, %v7368_v23 }
 0x6ea   : > { %v5623_v55 = vpop.permute.xlu1 %5622  ;;  %v5790_v22 = vsel %vm756_vm7, %v5695_v13, %v5789_v53 }
 0x6eb   : > { %v5757_v32 = vrot.slane %v5623_v55, %v7368_v23  ;;  %6575 = vmatmul.mubr.msk.f32.vlgmr.msra.gmra.mrb[2].mxu1 %vm777_vm10, %v5458_v41 }
 0x6ed   : > { %v5758_v12 = vsel %vm611_vm2, %v5757_v32, %v5753_v35  ;;  %v6008_v32 = vrot.slane %v10171_v3, %v7368_v23 }
 0x6ee   : > { %v5796_v60 = vsel %vm754_vm6, %v5758_v12, %v5795_v9  ;;  %v5587_v57 = vpop.permute.xlu1 %5586  ;;  %v5925_v9 = vpop.permute.xlu0 %5924 }
 0x6ef   : > { %v5703_v41 = vrot.slane %v5587_v57, %v7368_v23 }
 0x6f1   : > { %v5704_v34 = vsel %vm611_vm2, %v5703_v41, %v5699_v52 }
 0x6f2   : > { %v5629_v48 = vpop.permute.xlu1 %5628  ;;  %v5791_v37 = vsel %vm758_vm8, %v5704_v34, %v5790_v22 }
 0x6f3   : > { %v5766_v39 = vrot.slane %v5629_v48, %v7368_v23 }
 0x6f5   : > { %v5767_v6 = vsel %vm611_vm2, %v5766_v39, %v5762_v21 }
 0x6f6   : > { %v5797_v40 = vsel %vm756_vm7, %v5767_v6, %v5796_v60  ;;  %v5593_v42 = vpop.permute.xlu1 %5592  ;;  %v10260_v60 = vpop.permute.xlu0 %5966 }
 0x6f7   : > { %v5712_v50 = vrot.slane %v5593_v42, %v7368_v23 }
 0x6f9   : > { %v5713_v54 = vsel %vm611_vm2, %v5712_v50, %v5708_v49 }
 0x6fa   : > { %v5635_v8 = vpop.permute.xlu1 %5634  ;;  %v5792_v44 = vsel %vm760_vm9, %v5713_v54, %v5791_v37  ;;  %v5931_v61 = vpop.permute.xlu0 %5930 }
 0x6fb   : > { %v5775_v47 = vrot.slane %v5635_v8, %v7368_v23  ;;  %6581 = vmatprep.mubr.msk.f32.mxu1 %vm777_vm10, %v5792_v44  ;;  %v6017_v8 = vrot.slane %v10189_v62, %v7368_v23 }
 0x6fd   : > { %v5776_v29 = vsel %vm611_vm2, %v5775_v47, %v5771_v36  ;;  %v6026_v36 = vrot.slane %v10199_v14, %v7368_v23 }
 0x6fe   : > { %v5798_v16 = vsel %vm758_vm8, %v5776_v29, %v5797_v40  ;;  %v5641_v51 = vpop.permute.xlu1 %5640  ;;  %v10273_v28 = vpop.permute.xlu0 %5972 }
 0x6ff   : > { %v5784_v18 = vrot.slane %v5641_v51, %v7368_v23 }
 0x701   : > { %v5785_v26 = vsel %vm611_vm2, %v5784_v18, %v5780_v30  ;;  %v6040_v30 = vrot.slane %v5925_v9, %v7370_v19  ;;  %v6080_v9 = vrot.slane %v10191_v7, %v7368_v23 }
 0x702   : > { %v5799_v25 = vsel %vm760_vm9, %v5785_v26, %v5798_v16  ;;  %v10275_v52 = vpop.permute.xlu0 %5978  ;;  %v6031_v16 = vrot.slane %v10235_v10, %v7370_v19 }
 0x703   : > { %v5892_v45 = vpop.permute.xlu1 %5891 }
 0x704   : > { %v5990_v0 = vrot.slane %v5892_v45, %v7368_v23 }
 0x706   : > { %v5991_v27 = vsel %vm611_vm2, %v5990_v0, %v5986_v56  ;;  %v6814_v15 = vpop.permute.xlu0 %6813  ;;  %v6049_v0 = vrot.slane %v5931_v61, %v7370_v19 }
 0x707   : > { %v5895_v58 = vpop.permute.xlu1 %5894  ;;  %v6816_v59 = vunpack.i.h.bf16 %v6814_v15  ;;  %v6815_v20 = vunpack.i.l.bf16 %v6814_v15 }
 0x708   : > { %v5995_v11 = vrot.slane %v5895_v58, %v7370_v19 }
 0x709   : > { %v6659_v53 = vpack.c.bf16 %v6816_v59, %v6815_v20 }
 0x70a   : > { %v6000_v17 = vsel %vm611_vm2, %v5999_v46, %v5995_v11 }
 0x70b   : > { %v6127_v55 = vsel %vm748_vm3, %v6000_v17, %v5991_v27  ;;  %v5901_v35 = vpop.permute.xlu1 %5900  ;;  %v6089_v27 = vrot.slane %v10218_v63, %v7368_v23 }
 0x70c   : > { %v6004_v12 = vrot.slane %v5901_v35, %v7370_v19 }
 0x70e   : > { %v6009_v5 = vsel %vm611_vm2, %v6008_v32, %v6004_v12  ;;  %v6094_v32 = vrot.slane %v10244_v33, %v7370_v19 }
 0x70f   : > { %v6128_v43 = vsel %vm750_vm4, %v6009_v5, %v6127_v55  ;;  %v5937_v57 = vpop.permute.xlu1 %5936 }
 0x710   : > { %v6058_v24 = vrot.slane %v5937_v57, %v7370_v19 }
 0x712   : > { %v6063_v41 = vsel %vm611_vm2, %v6062_v31, %v6058_v24  ;;  %v6112_v24 = vrot.slane %v10273_v28, %v7370_v19 }
 0x713   : > { %v5943_v1 = vpop.permute.xlu1 %5942 }
 0x714   : > { %v6067_v3 = vrot.slane %v5943_v1, %v7370_v19 }
 0x716   : > { %v6072_v48 = vsel %vm611_vm2, %v6071_v4, %v6067_v3  ;;  %v6121_v3 = vrot.slane %v10275_v52, %v7370_v19 }
 0x717   : > { %v6134_v2 = vsel %vm748_vm3, %v6072_v48, %v6063_v41  ;;  %v5907_v21 = vpop.permute.xlu1 %5906 }
 0x718   : > { %v6013_v54 = vrot.slane %v5907_v21, %v7370_v19 }
 0x71a   : > { %v6018_v51 = vsel %vm611_vm2, %v6017_v8, %v6013_v54 }
 0x71b   : > { %v5949_v39 = vpop.permute.xlu1 %5948  ;;  %v6129_v62 = vsel %vm752_vm5, %v6018_v51, %v6128_v43  ;;  %v6103_v43 = vrot.slane %v10260_v60, %v7370_v19 }
 0x71f   : > { %v5913_v38 = vpop.permute.xlu1 %5912 }
 0x720   : > { %v6022_v37 = vrot.slane %v5913_v38, %v7370_v19 }
 0x722   : > { %v6027_v18 = vsel %vm611_vm2, %v6026_v36, %v6022_v37 }
 0x723   : > { %v5955_v13 = vpop.permute.xlu1 %5954  ;;  %v6130_v58 = vsel %vm754_vm6, %v6027_v18, %v6129_v62 }
 0x724   : > { %v6085_v10 = vrot.slane %v5955_v13, %v7370_v19 }
 0x726   : > { %v6090_v57 = vsel %vm611_vm2, %v6089_v27, %v6085_v10 }
 0x727   : > { %v6809_v6 = vpop.permute.xlu1 %6808 }
 0x728   : > { %v6811_v34 = vunpack.i.h.bf16 %v6809_v6  ;;  %v6810_v40 = vunpack.i.l.bf16 %v6809_v6 }
 0x72a   : > { %v6655_v42 = vpack.c.bf16 %v6811_v34, %v6810_v40 }
 0x72b   : > { %v5922_v49 = vpop.permute.xlu1 %5921 }
 0x72c   : > { %6656 = vmatprep.subr.bf16.mxu1 %v6655_v42  ;;  %v6035_v44 = vrot.slane %v5922_v49, %v7368_v23 }
 0x72d   : > { %6658 = vmatpush3.bf16.msra.mxu1 %v6655_v42 }
 0x72e   : > { %6660 = vmatprep.subr.bf16.mxu1 %v6659_v53  ;;  %v6036_v26 = vsel %vm611_vm2, %v6035_v44, %v6031_v16 }
 0x72f   : > { %v5964_v50 = vpop.permute.xlu1 %5963  ;;  %v6131_v46 = vsel %vm756_vm7, %v6036_v26, %v6130_v58 }
 0x730   : > { %6582 = vmatmul.mubr.msk.f32.vlgmr.msra.gmra.mrb[2].mxu1 %vm777_vm10, %v5799_v25  ;;  %v6076_v25 = vrot.slane %v5949_v39, %v7370_v19  ;;  %v6098_v11 = vrot.slane %v5964_v50, %v7368_v23 }
 0x731   : > { %6662 = vmatpush3.bf16.msra.mxu1 %v6659_v53 }
 0x732   : > { %v6081_v12 = vsel %vm611_vm2, %v6080_v9, %v6076_v25  ;;  %v6099_v61 = vsel %vm611_vm2, %v6098_v11, %v6094_v32 }
 0x733   : > { %v5928_v22 = vpop.permute.xlu1 %5927  ;;  %v6135_v33 = vsel %vm750_vm4, %v6081_v12, %v6134_v2 }
 0x734   : > { %v6044_v47 = vrot.slane %v5928_v22, %v7368_v23  ;;  %v6136_v31 = vsel %vm752_vm5, %v6090_v57, %v6135_v33  ;;  %v6236_v38 = vpop.permute.xlu0 %6235 }
 0x735   : > { %v6137_v41 = vsel %vm754_vm6, %v6099_v61, %v6136_v31 }
 0x736   : > { %v6045_v14 = vsel %vm611_vm2, %v6044_v47, %v6040_v30 }
 0x737   : > { %v5970_v29 = vpop.permute.xlu1 %5969  ;;  %v6132_v35 = vsel %vm758_vm8, %v6045_v14, %v6131_v46 }
 0x738   : > { %v6107_v17 = vrot.slane %v5970_v29, %v7368_v23 }
 0x73a   : > { %v6108_v1 = vsel %vm611_vm2, %v6107_v17, %v6103_v43 }
 0x73b   : > { %v5934_v45 = vpop.permute.xlu1 %5933  ;;  %v6138_v21 = vsel %vm756_vm7, %v6108_v1, %v6137_v41 }
 0x73c   : > { %v6053_v56 = vrot.slane %v5934_v45, %v7368_v23 }
 0x73e   : > { %v6054_v55 = vsel %vm611_vm2, %v6053_v56, %v6049_v0 }
 0x73f   : > { %v5976_v5 = vpop.permute.xlu1 %5975  ;;  %v6133_v7 = vsel %vm760_vm9, %v6054_v55, %v6132_v35 }
 0x740   : > { %v6116_v63 = vrot.slane %v5976_v5, %v7368_v23  ;;  %6588 = vmatprep.mubr.msk.f32.mxu1 %vm777_vm10, %v6133_v7 }
 0x742   : > { %v6117_v4 = vsel %vm611_vm2, %v6116_v63, %v6112_v24 }
 0x743   : > { %v5982_v60 = vpop.permute.xlu1 %5981  ;;  %v6139_v28 = vsel %vm758_vm8, %v6117_v4, %v6138_v21 }
 0x744   : > { %v6125_v48 = vrot.slane %v5982_v60, %v7368_v23 }
 0x746   : > { %v6126_v2 = vsel %vm611_vm2, %v6125_v48, %v6121_v3 }
 0x747   : > { %v6140_v39 = vsel %vm760_vm9, %v6126_v2, %v6139_v28 }
 0x748   : > { %6589 = vmatmul.mubr.msk.f32.vlgmr.msra.gmra.mrb[2].mxu1 %vm777_vm10, %v6140_v39  ;;  %v6231_v13 = vpop.permute.xlu1 %6230 }
 0x81b   : > { %v6590_v15 = vpop.f32.mrb[2].mxu1 }
 0x81c   : > { %v6239_v6 = vadd.f32 %v6590_v15, %v6236_v38  ;;  %v6217_v19 = vpop.f32.mrb[3].mxu1 }
 0x81d   : > { %v6238_v52 = vadd.f32 %v6231_v13, %v6217_v19 }
 0x81e   : > { %v6241_v59 = vsub.f32 0.0, %v6239_v6 }
 0x81f   : > { %v6240_v20 = vsub.f32 0.0, %v6238_v52 }
 0x820   : > { %v6244_v23 = vmul.f32 1.442695, %v6241_v59 }
 0x821   : > { %v6242_v34 = vmul.f32 1.442695, %v6240_v20 }
 0x822   : > { %6827 = vpow2.f32 %v6244_v23 }
 0x823   : > { %6829 = vpow2.f32 %v6242_v34 }
 0x82c   : > { %v6828_v40 = vpop.eup %6827 }
 0x82d   : > { %v6830_v42 = vpop.eup %6829  ;;  %v6247_v49 = vadd.f32 1.0, %v6828_v40 }
 0x82e   : > { %v6246_v53 = vadd.f32 1.0, %v6830_v42 }
 0x82f   : > { %6831 = vrcp.f32 %v6247_v49 }
 0x830   : > { %6833 = vrcp.f32 %v6246_v53 }
 0x839   : > { %v6832_v50 = vpop.eup %6831 }
 0x83a   : > { %v6834_v22 = vpop.eup %6833  ;;  %6255 = vst.msk [vmem:[%s419_s24 + $0x8] sm:$0xff] %vm777_vm10, %v6832_v50 }
 0x83b   : > { %6254 = vst.msk [vmem:[%s419_s24] sm:$0xff] %vm777_vm10, %v6834_v22 }
 0x83c PF: > { %s22_s17 = sadd.s32 1, %s6900_s17  }
 0x83d   : > { %p19_p4 = scmp.ge.s32.totalorder %s22_s17, 4  }
 0x83f   :  { %21 = sbr.rel (!%p19_p4) target bundleno = 1 (0x1), region = 105 }

</bundles_post_ra>
